<compile_context>
chip_gen: v5e
topology: v5e:2x2
jax: 0.10.0
libtpu: 0.0.40
codegen_flags: <defaults>
</compile_context>

<pallas_src>
import functools

import numpy as np
import jax
import jax.numpy as jnp
from jax.experimental import pallas as pl
from jax.experimental.pallas import tpu as pltpu

VMEM_SPEC = pl.BlockSpec(memory_space=pltpu.MemorySpace.VMEM)
H = W = 32            # spatial size required by the module (fc1 expects 8*8*(n_chans1//2))


# ------------------------------ fused kernel -------------------------------

def _net_kernel(x_ref,
                w1_ref, cb1_ref, red1_ref, bc1_ref, g1_ref, be1_ref,
                w2_ref, cb2_ref, red2_ref, bc2_ref, g2_ref, be2_ref,
                wf1_ref, bf1_ref, wf2_ref, bf2_ref,
                out_ref, s1_ref, s2_ref, *, n, c1, c2, eps=1e-5):
    f32 = jnp.float32

    def mxu(a, b_ref):
        # bf16 MXU operands (halves weight DMA / vreg pressure), f32 accumulation.
        return jnp.dot(a.astype(jnp.bfloat16), b_ref[...], preferred_element_type=f32)

    def bn_tanh(y, red_ref, bc_ref, gamma_ref, beta_ref, count):
        # nn.BatchNorm2d train mode (biased batch variance, eps=1e-5).  Two-pass
        # (centered) variance per the correctness feedback; all stats stay f32.
        inv = 1.0 / float(count)
        s = jnp.sum(y, axis=0, keepdims=True)                                    # (1, L)
        mean_c = jnp.dot(s, red_ref[...], preferred_element_type=f32) * inv      # (1, C)
        mean_l = jnp.dot(mean_c, bc_ref[...], preferred_element_type=f32)        # (1, L)
        d = y - mean_l
        ss = jnp.sum(d * d, axis=0, keepdims=True)
        var_c = jnp.dot(ss, red_ref[...], preferred_element_type=f32) * inv
        scale_c = jax.lax.rsqrt(var_c + eps) * gamma_ref[...]
        scale_l = jnp.dot(scale_c, bc_ref[...], preferred_element_type=f32)
        return jnp.tanh(d * scale_l + beta_ref[...])

    # ---- input slab: raw NCHW copied into a vertically zero-padded VMEM scratch ----
    s1_ref[...] = jnp.zeros(s1_ref.shape, f32)
    s1_ref[:, :, 1:H + 1, :] = x_ref[...]

    # ---- conv1: 9 static (cin, kh) shifted views, ONE MXU matmul ----
    pieces = [s1_ref[:, ci, kh:kh + H, :] for ci in range(3) for kh in range(3)]
    xk = jnp.concatenate(pieces, axis=-1).reshape(n * H, 9 * W)       # (N*32, 288)
    y1 = mxu(xk, w1_ref) + cb1_ref[...]                               # (N*32, 32*c1)
    a1 = bn_tanh(y1, red1_ref, bc1_ref, g1_ref, be1_ref, n * H * W)

    # ---- maxpool #1 (VPU/XLU only) fused with the conv-2 slab assembly ----
    hshift = jnp.concatenate([a1[:, c1:], a1[:, :c1]], axis=-1)       # lane shift by +c1
    hmax = jnp.maximum(a1, hshift)              # column pair-max (valid at even columns)
    h3 = hmax.reshape(n, H, W * c1)
    s2_ref[:, 0, :] = jnp.zeros((n, W * c1), f32)                     # top zero border
    s2_ref[:, H // 2 + 1, :] = jnp.zeros((n, W * c1), f32)            # bottom zero border
    for i in range(H // 2):                     # row pair-max + stride-2 downsample
        s2_ref[:, 1 + i, :] = jnp.maximum(h3[:, 2 * i, :], h3[:, 2 * i + 1, :])

    # ---- conv2: 3 static kh views, ONE MXU matmul (odd pooled-column lanes carry
    #      finite garbage and are zeroed by construction of w2) ----
    pieces2 = [s2_ref[:, kh:kh + H // 2, :] for kh in range(3)]
    xk2 = jnp.concatenate(pieces2, axis=-1).reshape(n * (H // 2), 3 * W * c1)   # (N*16, 768)
    y2 = mxu(xk2, w2_ref) + cb2_ref[...]                              # (N*16, 16*c2)
    a2 = bn_tanh(y2, red2_ref, bc2_ref, g2_ref, be2_ref, n * (H // 2) * (W // 2))

    # ---- maxpool #2 + NCHW flatten: pure value slices / lane concat, zero MXU work ----
    hshift2 = jnp.concatenate([a2[:, c2:], a2[:, :c2]], axis=-1)
    hmax2 = jnp.maximum(a2, hshift2)
    g3 = hmax2.reshape(n, H // 2, (W // 2) * c2)
    rows = [jnp.maximum(g3[:, 2 * i, :], g3[:, 2 * i + 1, :]) for i in range(H // 4)]
    flat = jnp.concatenate(rows, axis=-1)                             # (N, 8*16*c2)

    # ---- head: single fc1 matmul (flatten permutation folded into wf1) -> tanh -> fc2 ----
    f = jnp.tanh(mxu(flat, wf1_ref) + bf1_ref[...])
    out_ref[...] = mxu(f, wf2_ref) + bf2_ref[...]


# --------------------------- forward-pass wrapper ---------------------------

def net_batchnorm_forward(consts, x, *, n_chans1):
    n = x.shape[0]
    c1, c2 = n_chans1, n_chans1 // 2

    kernel = functools.partial(_net_kernel, n=n, c1=c1, c2=c2)

    flops = (2 * n * H * (9 * W) * (W * c1)
             + 2 * n * (H // 2) * (3 * W * c1) * ((W // 2) * c2)
             + 2 * n * ((H // 4) * (W // 2) * c2) * 32
             + 2 * n * 32 * 2)
    transcendentals = n * (H * W * c1 + (H // 2) * (W // 2) * c2 + 32)
    bytes_accessed = (x.size * x.dtype.itemsize
                      + sum(int(np.prod(c.shape)) * c.dtype.itemsize for c in consts)
                      + n * 2 * 4)

    return pl.pallas_call(
        kernel,
        out_shape=jax.ShapeDtypeStruct((n, 2), jnp.float32),
        in_specs=[VMEM_SPEC] * (1 + len(consts)),
        out_specs=VMEM_SPEC,
        scratch_shapes=[
            pltpu.VMEM((n, 3, H + 2, W), jnp.float32),          # padded conv-1 input slab
            pltpu.VMEM((n, H // 2 + 2, W * c1), jnp.float32),    # padded conv-2 input slab
        ],
        compiler_params=pltpu.CompilerParams(vmem_limit_bytes=32 * 1024 * 1024),
        cost_estimate=pl.CostEstimate(flops=int(flops),
                                      transcendentals=int(transcendentals),
                                      bytes_accessed=int(bytes_accessed)),
    )(x, *consts)


# --------------------- parameter init & constant packing --------------------

def init_params(key, n_chans1):
    # PyTorch-like synthetic init; BN gamma/beta made non-trivial so the check is meaningful.
    c1, c2 = n_chans1, n_chans1 // 2
    ks = jax.random.split(key, 12)

    def u(k, shape, fan_in):
        b = 1.0 / np.sqrt(float(fan_in))
        return jax.random.uniform(k, shape, jnp.float32, -b, b)

    return {
        "conv1_w": u(ks[0], (c1, 3, 3, 3), 3 * 9),
        "conv1_b": u(ks[1], (c1,), 3 * 9),
        "bn1_gamma": jax.random.uniform(ks[2], (c1,), jnp.float32, 0.5, 1.5),
        "bn1_beta": jax.random.uniform(ks[3], (c1,), jnp.float32, -0.5, 0.5),
        "conv2_w": u(ks[4], (c2, c1, 3, 3), c1 * 9),
        "conv2_b": u(ks[5], (c2,), c1 * 9),
        "bn2_gamma": jax.random.uniform(ks[6], (c2,), jnp.float32, 0.5, 1.5),
        "bn2_beta": jax.random.uniform(ks[7], (c2,), jnp.float32, -0.5, 0.5),
        "fc1_w": u(ks[8], (32, 8 * 8 * c2), 8 * 8 * c2),
        "fc1_b": u(ks[9], (32,), 8 * 8 * c2),
        "fc2_w": u(ks[10], (2, 32), 32),
        "fc2_b": u(ks[11], (2,), 32),
    }


def pack_constants(params, n_chans1):
    """One-time repack of the module parameters into lane-dense kernel operands.

    The big MXU operands (banded conv weights, packed fc weights) are stored bf16
    (structural 0s / bias-free selection patterns are exact in bf16); everything used
    by BN statistics or bias adds stays f32.  No operand scales with the batch size.
    """
    c1, c2, cin = n_chans1, n_chans1 // 2, 3
    H2, W2, H4, W4 = H // 2, W // 2, H // 4, W // 4
    p = {k: np.asarray(v, np.float32) for k, v in params.items()}

    # conv1 banded weight: K = 9*W  (row = (cin*3 + kh)*W + input column), out = W*c1
    w1 = np.zeros((9 * W, W * c1), np.float32)
    for ci in range(cin):
        for kh in range(3):
            base = (ci * 3 + kh) * W
            for kw in range(3):
                for j in range(W):
                    b = j + kw - 1                       # "same" horizontal padding
                    if 0 <= b < W:
                        w1[base + b, j * c1:(j + 1) * c1] = p["conv1_w"][:, ci, kh, kw]
    cb1 = np.tile(p["conv1_b"], W)[None, :]
    red1 = np.zeros((W * c1, c1), np.float32)
    for j in range(W):
        red1[j * c1:(j + 1) * c1, :] = np.eye(c1, dtype=np.float32)
    bc1 = np.ascontiguousarray(red1.T)
    g1 = p["bn1_gamma"][None, :]
    be1 = np.tile(p["bn1_beta"], W)[None, :]

    # conv2 banded weight: K = 3*(W*c1).  Only even pooled-column lanes get weights;
    # the odd-column (pool garbage) lanes map to zero rows.
    w2 = np.zeros((3 * W * c1, W2 * c2), np.float32)
    for kh in range(3):
        for kw in range(3):
            for j in range(W2):
                q = j + kw - 1                           # pooled input column
                if 0 <= q < W2:
                    for ci in range(c1):
                        w2[kh * W * c1 + 2 * q * c1 + ci, j * c2:(j + 1) * c2] = \
                            p["conv2_w"][:, ci, kh, kw]
    cb2 = np.tile(p["conv2_b"], W2)[None, :]
    red2 = np.zeros((W2 * c2, c2), np.float32)
    for j in range(W2):
        red2[j * c2:(j + 1) * c2, :] = np.eye(c2, dtype=np.float32)
    bc2 = np.ascontiguousarray(red2.T)
    g2 = p["bn2_gamma"][None, :]
    be2 = np.tile(p["bn2_beta"], W2)[None, :]

    # fc1 weight with the PyTorch NCHW .view(-1, 8*8*c2) permutation and the pool-2
    # column selection folded in (odd pooled-column lanes -> zero rows).
    wf1 = np.zeros((H4 * W2 * c2, p["fc1_w"].shape[0]), np.float32)
    for i in range(H4):
        for q in range(W4):
            for ch in range(c2):
                lane = 2 * q * c2 + ch
                wf1[i * (W2 * c2) + lane, :] = p["fc1_w"][:, ch * (H4 * W4) + i * W4 + q]
    bf1 = p["fc1_b"][None, :]
    wf2 = np.ascontiguousarray(p["fc2_w"].T)
    bf2 = p["fc2_b"][None, :]

    bf16, f32 = jnp.bfloat16, jnp.float32
    arrays = ((w1, bf16), (cb1, f32), (red1, f32), (bc1, f32), (g1, f32), (be1, f32),
              (w2, bf16), (cb2, f32), (red2, f32), (bc2, f32), (g2, f32), (be2, f32),
              (wf1, bf16), (bf1, f32), (wf2, bf16), (bf2, f32))
    return tuple(jnp.asarray(a, d) for a, d in arrays)


# ----------------------- pure-JAX reference (for checking) ------------------

def _bn_ref(x, gamma, beta, eps=1e-5):
    mean = jnp.mean(x, axis=(0, 2, 3), keepdims=True)
    var = jnp.mean((x - mean) ** 2, axis=(0, 2, 3), keepdims=True)   # biased, train mode
    return (x - mean) * jax.lax.rsqrt(var + eps) * gamma[None, :, None, None] \
        + beta[None, :, None, None]


def _maxpool2_ref(x):
    nb, c, hh, ww = x.shape
    return x.reshape(nb, c, hh // 2, 2, ww // 2, 2).max(axis=(3, 5))


def reference_forward(params, x):
    dn = ("NCHW", "OIHW", "NCHW")
    out = jax.lax.conv_general_dilated(x, params["conv1_w"], (1, 1), ((1, 1), (1, 1)),
                                       dimension_numbers=dn)
    out = out + params["conv1_b"][None, :, None, None]
    out = _bn_ref(out, params["bn1_gamma"], params["bn1_beta"])
    out = _maxpool2_ref(jnp.tanh(out))
    out = jax.lax.conv_general_dilated(out, params["conv2_w"], (1, 1), ((1, 1), (1, 1)),
                                       dimension_numbers=dn)
    out = out + params["conv2_b"][None, :, None, None]
    out = _bn_ref(out, params["bn2_gamma"], params["bn2_beta"])
    out = _maxpool2_ref(jnp.tanh(out))
    feat = out.reshape(out.shape[0], -1)                  # NCHW flatten, like .view()
    out = jnp.tanh(feat @ params["fc1_w"].T + params["fc1_b"])
    return out @ params["fc2_w"].T + params["fc2_b"]


# ----------------------------------- main ------------------------------------

if __name__ == "__main__":
    n_chans1 = 8          # small but structurally faithful (fc1 in = 8*8*n_chans1//2)
    batch = 2
    key = jax.random.PRNGKey(0)
    kx, kp = jax.random.split(key)

    x = jax.random.normal(kx, (batch, 3, H, W), jnp.float32)     # NCHW, like PyTorch
    params = init_params(kp, n_chans1)
    consts = pack_constants(params, n_chans1)

    fwd = jax.jit(functools.partial(net_batchnorm_forward, n_chans1=n_chans1))
    y = fwd(consts, x)
    jax.block_until_ready(y)
    assert y.shape == (batch, 2) and y.dtype == jnp.float32

    # Check against a plain-XLA f32 reference.  Tolerance reflects the deliberate bf16
    # MXU operands (expected deviation ~1e-2); tightened from the previous 5e-2.
    y_ref = jax.jit(reference_forward)(params, x)
    np.testing.assert_allclose(np.asarray(y), np.asarray(y_ref), rtol=3e-2, atol=3e-2)

    print("KERNEL_OK")
</pallas_src>

<mosaic_0001>
module attributes {stable_mosaic.version = 11 : i64} {
  func.func @_net_kernel(%arg0: memref<2x3x32x32xf32, #tpu.memory_space<vmem>>, %arg1: memref<288x256xbf16, #tpu.memory_space<vmem>>, %arg2: memref<1x256xf32, #tpu.memory_space<vmem>>, %arg3: memref<256x8xf32, #tpu.memory_space<vmem>>, %arg4: memref<8x256xf32, #tpu.memory_space<vmem>>, %arg5: memref<1x8xf32, #tpu.memory_space<vmem>>, %arg6: memref<1x256xf32, #tpu.memory_space<vmem>>, %arg7: memref<768x64xbf16, #tpu.memory_space<vmem>>, %arg8: memref<1x64xf32, #tpu.memory_space<vmem>>, %arg9: memref<64x4xf32, #tpu.memory_space<vmem>>, %arg10: memref<4x64xf32, #tpu.memory_space<vmem>>, %arg11: memref<1x4xf32, #tpu.memory_space<vmem>>, %arg12: memref<1x64xf32, #tpu.memory_space<vmem>>, %arg13: memref<512x32xbf16, #tpu.memory_space<vmem>>, %arg14: memref<1x32xf32, #tpu.memory_space<vmem>>, %arg15: memref<32x2xbf16, #tpu.memory_space<vmem>>, %arg16: memref<1x2xf32, #tpu.memory_space<vmem>>, %arg17: memref<2x2xf32, #tpu.memory_space<vmem>>, %arg18: memref<2x3x34x32xf32, #tpu.memory_space<vmem>>, %arg19: memref<2x18x256xf32, #tpu.memory_space<vmem>>) attributes {dimension_semantics = [], scalar_prefetch = 0 : i64, scratch_operands = 2 : i64, tpu.core_type = #tpu.core_type<tc>} {
    %cst = arith.constant 0.000000e+00 : f32
    %0 = vector.broadcast %cst : f32 to vector<2x3x34x32xf32>
    %c0 = arith.constant 0 : index
    %c0_0 = arith.constant 0 : index
    %c0_1 = arith.constant 0 : index
    %c0_2 = arith.constant 0 : index
    %1 = vector.load %arg18[%c0, %c0_0, %c0_1, %c0_2] : memref<2x3x34x32xf32, #tpu.memory_space<vmem>>, vector<2x3x34x32xf32>
    tpu.vector_store %arg18[%c0, %c0_0, %c0_1, %c0_2], %0 {strides = array<i32>} : memref<2x3x34x32xf32, #tpu.memory_space<vmem>>, vector<2x3x34x32xf32>,
    %c0_3 = arith.constant 0 : index
    %c0_4 = arith.constant 0 : index
    %c0_5 = arith.constant 0 : index
    %c0_6 = arith.constant 0 : index
    %2 = vector.load %arg0[%c0_3, %c0_4, %c0_5, %c0_6] : memref<2x3x32x32xf32, #tpu.memory_space<vmem>>, vector<2x3x32x32xf32>
    %c0_7 = arith.constant 0 : index
    %c0_8 = arith.constant 0 : index
    %c1 = arith.constant 1 : index
    %c0_9 = arith.constant 0 : index
    %3 = vector.load %arg18[%c0_7, %c0_8, %c1, %c0_9] : memref<2x3x34x32xf32, #tpu.memory_space<vmem>>, vector<2x3x32x32xf32>
    tpu.vector_store %arg18[%c0_7, %c0_8, %c1, %c0_9], %2 {strides = array<i32>} : memref<2x3x34x32xf32, #tpu.memory_space<vmem>>, vector<2x3x32x32xf32>,
    %c0_10 = arith.constant 0 : index
    %c0_11 = arith.constant 0 : index
    %c0_12 = arith.constant 0 : index
    %c0_13 = arith.constant 0 : index
    %4 = vector.load %arg18[%c0_10, %c0_11, %c0_12, %c0_13] : memref<2x3x34x32xf32, #tpu.memory_space<vmem>>, vector<2x1x32x32xf32>
    %5 = vector.shape_cast %4 : vector<2x1x32x32xf32> to vector<2x32x32xf32>
    %c0_14 = arith.constant 0 : index
    %c0_15 = arith.constant 0 : index
    %c1_16 = arith.constant 1 : index
    %c0_17 = arith.constant 0 : index
    %6 = vector.load %arg18[%c0_14, %c0_15, %c1_16, %c0_17] : memref<2x3x34x32xf32, #tpu.memory_space<vmem>>, vector<2x1x32x32xf32>
    %7 = vector.shape_cast %6 : vector<2x1x32x32xf32> to vector<2x32x32xf32>
    %c0_18 = arith.constant 0 : index
    %c0_19 = arith.constant 0 : index
    %c2 = arith.constant 2 : index
    %c0_20 = arith.constant 0 : index
    %8 = vector.load %arg18[%c0_18, %c0_19, %c2, %c0_20] : memref<2x3x34x32xf32, #tpu.memory_space<vmem>>, vector<2x1x32x32xf32>
    %9 = vector.shape_cast %8 : vector<2x1x32x32xf32> to vector<2x32x32xf32>
    %c0_21 = arith.constant 0 : index
    %c1_22 = arith.constant 1 : index
    %c0_23 = arith.constant 0 : index
    %c0_24 = arith.constant 0 : index
    %10 = vector.load %arg18[%c0_21, %c1_22, %c0_23, %c0_24] : memref<2x3x34x32xf32, #tpu.memory_space<vmem>>, vector<2x1x32x32xf32>
    %11 = vector.shape_cast %10 : vector<2x1x32x32xf32> to vector<2x32x32xf32>
    %c0_25 = arith.constant 0 : index
    %c1_26 = arith.constant 1 : index
    %c1_27 = arith.constant 1 : index
    %c0_28 = arith.constant 0 : index
    %12 = vector.load %arg18[%c0_25, %c1_26, %c1_27, %c0_28] : memref<2x3x34x32xf32, #tpu.memory_space<vmem>>, vector<2x1x32x32xf32>
    %13 = vector.shape_cast %12 : vector<2x1x32x32xf32> to vector<2x32x32xf32>
    %c0_29 = arith.constant 0 : index
    %c1_30 = arith.constant 1 : index
    %c2_31 = arith.constant 2 : index
    %c0_32 = arith.constant 0 : index
    %14 = vector.load %arg18[%c0_29, %c1_30, %c2_31, %c0_32] : memref<2x3x34x32xf32, #tpu.memory_space<vmem>>, vector<2x1x32x32xf32>
    %15 = vector.shape_cast %14 : vector<2x1x32x32xf32> to vector<2x32x32xf32>
    %c0_33 = arith.constant 0 : index
    %c2_34 = arith.constant 2 : index
    %c0_35 = arith.constant 0 : index
    %c0_36 = arith.constant 0 : index
    %16 = vector.load %arg18[%c0_33, %c2_34, %c0_35, %c0_36] : memref<2x3x34x32xf32, #tpu.memory_space<vmem>>, vector<2x1x32x32xf32>
    %17 = vector.shape_cast %16 : vector<2x1x32x32xf32> to vector<2x32x32xf32>
    %c0_37 = arith.constant 0 : index
    %c2_38 = arith.constant 2 : index
    %c1_39 = arith.constant 1 : index
    %c0_40 = arith.constant 0 : index
    %18 = vector.load %arg18[%c0_37, %c2_38, %c1_39, %c0_40] : memref<2x3x34x32xf32, #tpu.memory_space<vmem>>, vector<2x1x32x32xf32>
    %19 = vector.shape_cast %18 : vector<2x1x32x32xf32> to vector<2x32x32xf32>
    %c0_41 = arith.constant 0 : index
    %c2_42 = arith.constant 2 : index
    %c2_43 = arith.constant 2 : index
    %c0_44 = arith.constant 0 : index
    %20 = vector.load %arg18[%c0_41, %c2_42, %c2_43, %c0_44] : memref<2x3x34x32xf32, #tpu.memory_space<vmem>>, vector<2x1x32x32xf32>
    %21 = vector.shape_cast %20 : vector<2x1x32x32xf32> to vector<2x32x32xf32>
    %22 = tpu.concatenate %5, %7, %9, %11, %13, %15, %17, %19, %21 in 2 : vector<2x32x32xf32>, vector<2x32x32xf32>, vector<2x32x32xf32>, vector<2x32x32xf32>, vector<2x32x32xf32>, vector<2x32x32xf32>, vector<2x32x32xf32>, vector<2x32x32xf32>, vector<2x32x32xf32> -> vector<2x32x288xf32>
    %23 = vector.shape_cast %22 : vector<2x32x288xf32> to vector<64x288xf32>
    %24 = arith.truncf %23 : vector<64x288xf32> to vector<64x288xbf16>
    %c0_45 = arith.constant 0 : index
    %c0_46 = arith.constant 0 : index
    %25 = vector.load %arg1[%c0_45, %c0_46] : memref<288x256xbf16, #tpu.memory_space<vmem>>, vector<288x256xbf16>
    %cst_47 = arith.constant dense<0.000000e+00> : vector<64x256xf32>
    %26 = tpu.matmul %24, %25, %cst_47 {dimension_numbers = #tpu.dot_dimension_numbers<[1], [0], [0], [1], [0, 0, 1, 1], [], []>} : vector<64x288xbf16>, vector<288x256xbf16>, vector<64x256xf32> -> vector<64x256xf32>
    %c0_48 = arith.constant 0 : index
    %c0_49 = arith.constant 0 : index
    %27 = vector.load %arg2[%c0_48, %c0_49] : memref<1x256xf32, #tpu.memory_space<vmem>>, vector<1x256xf32>
    %28 = vector.broadcast %27 : vector<1x256xf32> to vector<64x256xf32>
    %29 = arith.addf %26, %28 : vector<64x256xf32>
    %cst_50 = arith.constant dense<0.000000e+00> : vector<256xf32>
    %30 = vector.multi_reduction <add>, %29, %cst_50 [0] : vector<64x256xf32> to vector<256xf32>
    %31 = vector.shape_cast %30 : vector<256xf32> to vector<1x256xf32>
    %c0_51 = arith.constant 0 : index
    %c0_52 = arith.constant 0 : index
    %32 = vector.load %arg3[%c0_51, %c0_52] : memref<256x8xf32, #tpu.memory_space<vmem>>, vector<256x8xf32>
    %cst_53 = arith.constant dense<0.000000e+00> : vector<1x8xf32>
    %33 = tpu.matmul %31, %32, %cst_53 {dimension_numbers = #tpu.dot_dimension_numbers<[1], [0], [0], [1], [0, 0, 1, 1], [], []>} : vector<1x256xf32>, vector<256x8xf32>, vector<1x8xf32> -> vector<1x8xf32>
    %cst_54 = arith.constant 4.8828125E-4 : f32
    %34 = vector.broadcast %cst_54 : f32 to vector<1x8xf32>
    %35 = arith.mulf %33, %34 : vector<1x8xf32>
    %c0_55 = arith.constant 0 : index
    %c0_56 = arith.constant 0 : index
    %36 = vector.load %arg4[%c0_55, %c0_56] : memref<8x256xf32, #tpu.memory_space<vmem>>, vector<8x256xf32>
    %cst_57 = arith.constant dense<0.000000e+00> : vector<1x256xf32>
    %37 = tpu.matmul %35, %36, %cst_57 {dimension_numbers = #tpu.dot_dimension_numbers<[1], [0], [0], [1], [0, 0, 1, 1], [], []>} : vector<1x8xf32>, vector<8x256xf32>, vector<1x256xf32> -> vector<1x256xf32>
    %38 = vector.broadcast %37 : vector<1x256xf32> to vector<64x256xf32>
    %39 = arith.subf %29, %38 : vector<64x256xf32>
    %40 = arith.mulf %39, %39 : vector<64x256xf32>
    %cst_58 = arith.constant dense<0.000000e+00> : vector<256xf32>
    %41 = vector.multi_reduction <add>, %40, %cst_58 [0] : vector<64x256xf32> to vector<256xf32>
    %42 = vector.shape_cast %41 : vector<256xf32> to vector<1x256xf32>
    %c0_59 = arith.constant 0 : index
    %c0_60 = arith.constant 0 : index
    %43 = vector.load %arg3[%c0_59, %c0_60] : memref<256x8xf32, #tpu.memory_space<vmem>>, vector<256x8xf32>
    %cst_61 = arith.constant dense<0.000000e+00> : vector<1x8xf32>
    %44 = tpu.matmul %42, %43, %cst_61 {dimension_numbers = #tpu.dot_dimension_numbers<[1], [0], [0], [1], [0, 0, 1, 1], [], []>} : vector<1x256xf32>, vector<256x8xf32>, vector<1x8xf32> -> vector<1x8xf32>
    %cst_62 = arith.constant 4.8828125E-4 : f32
    %45 = vector.broadcast %cst_62 : f32 to vector<1x8xf32>
    %46 = arith.mulf %44, %45 : vector<1x8xf32>
    %cst_63 = arith.constant 9.99999974E-6 : f32
    %47 = vector.broadcast %cst_63 : f32 to vector<1x8xf32>
    %48 = arith.addf %46, %47 : vector<1x8xf32>
    %49 = math.rsqrt %48 : vector<1x8xf32>
    %c0_64 = arith.constant 0 : index
    %c0_65 = arith.constant 0 : index
    %50 = vector.load %arg5[%c0_64, %c0_65] : memref<1x8xf32, #tpu.memory_space<vmem>>, vector<1x8xf32>
    %51 = arith.mulf %49, %50 : vector<1x8xf32>
    %c0_66 = arith.constant 0 : index
    %c0_67 = arith.constant 0 : index
    %52 = vector.load %arg4[%c0_66, %c0_67] : memref<8x256xf32, #tpu.memory_space<vmem>>, vector<8x256xf32>
    %cst_68 = arith.constant dense<0.000000e+00> : vector<1x256xf32>
    %53 = tpu.matmul %51, %52, %cst_68 {dimension_numbers = #tpu.dot_dimension_numbers<[1], [0], [0], [1], [0, 0, 1, 1], [], []>} : vector<1x8xf32>, vector<8x256xf32>, vector<1x256xf32> -> vector<1x256xf32>
    %54 = vector.broadcast %53 : vector<1x256xf32> to vector<64x256xf32>
    %55 = arith.mulf %39, %54 : vector<64x256xf32>
    %c0_69 = arith.constant 0 : index
    %c0_70 = arith.constant 0 : index
    %56 = vector.load %arg6[%c0_69, %c0_70] : memref<1x256xf32, #tpu.memory_space<vmem>>, vector<1x256xf32>
    %57 = vector.broadcast %56 : vector<1x256xf32> to vector<64x256xf32>
    %58 = arith.addf %55, %57 : vector<64x256xf32>
    %59 = math.tanh %58 : vector<64x256xf32>
    %60 = vector.extract_strided_slice %59 {offsets = [0, 8], sizes = [64, 248], strides = [1, 1]} : vector<64x256xf32> to vector<64x248xf32>
    %61 = vector.extract_strided_slice %59 {offsets = [0, 0], sizes = [64, 8], strides = [1, 1]} : vector<64x256xf32> to vector<64x8xf32>
    %62 = tpu.concatenate %60, %61 in 1 : vector<64x248xf32>, vector<64x8xf32> -> vector<64x256xf32>
    %63 = arith.maximumf %59, %62 : vector<64x256xf32>
    %64 = vector.shape_cast %63 : vector<64x256xf32> to vector<2x32x256xf32>
    %cst_71 = arith.constant 0.000000e+00 : f32
    %65 = vector.broadcast %cst_71 : f32 to vector<2x256xf32>
    %c0_72 = arith.constant 0 : index
    %c0_73 = arith.constant 0 : index
    %c0_74 = arith.constant 0 : index
    %66 = vector.load %arg19[%c0_72, %c0_73, %c0_74] : memref<2x18x256xf32, #tpu.memory_space<vmem>>, vector<2x1x256xf32>
    %67 = vector.shape_cast %66 : vector<2x1x256xf32> to vector<2x256xf32>
    %68 = vector.shape_cast %65 : vector<2x256xf32> to vector<2x1x256xf32>
    tpu.vector_store %arg19[%c0_72, %c0_73, %c0_74], %68 {strides = array<i32>} : memref<2x18x256xf32, #tpu.memory_space<vmem>>, vector<2x1x256xf32>,
    %cst_75 = arith.constant 0.000000e+00 : f32
    %69 = vector.broadcast %cst_75 : f32 to vector<2x256xf32>
    %c0_76 = arith.constant 0 : index
    %c17 = arith.constant 17 : index
    %c0_77 = arith.constant 0 : index
    %70 = vector.load %arg19[%c0_76, %c17, %c0_77] : memref<2x18x256xf32, #tpu.memory_space<vmem>>, vector<2x1x256xf32>
    %71 = vector.shape_cast %70 : vector<2x1x256xf32> to vector<2x256xf32>
    %72 = vector.shape_cast %69 : vector<2x256xf32> to vector<2x1x256xf32>
    tpu.vector_store %arg19[%c0_76, %c17, %c0_77], %72 {strides = array<i32>} : memref<2x18x256xf32, #tpu.memory_space<vmem>>, vector<2x1x256xf32>,
    %73 = vector.extract_strided_slice %64 {offsets = [0, 0, 0], sizes = [2, 1, 256], strides = [1, 1, 1]} : vector<2x32x256xf32> to vector<2x1x256xf32>
    %74 = vector.shape_cast %73 : vector<2x1x256xf32> to vector<2x256xf32>
    %75 = vector.extract_strided_slice %64 {offsets = [0, 1, 0], sizes = [2, 1, 256], strides = [1, 1, 1]} : vector<2x32x256xf32> to vector<2x1x256xf32>
    %76 = vector.shape_cast %75 : vector<2x1x256xf32> to vector<2x256xf32>
    %77 = arith.maximumf %74, %76 : vector<2x256xf32>
    %c0_78 = arith.constant 0 : index
    %c1_79 = arith.constant 1 : index
    %c0_80 = arith.constant 0 : index
    %78 = vector.load %arg19[%c0_78, %c1_79, %c0_80] : memref<2x18x256xf32, #tpu.memory_space<vmem>>, vector<2x1x256xf32>
    %79 = vector.shape_cast %78 : vector<2x1x256xf32> to vector<2x256xf32>
    %80 = vector.shape_cast %77 : vector<2x256xf32> to vector<2x1x256xf32>
    tpu.vector_store %arg19[%c0_78, %c1_79, %c0_80], %80 {strides = array<i32>} : memref<2x18x256xf32, #tpu.memory_space<vmem>>, vector<2x1x256xf32>,
    %81 = vector.extract_strided_slice %64 {offsets = [0, 2, 0], sizes = [2, 1, 256], strides = [1, 1, 1]} : vector<2x32x256xf32> to vector<2x1x256xf32>
    %82 = vector.shape_cast %81 : vector<2x1x256xf32> to vector<2x256xf32>
    %83 = vector.extract_strided_slice %64 {offsets = [0, 3, 0], sizes = [2, 1, 256], strides = [1, 1, 1]} : vector<2x32x256xf32> to vector<2x1x256xf32>
    %84 = vector.shape_cast %83 : vector<2x1x256xf32> to vector<2x256xf32>
    %85 = arith.maximumf %82, %84 : vector<2x256xf32>
    %c0_81 = arith.constant 0 : index
    %c2_82 = arith.constant 2 : index
    %c0_83 = arith.constant 0 : index
    %86 = vector.load %arg19[%c0_81, %c2_82, %c0_83] : memref<2x18x256xf32, #tpu.memory_space<vmem>>, vector<2x1x256xf32>
    %87 = vector.shape_cast %86 : vector<2x1x256xf32> to vector<2x256xf32>
    %88 = vector.shape_cast %85 : vector<2x256xf32> to vector<2x1x256xf32>
    tpu.vector_store %arg19[%c0_81, %c2_82, %c0_83], %88 {strides = array<i32>} : memref<2x18x256xf32, #tpu.memory_space<vmem>>, vector<2x1x256xf32>,
    %89 = vector.extract_strided_slice %64 {offsets = [0, 4, 0], sizes = [2, 1, 256], strides = [1, 1, 1]} : vector<2x32x256xf32> to vector<2x1x256xf32>
    %90 = vector.shape_cast %89 : vector<2x1x256xf32> to vector<2x256xf32>
    %91 = vector.extract_strided_slice %64 {offsets = [0, 5, 0], sizes = [2, 1, 256], strides = [1, 1, 1]} : vector<2x32x256xf32> to vector<2x1x256xf32>
    %92 = vector.shape_cast %91 : vector<2x1x256xf32> to vector<2x256xf32>
    %93 = arith.maximumf %90, %92 : vector<2x256xf32>
    %c0_84 = arith.constant 0 : index
    %c3 = arith.constant 3 : index
    %c0_85 = arith.constant 0 : index
    %94 = vector.load %arg19[%c0_84, %c3, %c0_85] : memref<2x18x256xf32, #tpu.memory_space<vmem>>, vector<2x1x256xf32>
    %95 = vector.shape_cast %94 : vector<2x1x256xf32> to vector<2x256xf32>
    %96 = vector.shape_cast %93 : vector<2x256xf32> to vector<2x1x256xf32>
    tpu.vector_store %arg19[%c0_84, %c3, %c0_85], %96 {strides = array<i32>} : memref<2x18x256xf32, #tpu.memory_space<vmem>>, vector<2x1x256xf32>,
    %97 = vector.extract_strided_slice %64 {offsets = [0, 6, 0], sizes = [2, 1, 256], strides = [1, 1, 1]} : vector<2x32x256xf32> to vector<2x1x256xf32>
    %98 = vector.shape_cast %97 : vector<2x1x256xf32> to vector<2x256xf32>
    %99 = vector.extract_strided_slice %64 {offsets = [0, 7, 0], sizes = [2, 1, 256], strides = [1, 1, 1]} : vector<2x32x256xf32> to vector<2x1x256xf32>
    %100 = vector.shape_cast %99 : vector<2x1x256xf32> to vector<2x256xf32>
    %101 = arith.maximumf %98, %100 : vector<2x256xf32>
    %c0_86 = arith.constant 0 : index
    %c4 = arith.constant 4 : index
    %c0_87 = arith.constant 0 : index
    %102 = vector.load %arg19[%c0_86, %c4, %c0_87] : memref<2x18x256xf32, #tpu.memory_space<vmem>>, vector<2x1x256xf32>
    %103 = vector.shape_cast %102 : vector<2x1x256xf32> to vector<2x256xf32>
    %104 = vector.shape_cast %101 : vector<2x256xf32> to vector<2x1x256xf32>
    tpu.vector_store %arg19[%c0_86, %c4, %c0_87], %104 {strides = array<i32>} : memref<2x18x256xf32, #tpu.memory_space<vmem>>, vector<2x1x256xf32>,
    %105 = vector.extract_strided_slice %64 {offsets = [0, 8, 0], sizes = [2, 1, 256], strides = [1, 1, 1]} : vector<2x32x256xf32> to vector<2x1x256xf32>
    %106 = vector.shape_cast %105 : vector<2x1x256xf32> to vector<2x256xf32>
    %107 = vector.extract_strided_slice %64 {offsets = [0, 9, 0], sizes = [2, 1, 256], strides = [1, 1, 1]} : vector<2x32x256xf32> to vector<2x1x256xf32>
    %108 = vector.shape_cast %107 : vector<2x1x256xf32> to vector<2x256xf32>
    %109 = arith.maximumf %106, %108 : vector<2x256xf32>
    %c0_88 = arith.constant 0 : index
    %c5 = arith.constant 5 : index
    %c0_89 = arith.constant 0 : index
    %110 = vector.load %arg19[%c0_88, %c5, %c0_89] : memref<2x18x256xf32, #tpu.memory_space<vmem>>, vector<2x1x256xf32>
    %111 = vector.shape_cast %110 : vector<2x1x256xf32> to vector<2x256xf32>
    %112 = vector.shape_cast %109 : vector<2x256xf32> to vector<2x1x256xf32>
    tpu.vector_store %arg19[%c0_88, %c5, %c0_89], %112 {strides = array<i32>} : memref<2x18x256xf32, #tpu.memory_space<vmem>>, vector<2x1x256xf32>,
    %113 = vector.extract_strided_slice %64 {offsets = [0, 10, 0], sizes = [2, 1, 256], strides = [1, 1, 1]} : vector<2x32x256xf32> to vector<2x1x256xf32>
    %114 = vector.shape_cast %113 : vector<2x1x256xf32> to vector<2x256xf32>
    %115 = vector.extract_strided_slice %64 {offsets = [0, 11, 0], sizes = [2, 1, 256], strides = [1, 1, 1]} : vector<2x32x256xf32> to vector<2x1x256xf32>
    %116 = vector.shape_cast %115 : vector<2x1x256xf32> to vector<2x256xf32>
    %117 = arith.maximumf %114, %116 : vector<2x256xf32>
    %c0_90 = arith.constant 0 : index
    %c6 = arith.constant 6 : index
    %c0_91 = arith.constant 0 : index
    %118 = vector.load %arg19[%c0_90, %c6, %c0_91] : memref<2x18x256xf32, #tpu.memory_space<vmem>>, vector<2x1x256xf32>
    %119 = vector.shape_cast %118 : vector<2x1x256xf32> to vector<2x256xf32>
    %120 = vector.shape_cast %117 : vector<2x256xf32> to vector<2x1x256xf32>
    tpu.vector_store %arg19[%c0_90, %c6, %c0_91], %120 {strides = array<i32>} : memref<2x18x256xf32, #tpu.memory_space<vmem>>, vector<2x1x256xf32>,
    %121 = vector.extract_strided_slice %64 {offsets = [0, 12, 0], sizes = [2, 1, 256], strides = [1, 1, 1]} : vector<2x32x256xf32> to vector<2x1x256xf32>
    %122 = vector.shape_cast %121 : vector<2x1x256xf32> to vector<2x256xf32>
    %123 = vector.extract_strided_slice %64 {offsets = [0, 13, 0], sizes = [2, 1, 256], strides = [1, 1, 1]} : vector<2x32x256xf32> to vector<2x1x256xf32>
    %124 = vector.shape_cast %123 : vector<2x1x256xf32> to vector<2x256xf32>
    %125 = arith.maximumf %122, %124 : vector<2x256xf32>
    %c0_92 = arith.constant 0 : index
    %c7 = arith.constant 7 : index
    %c0_93 = arith.constant 0 : index
    %126 = vector.load %arg19[%c0_92, %c7, %c0_93] : memref<2x18x256xf32, #tpu.memory_space<vmem>>, vector<2x1x256xf32>
    %127 = vector.shape_cast %126 : vector<2x1x256xf32> to vector<2x256xf32>
    %128 = vector.shape_cast %125 : vector<2x256xf32> to vector<2x1x256xf32>
    tpu.vector_store %arg19[%c0_92, %c7, %c0_93], %128 {strides = array<i32>} : memref<2x18x256xf32, #tpu.memory_space<vmem>>, vector<2x1x256xf32>,
    %129 = vector.extract_strided_slice %64 {offsets = [0, 14, 0], sizes = [2, 1, 256], strides = [1, 1, 1]} : vector<2x32x256xf32> to vector<2x1x256xf32>
    %130 = vector.shape_cast %129 : vector<2x1x256xf32> to vector<2x256xf32>
    %131 = vector.extract_strided_slice %64 {offsets = [0, 15, 0], sizes = [2, 1, 256], strides = [1, 1, 1]} : vector<2x32x256xf32> to vector<2x1x256xf32>
    %132 = vector.shape_cast %131 : vector<2x1x256xf32> to vector<2x256xf32>
    %133 = arith.maximumf %130, %132 : vector<2x256xf32>
    %c0_94 = arith.constant 0 : index
    %c8 = arith.constant 8 : index
    %c0_95 = arith.constant 0 : index
    %134 = vector.load %arg19[%c0_94, %c8, %c0_95] : memref<2x18x256xf32, #tpu.memory_space<vmem>>, vector<2x1x256xf32>
    %135 = vector.shape_cast %134 : vector<2x1x256xf32> to vector<2x256xf32>
    %136 = vector.shape_cast %133 : vector<2x256xf32> to vector<2x1x256xf32>
    tpu.vector_store %arg19[%c0_94, %c8, %c0_95], %136 {strides = array<i32>} : memref<2x18x256xf32, #tpu.memory_space<vmem>>, vector<2x1x256xf32>,
    %137 = vector.extract_strided_slice %64 {offsets = [0, 16, 0], sizes = [2, 1, 256], strides = [1, 1, 1]} : vector<2x32x256xf32> to vector<2x1x256xf32>
    %138 = vector.shape_cast %137 : vector<2x1x256xf32> to vector<2x256xf32>
    %139 = vector.extract_strided_slice %64 {offsets = [0, 17, 0], sizes = [2, 1, 256], strides = [1, 1, 1]} : vector<2x32x256xf32> to vector<2x1x256xf32>
    %140 = vector.shape_cast %139 : vector<2x1x256xf32> to vector<2x256xf32>
    %141 = arith.maximumf %138, %140 : vector<2x256xf32>
    %c0_96 = arith.constant 0 : index
    %c9 = arith.constant 9 : index
    %c0_97 = arith.constant 0 : index
    %142 = vector.load %arg19[%c0_96, %c9, %c0_97] : memref<2x18x256xf32, #tpu.memory_space<vmem>>, vector<2x1x256xf32>
    %143 = vector.shape_cast %142 : vector<2x1x256xf32> to vector<2x256xf32>
    %144 = vector.shape_cast %141 : vector<2x256xf32> to vector<2x1x256xf32>
    tpu.vector_store %arg19[%c0_96, %c9, %c0_97], %144 {strides = array<i32>} : memref<2x18x256xf32, #tpu.memory_space<vmem>>, vector<2x1x256xf32>,
    %145 = vector.extract_strided_slice %64 {offsets = [0, 18, 0], sizes = [2, 1, 256], strides = [1, 1, 1]} : vector<2x32x256xf32> to vector<2x1x256xf32>
    %146 = vector.shape_cast %145 : vector<2x1x256xf32> to vector<2x256xf32>
    %147 = vector.extract_strided_slice %64 {offsets = [0, 19, 0], sizes = [2, 1, 256], strides = [1, 1, 1]} : vector<2x32x256xf32> to vector<2x1x256xf32>
    %148 = vector.shape_cast %147 : vector<2x1x256xf32> to vector<2x256xf32>
    %149 = arith.maximumf %146, %148 : vector<2x256xf32>
    %c0_98 = arith.constant 0 : index
    %c10 = arith.constant 10 : index
    %c0_99 = arith.constant 0 : index
    %150 = vector.load %arg19[%c0_98, %c10, %c0_99] : memref<2x18x256xf32, #tpu.memory_space<vmem>>, vector<2x1x256xf32>
    %151 = vector.shape_cast %150 : vector<2x1x256xf32> to vector<2x256xf32>
    %152 = vector.shape_cast %149 : vector<2x256xf32> to vector<2x1x256xf32>
    tpu.vector_store %arg19[%c0_98, %c10, %c0_99], %152 {strides = array<i32>} : memref<2x18x256xf32, #tpu.memory_space<vmem>>, vector<2x1x256xf32>,
    %153 = vector.extract_strided_slice %64 {offsets = [0, 20, 0], sizes = [2, 1, 256], strides = [1, 1, 1]} : vector<2x32x256xf32> to vector<2x1x256xf32>
    %154 = vector.shape_cast %153 : vector<2x1x256xf32> to vector<2x256xf32>
    %155 = vector.extract_strided_slice %64 {offsets = [0, 21, 0], sizes = [2, 1, 256], strides = [1, 1, 1]} : vector<2x32x256xf32> to vector<2x1x256xf32>
    %156 = vector.shape_cast %155 : vector<2x1x256xf32> to vector<2x256xf32>
    %157 = arith.maximumf %154, %156 : vector<2x256xf32>
    %c0_100 = arith.constant 0 : index
    %c11 = arith.constant 11 : index
    %c0_101 = arith.constant 0 : index
    %158 = vector.load %arg19[%c0_100, %c11, %c0_101] : memref<2x18x256xf32, #tpu.memory_space<vmem>>, vector<2x1x256xf32>
    %159 = vector.shape_cast %158 : vector<2x1x256xf32> to vector<2x256xf32>
    %160 = vector.shape_cast %157 : vector<2x256xf32> to vector<2x1x256xf32>
    tpu.vector_store %arg19[%c0_100, %c11, %c0_101], %160 {strides = array<i32>} : memref<2x18x256xf32, #tpu.memory_space<vmem>>, vector<2x1x256xf32>,
    %161 = vector.extract_strided_slice %64 {offsets = [0, 22, 0], sizes = [2, 1, 256], strides = [1, 1, 1]} : vector<2x32x256xf32> to vector<2x1x256xf32>
    %162 = vector.shape_cast %161 : vector<2x1x256xf32> to vector<2x256xf32>
    %163 = vector.extract_strided_slice %64 {offsets = [0, 23, 0], sizes = [2, 1, 256], strides = [1, 1, 1]} : vector<2x32x256xf32> to vector<2x1x256xf32>
    %164 = vector.shape_cast %163 : vector<2x1x256xf32> to vector<2x256xf32>
    %165 = arith.maximumf %162, %164 : vector<2x256xf32>
    %c0_102 = arith.constant 0 : index
    %c12 = arith.constant 12 : index
    %c0_103 = arith.constant 0 : index
    %166 = vector.load %arg19[%c0_102, %c12, %c0_103] : memref<2x18x256xf32, #tpu.memory_space<vmem>>, vector<2x1x256xf32>
    %167 = vector.shape_cast %166 : vector<2x1x256xf32> to vector<2x256xf32>
    %168 = vector.shape_cast %165 : vector<2x256xf32> to vector<2x1x256xf32>
    tpu.vector_store %arg19[%c0_102, %c12, %c0_103], %168 {strides = array<i32>} : memref<2x18x256xf32, #tpu.memory_space<vmem>>, vector<2x1x256xf32>,
    %169 = vector.extract_strided_slice %64 {offsets = [0, 24, 0], sizes = [2, 1, 256], strides = [1, 1, 1]} : vector<2x32x256xf32> to vector<2x1x256xf32>
    %170 = vector.shape_cast %169 : vector<2x1x256xf32> to vector<2x256xf32>
    %171 = vector.extract_strided_slice %64 {offsets = [0, 25, 0], sizes = [2, 1, 256], strides = [1, 1, 1]} : vector<2x32x256xf32> to vector<2x1x256xf32>
    %172 = vector.shape_cast %171 : vector<2x1x256xf32> to vector<2x256xf32>
    %173 = arith.maximumf %170, %172 : vector<2x256xf32>
    %c0_104 = arith.constant 0 : index
    %c13 = arith.constant 13 : index
    %c0_105 = arith.constant 0 : index
    %174 = vector.load %arg19[%c0_104, %c13, %c0_105] : memref<2x18x256xf32, #tpu.memory_space<vmem>>, vector<2x1x256xf32>
    %175 = vector.shape_cast %174 : vector<2x1x256xf32> to vector<2x256xf32>
    %176 = vector.shape_cast %173 : vector<2x256xf32> to vector<2x1x256xf32>
    tpu.vector_store %arg19[%c0_104, %c13, %c0_105], %176 {strides = array<i32>} : memref<2x18x256xf32, #tpu.memory_space<vmem>>, vector<2x1x256xf32>,
    %177 = vector.extract_strided_slice %64 {offsets = [0, 26, 0], sizes = [2, 1, 256], strides = [1, 1, 1]} : vector<2x32x256xf32> to vector<2x1x256xf32>
    %178 = vector.shape_cast %177 : vector<2x1x256xf32> to vector<2x256xf32>
    %179 = vector.extract_strided_slice %64 {offsets = [0, 27, 0], sizes = [2, 1, 256], strides = [1, 1, 1]} : vector<2x32x256xf32> to vector<2x1x256xf32>
    %180 = vector.shape_cast %179 : vector<2x1x256xf32> to vector<2x256xf32>
    %181 = arith.maximumf %178, %180 : vector<2x256xf32>
    %c0_106 = arith.constant 0 : index
    %c14 = arith.constant 14 : index
    %c0_107 = arith.constant 0 : index
    %182 = vector.load %arg19[%c0_106, %c14, %c0_107] : memref<2x18x256xf32, #tpu.memory_space<vmem>>, vector<2x1x256xf32>
    %183 = vector.shape_cast %182 : vector<2x1x256xf32> to vector<2x256xf32>
    %184 = vector.shape_cast %181 : vector<2x256xf32> to vector<2x1x256xf32>
    tpu.vector_store %arg19[%c0_106, %c14, %c0_107], %184 {strides = array<i32>} : memref<2x18x256xf32, #tpu.memory_space<vmem>>, vector<2x1x256xf32>,
    %185 = vector.extract_strided_slice %64 {offsets = [0, 28, 0], sizes = [2, 1, 256], strides = [1, 1, 1]} : vector<2x32x256xf32> to vector<2x1x256xf32>
    %186 = vector.shape_cast %185 : vector<2x1x256xf32> to vector<2x256xf32>
    %187 = vector.extract_strided_slice %64 {offsets = [0, 29, 0], sizes = [2, 1, 256], strides = [1, 1, 1]} : vector<2x32x256xf32> to vector<2x1x256xf32>
    %188 = vector.shape_cast %187 : vector<2x1x256xf32> to vector<2x256xf32>
    %189 = arith.maximumf %186, %188 : vector<2x256xf32>
    %c0_108 = arith.constant 0 : index
    %c15 = arith.constant 15 : index
    %c0_109 = arith.constant 0 : index
    %190 = vector.load %arg19[%c0_108, %c15, %c0_109] : memref<2x18x256xf32, #tpu.memory_space<vmem>>, vector<2x1x256xf32>
    %191 = vector.shape_cast %190 : vector<2x1x256xf32> to vector<2x256xf32>
    %192 = vector.shape_cast %189 : vector<2x256xf32> to vector<2x1x256xf32>
    tpu.vector_store %arg19[%c0_108, %c15, %c0_109], %192 {strides = array<i32>} : memref<2x18x256xf32, #tpu.memory_space<vmem>>, vector<2x1x256xf32>,
    %193 = vector.extract_strided_slice %64 {offsets = [0, 30, 0], sizes = [2, 1, 256], strides = [1, 1, 1]} : vector<2x32x256xf32> to vector<2x1x256xf32>
    %194 = vector.shape_cast %193 : vector<2x1x256xf32> to vector<2x256xf32>
    %195 = vector.extract_strided_slice %64 {offsets = [0, 31, 0], sizes = [2, 1, 256], strides = [1, 1, 1]} : vector<2x32x256xf32> to vector<2x1x256xf32>
    %196 = vector.shape_cast %195 : vector<2x1x256xf32> to vector<2x256xf32>
    %197 = arith.maximumf %194, %196 : vector<2x256xf32>
    %c0_110 = arith.constant 0 : index
    %c16 = arith.constant 16 : index
    %c0_111 = arith.constant 0 : index
    %198 = vector.load %arg19[%c0_110, %c16, %c0_111] : memref<2x18x256xf32, #tpu.memory_space<vmem>>, vector<2x1x256xf32>
    %199 = vector.shape_cast %198 : vector<2x1x256xf32> to vector<2x256xf32>
    %200 = vector.shape_cast %197 : vector<2x256xf32> to vector<2x1x256xf32>
    tpu.vector_store %arg19[%c0_110, %c16, %c0_111], %200 {strides = array<i32>} : memref<2x18x256xf32, #tpu.memory_space<vmem>>, vector<2x1x256xf32>,
    %c0_112 = arith.constant 0 : index
    %c0_113 = arith.constant 0 : index
    %c0_114 = arith.constant 0 : index
    %201 = vector.load %arg19[%c0_112, %c0_113, %c0_114] : memref<2x18x256xf32, #tpu.memory_space<vmem>>, vector<2x16x256xf32>
    %c0_115 = arith.constant 0 : index
    %c1_116 = arith.constant 1 : index
    %c0_117 = arith.constant 0 : index
    %202 = vector.load %arg19[%c0_115, %c1_116, %c0_117] : memref<2x18x256xf32, #tpu.memory_space<vmem>>, vector<2x16x256xf32>
    %c0_118 = arith.constant 0 : index
    %c2_119 = arith.constant 2 : index
    %c0_120 = arith.constant 0 : index
    %203 = vector.load %arg19[%c0_118, %c2_119, %c0_120] : memref<2x18x256xf32, #tpu.memory_space<vmem>>, vector<2x16x256xf32>
    %204 = tpu.concatenate %201, %202, %203 in 2 : vector<2x16x256xf32>, vector<2x16x256xf32>, vector<2x16x256xf32> -> vector<2x16x768xf32>
    %205 = vector.shape_cast %204 : vector<2x16x768xf32> to vector<32x768xf32>
    %206 = arith.truncf %205 : vector<32x768xf32> to vector<32x768xbf16>
    %c0_121 = arith.constant 0 : index
    %c0_122 = arith.constant 0 : index
    %207 = vector.load %arg7[%c0_121, %c0_122] : memref<768x64xbf16, #tpu.memory_space<vmem>>, vector<768x64xbf16>
    %cst_123 = arith.constant dense<0.000000e+00> : vector<32x64xf32>
    %208 = tpu.matmul %206, %207, %cst_123 {dimension_numbers = #tpu.dot_dimension_numbers<[1], [0], [0], [1], [0, 0, 1, 1], [], []>} : vector<32x768xbf16>, vector<768x64xbf16>, vector<32x64xf32> -> vector<32x64xf32>
    %c0_124 = arith.constant 0 : index
    %c0_125 = arith.constant 0 : index
    %209 = vector.load %arg8[%c0_124, %c0_125] : memref<1x64xf32, #tpu.memory_space<vmem>>, vector<1x64xf32>
    %210 = vector.broadcast %209 : vector<1x64xf32> to vector<32x64xf32>
    %211 = arith.addf %208, %210 : vector<32x64xf32>
    %cst_126 = arith.constant dense<0.000000e+00> : vector<64xf32>
    %212 = vector.multi_reduction <add>, %211, %cst_126 [0] : vector<32x64xf32> to vector<64xf32>
    %213 = vector.shape_cast %212 : vector<64xf32> to vector<1x64xf32>
    %c0_127 = arith.constant 0 : index
    %c0_128 = arith.constant 0 : index
    %214 = vector.load %arg9[%c0_127, %c0_128] : memref<64x4xf32, #tpu.memory_space<vmem>>, vector<64x4xf32>
    %cst_129 = arith.constant dense<0.000000e+00> : vector<1x4xf32>
    %215 = tpu.matmul %213, %214, %cst_129 {dimension_numbers = #tpu.dot_dimension_numbers<[1], [0], [0], [1], [0, 0, 1, 1], [], []>} : vector<1x64xf32>, vector<64x4xf32>, vector<1x4xf32> -> vector<1x4xf32>
    %cst_130 = arith.constant 0.001953125 : f32
    %216 = vector.broadcast %cst_130 : f32 to vector<1x4xf32>
    %217 = arith.mulf %215, %216 : vector<1x4xf32>
    %c0_131 = arith.constant 0 : index
    %c0_132 = arith.constant 0 : index
    %218 = vector.load %arg10[%c0_131, %c0_132] : memref<4x64xf32, #tpu.memory_space<vmem>>, vector<4x64xf32>
    %cst_133 = arith.constant dense<0.000000e+00> : vector<1x64xf32>
    %219 = tpu.matmul %217, %218, %cst_133 {dimension_numbers = #tpu.dot_dimension_numbers<[1], [0], [0], [1], [0, 0, 1, 1], [], []>} : vector<1x4xf32>, vector<4x64xf32>, vector<1x64xf32> -> vector<1x64xf32>
    %220 = vector.broadcast %219 : vector<1x64xf32> to vector<32x64xf32>
    %221 = arith.subf %211, %220 : vector<32x64xf32>
    %222 = arith.mulf %221, %221 : vector<32x64xf32>
    %cst_134 = arith.constant dense<0.000000e+00> : vector<64xf32>
    %223 = vector.multi_reduction <add>, %222, %cst_134 [0] : vector<32x64xf32> to vector<64xf32>
    %224 = vector.shape_cast %223 : vector<64xf32> to vector<1x64xf32>
    %c0_135 = arith.constant 0 : index
    %c0_136 = arith.constant 0 : index
    %225 = vector.load %arg9[%c0_135, %c0_136] : memref<64x4xf32, #tpu.memory_space<vmem>>, vector<64x4xf32>
    %cst_137 = arith.constant dense<0.000000e+00> : vector<1x4xf32>
    %226 = tpu.matmul %224, %225, %cst_137 {dimension_numbers = #tpu.dot_dimension_numbers<[1], [0], [0], [1], [0, 0, 1, 1], [], []>} : vector<1x64xf32>, vector<64x4xf32>, vector<1x4xf32> -> vector<1x4xf32>
    %cst_138 = arith.constant 0.001953125 : f32
    %227 = vector.broadcast %cst_138 : f32 to vector<1x4xf32>
    %228 = arith.mulf %226, %227 : vector<1x4xf32>
    %cst_139 = arith.constant 9.99999974E-6 : f32
    %229 = vector.broadcast %cst_139 : f32 to vector<1x4xf32>
    %230 = arith.addf %228, %229 : vector<1x4xf32>
    %231 = math.rsqrt %230 : vector<1x4xf32>
    %c0_140 = arith.constant 0 : index
    %c0_141 = arith.constant 0 : index
    %232 = vector.load %arg11[%c0_140, %c0_141] : memref<1x4xf32, #tpu.memory_space<vmem>>, vector<1x4xf32>
    %233 = arith.mulf %231, %232 : vector<1x4xf32>
    %c0_142 = arith.constant 0 : index
    %c0_143 = arith.constant 0 : index
    %234 = vector.load %arg10[%c0_142, %c0_143] : memref<4x64xf32, #tpu.memory_space<vmem>>, vector<4x64xf32>
    %cst_144 = arith.constant dense<0.000000e+00> : vector<1x64xf32>
    %235 = tpu.matmul %233, %234, %cst_144 {dimension_numbers = #tpu.dot_dimension_numbers<[1], [0], [0], [1], [0, 0, 1, 1], [], []>} : vector<1x4xf32>, vector<4x64xf32>, vector<1x64xf32> -> vector<1x64xf32>
    %236 = vector.broadcast %235 : vector<1x64xf32> to vector<32x64xf32>
    %237 = arith.mulf %221, %236 : vector<32x64xf32>
    %c0_145 = arith.constant 0 : index
    %c0_146 = arith.constant 0 : index
    %238 = vector.load %arg12[%c0_145, %c0_146] : memref<1x64xf32, #tpu.memory_space<vmem>>, vector<1x64xf32>
    %239 = vector.broadcast %238 : vector<1x64xf32> to vector<32x64xf32>
    %240 = arith.addf %237, %239 : vector<32x64xf32>
    %241 = math.tanh %240 : vector<32x64xf32>
    %242 = vector.extract_strided_slice %241 {offsets = [0, 4], sizes = [32, 60], strides = [1, 1]} : vector<32x64xf32> to vector<32x60xf32>
    %243 = vector.extract_strided_slice %241 {offsets = [0, 0], sizes = [32, 4], strides = [1, 1]} : vector<32x64xf32> to vector<32x4xf32>
    %244 = tpu.concatenate %242, %243 in 1 : vector<32x60xf32>, vector<32x4xf32> -> vector<32x64xf32>
    %245 = arith.maximumf %241, %244 : vector<32x64xf32>
    %246 = vector.shape_cast %245 : vector<32x64xf32> to vector<2x16x64xf32>
    %247 = vector.extract_strided_slice %246 {offsets = [0, 0, 0], sizes = [2, 1, 64], strides = [1, 1, 1]} : vector<2x16x64xf32> to vector<2x1x64xf32>
    %248 = vector.shape_cast %247 : vector<2x1x64xf32> to vector<2x64xf32>
    %249 = vector.extract_strided_slice %246 {offsets = [0, 1, 0], sizes = [2, 1, 64], strides = [1, 1, 1]} : vector<2x16x64xf32> to vector<2x1x64xf32>
    %250 = vector.shape_cast %249 : vector<2x1x64xf32> to vector<2x64xf32>
    %251 = arith.maximumf %248, %250 : vector<2x64xf32>
    %252 = vector.extract_strided_slice %246 {offsets = [0, 2, 0], sizes = [2, 1, 64], strides = [1, 1, 1]} : vector<2x16x64xf32> to vector<2x1x64xf32>
    %253 = vector.shape_cast %252 : vector<2x1x64xf32> to vector<2x64xf32>
    %254 = vector.extract_strided_slice %246 {offsets = [0, 3, 0], sizes = [2, 1, 64], strides = [1, 1, 1]} : vector<2x16x64xf32> to vector<2x1x64xf32>
    %255 = vector.shape_cast %254 : vector<2x1x64xf32> to vector<2x64xf32>
    %256 = arith.maximumf %253, %255 : vector<2x64xf32>
    %257 = vector.extract_strided_slice %246 {offsets = [0, 4, 0], sizes = [2, 1, 64], strides = [1, 1, 1]} : vector<2x16x64xf32> to vector<2x1x64xf32>
    %258 = vector.shape_cast %257 : vector<2x1x64xf32> to vector<2x64xf32>
    %259 = vector.extract_strided_slice %246 {offsets = [0, 5, 0], sizes = [2, 1, 64], strides = [1, 1, 1]} : vector<2x16x64xf32> to vector<2x1x64xf32>
    %260 = vector.shape_cast %259 : vector<2x1x64xf32> to vector<2x64xf32>
    %261 = arith.maximumf %258, %260 : vector<2x64xf32>
    %262 = vector.extract_strided_slice %246 {offsets = [0, 6, 0], sizes = [2, 1, 64], strides = [1, 1, 1]} : vector<2x16x64xf32> to vector<2x1x64xf32>
    %263 = vector.shape_cast %262 : vector<2x1x64xf32> to vector<2x64xf32>
    %264 = vector.extract_strided_slice %246 {offsets = [0, 7, 0], sizes = [2, 1, 64], strides = [1, 1, 1]} : vector<2x16x64xf32> to vector<2x1x64xf32>
    %265 = vector.shape_cast %264 : vector<2x1x64xf32> to vector<2x64xf32>
    %266 = arith.maximumf %263, %265 : vector<2x64xf32>
    %267 = vector.extract_strided_slice %246 {offsets = [0, 8, 0], sizes = [2, 1, 64], strides = [1, 1, 1]} : vector<2x16x64xf32> to vector<2x1x64xf32>
    %268 = vector.shape_cast %267 : vector<2x1x64xf32> to vector<2x64xf32>
    %269 = vector.extract_strided_slice %246 {offsets = [0, 9, 0], sizes = [2, 1, 64], strides = [1, 1, 1]} : vector<2x16x64xf32> to vector<2x1x64xf32>
    %270 = vector.shape_cast %269 : vector<2x1x64xf32> to vector<2x64xf32>
    %271 = arith.maximumf %268, %270 : vector<2x64xf32>
    %272 = vector.extract_strided_slice %246 {offsets = [0, 10, 0], sizes = [2, 1, 64], strides = [1, 1, 1]} : vector<2x16x64xf32> to vector<2x1x64xf32>
    %273 = vector.shape_cast %272 : vector<2x1x64xf32> to vector<2x64xf32>
    %274 = vector.extract_strided_slice %246 {offsets = [0, 11, 0], sizes = [2, 1, 64], strides = [1, 1, 1]} : vector<2x16x64xf32> to vector<2x1x64xf32>
    %275 = vector.shape_cast %274 : vector<2x1x64xf32> to vector<2x64xf32>
    %276 = arith.maximumf %273, %275 : vector<2x64xf32>
    %277 = vector.extract_strided_slice %246 {offsets = [0, 12, 0], sizes = [2, 1, 64], strides = [1, 1, 1]} : vector<2x16x64xf32> to vector<2x1x64xf32>
    %278 = vector.shape_cast %277 : vector<2x1x64xf32> to vector<2x64xf32>
    %279 = vector.extract_strided_slice %246 {offsets = [0, 13, 0], sizes = [2, 1, 64], strides = [1, 1, 1]} : vector<2x16x64xf32> to vector<2x1x64xf32>
    %280 = vector.shape_cast %279 : vector<2x1x64xf32> to vector<2x64xf32>
    %281 = arith.maximumf %278, %280 : vector<2x64xf32>
    %282 = vector.extract_strided_slice %246 {offsets = [0, 14, 0], sizes = [2, 1, 64], strides = [1, 1, 1]} : vector<2x16x64xf32> to vector<2x1x64xf32>
    %283 = vector.shape_cast %282 : vector<2x1x64xf32> to vector<2x64xf32>
    %284 = vector.extract_strided_slice %246 {offsets = [0, 15, 0], sizes = [2, 1, 64], strides = [1, 1, 1]} : vector<2x16x64xf32> to vector<2x1x64xf32>
    %285 = vector.shape_cast %284 : vector<2x1x64xf32> to vector<2x64xf32>
    %286 = arith.maximumf %283, %285 : vector<2x64xf32>
    %287 = tpu.concatenate %251, %256, %261, %266, %271, %276, %281, %286 in 1 : vector<2x64xf32>, vector<2x64xf32>, vector<2x64xf32>, vector<2x64xf32>, vector<2x64xf32>, vector<2x64xf32>, vector<2x64xf32>, vector<2x64xf32> -> vector<2x512xf32>
    %288 = arith.truncf %287 : vector<2x512xf32> to vector<2x512xbf16>
    %c0_147 = arith.constant 0 : index
    %c0_148 = arith.constant 0 : index
    %289 = vector.load %arg13[%c0_147, %c0_148] : memref<512x32xbf16, #tpu.memory_space<vmem>>, vector<512x32xbf16>
    %cst_149 = arith.constant dense<0.000000e+00> : vector<2x32xf32>
    %290 = tpu.matmul %288, %289, %cst_149 {dimension_numbers = #tpu.dot_dimension_numbers<[1], [0], [0], [1], [0, 0, 1, 1], [], []>} : vector<2x512xbf16>, vector<512x32xbf16>, vector<2x32xf32> -> vector<2x32xf32>
    %c0_150 = arith.constant 0 : index
    %c0_151 = arith.constant 0 : index
    %291 = vector.load %arg14[%c0_150, %c0_151] : memref<1x32xf32, #tpu.memory_space<vmem>>, vector<1x32xf32>
    %292 = vector.broadcast %291 : vector<1x32xf32> to vector<2x32xf32>
    %293 = arith.addf %290, %292 : vector<2x32xf32>
    %294 = math.tanh %293 : vector<2x32xf32>
    %295 = arith.truncf %294 : vector<2x32xf32> to vector<2x32xbf16>
    %c0_152 = arith.constant 0 : index
    %c0_153 = arith.constant 0 : index
    %296 = vector.load %arg15[%c0_152, %c0_153] : memref<32x2xbf16, #tpu.memory_space<vmem>>, vector<32x2xbf16>
    %cst_154 = arith.constant dense<0.000000e+00> : vector<2x2xf32>
    %297 = tpu.matmul %295, %296, %cst_154 {dimension_numbers = #tpu.dot_dimension_numbers<[1], [0], [0], [1], [0, 0, 1, 1], [], []>} : vector<2x32xbf16>, vector<32x2xbf16>, vector<2x2xf32> -> vector<2x2xf32>
    %c0_155 = arith.constant 0 : index
    %c0_156 = arith.constant 0 : index
    %298 = vector.load %arg16[%c0_155, %c0_156] : memref<1x2xf32, #tpu.memory_space<vmem>>, vector<1x2xf32>
    %299 = vector.broadcast %298 : vector<1x2xf32> to vector<2x2xf32>
    %300 = arith.addf %297, %299 : vector<2x2xf32>
    %c0_157 = arith.constant 0 : index
    %c0_158 = arith.constant 0 : index
    %301 = vector.load %arg17[%c0_157, %c0_158] : memref<2x2xf32, #tpu.memory_space<vmem>>, vector<2x2xf32>
    tpu.vector_store %arg17[%c0_157, %c0_158], %300 {strides = array<i32>} : memref<2x2xf32, #tpu.memory_space<vmem>>, vector<2x2xf32>,
    return
  }
}

</mosaic_0001>

<bundles_post_ra>
// kernel: net_batchnorm_forward.1
= control target key start
LH: loop header
LB: loop body
LE: loop exit
PB: predicated region body
PF: predicated region fallthrough
CT: control target
= control target key end

     0   :  { %s5412_s0 = inlined_call_operand.vmem [shape: f32[2,3,32,32], index: 0, kind: input, shape index: {}]   ;;  %s5413_s1 = inlined_call_operand.vmem [shape: bf16[288,256], index: 1, kind: input, shape index: {}]   ;;  %s5414_s2 = inlined_call_operand.vmem [shape: f32[1,256], index: 2, kind: input, shape index: {}]   ;;  %s5415_s3 = inlined_call_operand.vmem [shape: f32[256,8], index: 3, kind: input, shape index: {}]   ;;  %s5416_s4 = inlined_call_operand.vmem [shape: f32[8,256], index: 4, kind: input, shape index: {}]   ;;  %s5417_s5 = inlined_call_operand.vmem [shape: f32[1,8], index: 5, kind: input, shape index: {}]   ;;  %s5418_s6 = inlined_call_operand.vmem [shape: f32[1,256], index: 6, kind: input, shape index: {}]   ;;  %s5419_s7 = inlined_call_operand.vmem [shape: bf16[768,64], index: 7, kind: input, shape index: {}]   ;;  %s5420_s8 = inlined_call_operand.vmem [shape: f32[1,64], index: 8, kind: input, shape index: {}]   ;;  %s5421_s9 = inlined_call_operand.vmem [shape: f32[64,4], index: 9, kind: input, shape index: {}]   ;;  %s5422_s10 = inlined_call_operand.vmem [shape: f32[4,64], index: 10, kind: input, shape index: {}]   ;;  %s5423_s11 = inlined_call_operand.vmem [shape: f32[1,4], index: 11, kind: input, shape index: {}]   ;;  %s5424_s12 = inlined_call_operand.vmem [shape: f32[1,64], index: 12, kind: input, shape index: {}]   ;;  %s5425_s13 = inlined_call_operand.vmem [shape: bf16[512,32], index: 13, kind: input, shape index: {}]   ;;  %s5426_s14 = inlined_call_operand.vmem [shape: f32[1,32], index: 14, kind: input, shape index: {}]   ;;  %s5427_s15 = inlined_call_operand.vmem [shape: bf16[32,2], index: 15, kind: input, shape index: {}]   ;;  %s5428_s16 = inlined_call_operand.vmem [shape: f32[1,2], index: 16, kind: input, shape index: {}]   ;;  %s5429_s17 = inlined_call_operand.hbm [shape: f32[2,2], index: 17, kind: output, shape index: {}]  }
   0x1   :  { %5432 = sst [smem:[#allocation7_spill]] %s5412_s0 }
   0x2   :  { %5433 = sst [smem:[#allocation8_spill]] %s5413_s1 }
   0x3   :  { %vm58_vm0 = vcmask 261120   ;;  %v3755_v0 = vmov 0.0   ;;  %s5434_s26 = sld [smem:[#allocation7_spill]] }
   0x4   :  { %59 = vst.msk [vmem:[#allocation2] sm:$0xff] %vm58_vm0, %v3755_v0 }
   0x5   :  { %60 = vst.msk [vmem:[#allocation2 + $0x8] sm:$0xff] %vm58_vm0, %v3755_v0 }
   0x6   :  { %61 = vst.msk [vmem:[#allocation2 + $0x10] sm:$0xff] %vm58_vm0, %v3755_v0 }
   0x9   :  { %v90_v1 = vld [vmem:[%s5434_s26] sm:$0xff]  ;;  %v91_v2 = vld [vmem:[%s5434_s26 + $0x8] sm:$0xff] }
   0xa   :  { %114 = vst.msk [vmem:[#allocation2 + $0x1] sm:$0xff] %vm58_vm0, %v90_v1 }
   0xb   :  { %22 = vsyncpa [#allocation5], 0  ;;  %115 = vst.msk [vmem:[#allocation2 + $0x9] sm:$0xff] %vm58_vm0, %v91_v2  ;;  %s3756_s29 = smov 32   ;;  %v94_v6 = vld [vmem:[%s5434_s26 + $0x20] sm:$0xff]  ;;  %v95_v7 = vld [vmem:[%s5434_s26 + $0x28] sm:$0xff] }
   0xc   :  { %62 = vst.msk [vmem:[#allocation2 + $0x18] sm:$0xff] %vm58_vm0, %v3755_v0  ;;  %v92_v8 = vld [vmem:[%s5434_s26 + $0x10] sm:$0xff]  ;;  %vm63_vm1 = vcmask 254976   ;;  %v93_v9 = vld [vmem:[%s5434_s26 + $0x18] sm:$0xff]  ;;  %v102_v12 = vld [vmem:[%s5434_s26 + $0x60] sm:$0xff]  ;;  %s3757_s19 = smov 96  }
   0xd   :  { %65 = vst.msk [vmem:[#allocation2 + $0x28] sm:$0xff] %vm58_vm0, %v3755_v0  ;;  %v103_v14 = vld [vmem:[%s5434_s26 + $0x68] sm:$0xff]  ;;  %v104_v17 = vld [vmem:[%s5434_s26 + $0x70] sm:$0xff]  ;;  %v105_v19 = vld [vmem:[%s5434_s26 + $0x78] sm:$0xff]  ;;  %s3758_s21 = smov 64   ;;  %s5435_s0 = sld [smem:[#allocation8_spill]] }
   0xe   :  { %66 = vst.msk [vmem:[#allocation2 + $0x30] sm:$0xff] %vm58_vm0, %v3755_v0  ;;  %v96_v22 = vld [vmem:[%s5434_s26 + $0x30] sm:$0xff]  ;;  %v98_v26 = vld [vmem:[%s5434_s26 + $0x40] sm:$0xff]  ;;  %v99_v27 = vld [vmem:[%s5434_s26 + $0x48] sm:$0xff]  ;;  %vm412_vm2 = vcmask 523264   ;;  %vm421_vm3 = vcmask 785408  }
   0xf   :  { %67 = vst.msk [vmem:[#allocation2 + $0x38] sm:$0xff] %vm58_vm0, %v3755_v0  ;;  %v97_v28 = vld [vmem:[%s5434_s26 + $0x38] sm:$0xff]  ;;  %v106_v30 = vld [vmem:[%s5434_s26 + $0x80] sm:$0xff]  ;;  %v107_v31 = vld [vmem:[%s5434_s26 + $0x88] sm:$0xff]  ;;  %vm975_vm4 = vcmask 64512   ;;  %vm1280_vm9 = vcmask 982016  }
  0x10   :  { %68 = vst.msk [vmem:[#allocation2 + $0x40] sm:$0xff] %vm58_vm0, %v3755_v0  ;;  %v100_v33 = vld [vmem:[%s5434_s26 + $0x50] sm:$0xff]  ;;  %v101_v35 = vld [vmem:[%s5434_s26 + $0x58] sm:$0xff]  ;;  %v110_v42 = vld [vmem:[%s5434_s26 + $0xa0] sm:$0xff]  ;;  %vm1374_vm10 = vcmask 1040384   ;;  %vm1697_vm11 = vcmask 1046528  }
  0x11   :  { %v146_v3 = vld [vmem:[#allocation2 + $0x1] sm:$0xff]  ;;  %70 = vst.msk [vmem:[#allocation2 + $0x50] sm:$0xff] %vm58_vm0, %v3755_v0  ;;  %v109_v40 = vld [vmem:[%s5434_s26 + $0x98] sm:$0xff]  ;;  %vm1734_vm12 = vcmask 1045504   ;;  %vm2327_vm13 = vcmask 1043456   ;;  %vm2323_vm14 = vcmask 31744  }
  0x12   :  { %v147_v4 = vld [vmem:[#allocation2 + $0x9] sm:$0xff]  ;;  %71 = vst.msk [vmem:[#allocation2 + $0x58] sm:$0xff] %vm58_vm0, %v3755_v0  ;;  %v111_v45 = vld [vmem:[%s5434_s26 + $0xa8] sm:$0xff] }
  0x13   :  { %v3539_v5 = vpack.i.bf16 %v147_v4, %v146_v3  ;;  %72 = vst.msk [vmem:[#allocation2 + $0x60] sm:$0xff] %vm58_vm0, %v3755_v0  ;;  %v154_v11 = vld [vmem:[#allocation2 + $0x2] sm:$0xff]  ;;  %v113_v59 = vld [vmem:[%s5434_s26 + $0xb8] sm:$0xff] }
  0x14   :  { %73 = vst.msk [vmem:[#allocation2 + $0x68] sm:$0xff] %vm58_vm0, %v3755_v0  ;;  %v108_v37 = vld [vmem:[%s5434_s26 + $0x90] sm:$0xff]  ;;  %v3448_v2 = vld [vmem:[%s5435_s0 + $0x114] sm:$0xf0] }
  0x15   :  { %3540 = vrot.lane.b32.xlu0 %v3539_v5, %s3756_s29  ;;  %75 = vst.msk [vmem:[#allocation2 + $0x78] sm:$0xff] %vm58_vm0, %v3755_v0  ;;  %v112_v54 = vld [vmem:[%s5434_s26 + $0xb0] sm:$0xff] }
  0x16   :  { %76 = vst.msk [vmem:[#allocation2 + $0x80] sm:$0xff] %vm58_vm0, %v3755_v0  ;;  %v3060_v1 = vld [vmem:[%s5435_s0 + $0x110] sm:$0xf] }
  0x17   :  { %77 = vst.msk [vmem:[#allocation2 + $0x88] sm:$0xff] %vm58_vm0, %v3755_v0  ;;  %v3061_v5 = vor.u32 %v3448_v2, %v3060_v1 }
  0x18   :  { %78 = vst.msk [vmem:[#allocation2 + $0x90] sm:$0xff] %vm58_vm0, %v3755_v0 }
  0x19   :  { %80 = vst.msk [vmem:[#allocation2 + $0xa0] sm:$0xff] %vm58_vm0, %v3755_v0  ;;  %764 = vmatpush.bf16.msra.mxu2 %v3061_v5 }
  0x1a   :  { %81 = vst.msk [vmem:[#allocation2 + $0xa8] sm:$0xff] %vm58_vm0, %v3755_v0 }
  0x1b   :  { %82 = vst.msk [vmem:[#allocation2 + $0xb0] sm:$0xff] %vm58_vm0, %v3755_v0 }
  0x1c   :  { %83 = vst.msk [vmem:[#allocation2 + $0xb8] sm:$0xff] %vm58_vm0, %v3755_v0 }
  0x1d   :  { %85 = vst.msk [vmem:[#allocation2 + $0xc8] sm:$0xff] %vm58_vm0, %v3755_v0 }
  0x1e   :  { %86 = vst.msk [vmem:[#allocation2 + $0xd0] sm:$0xff] %vm58_vm0, %v3755_v0 }
  0x1f   :  { %87 = vst.msk [vmem:[#allocation2 + $0xd8] sm:$0xff] %vm58_vm0, %v3755_v0 }
  0x20   :  { %88 = vst.msk [vmem:[#allocation2 + $0xe0] sm:$0xff] %vm58_vm0, %v3755_v0 }
  0x21   :  { %118 = vst.msk [vmem:[#allocation2 + $0x29] sm:$0xff] %vm58_vm0, %v94_v6  ;;  %v3052_v6 = vld [vmem:[%s5435_s0 + $0x100] sm:$0xf] }
  0x22   :  { %119 = vst.msk [vmem:[#allocation2 + $0x31] sm:$0xff] %vm58_vm0, %v95_v7  ;;  %v3446_v7 = vld [vmem:[%s5435_s0 + $0x104] sm:$0xf0] }
  0x23   :  { %116 = vst.msk [vmem:[#allocation2 + $0x11] sm:$0xff] %vm58_vm0, %v92_v8 }
  0x24   :  { %64 = vst.msk [vmem:[#allocation2 + $0x20] sm:$0x3] %vm63_vm1, %v3755_v0 }
  0x25   :  { %117 = vst.msk [vmem:[#allocation2 + $0x19] sm:$0xff] %vm58_vm0, %v93_v9 }
  0x26   :  { %69 = vst.msk [vmem:[#allocation2 + $0x48] sm:$0x3] %vm63_vm1, %v3755_v0 }
  0x27   :  { %74 = vst.msk [vmem:[#allocation2 + $0x70] sm:$0x3] %vm63_vm1, %v3755_v0 }
  0x28   :  { %v163_v10 = vld [vmem:[#allocation2 + $0x28] sm:$0xff]  ;;  %79 = vst.msk [vmem:[#allocation2 + $0x98] sm:$0x3] %vm63_vm1, %v3755_v0 }
  0x29   :  { %v164_v13 = vld [vmem:[#allocation2 + $0x30] sm:$0xff]  ;;  %84 = vst.msk [vmem:[#allocation2 + $0xc0] sm:$0x3] %vm63_vm1, %v3755_v0 }
  0x2a   :  { %v3549_v15 = vpack.i.bf16 %v164_v13, %v163_v10  ;;  %v155_v16 = vld [vmem:[#allocation2 + $0xa] sm:$0xff]  ;;  %89 = vst.msk [vmem:[#allocation2 + $0xe8] sm:$0x3] %vm63_vm1, %v3755_v0 }
  0x2b   :  { %v3544_v18 = vpack.i.bf16 %v155_v16, %v154_v11  ;;  %126 = vst.msk [vmem:[#allocation2 + $0x79] sm:$0xff] %vm58_vm0, %v102_v12  ;;  %v148_v23 = vld [vmem:[#allocation2 + $0x11] sm:$0xff]  ;;  %v3053_v11 = vor.u32 %v3446_v7, %v3052_v6  ;;  %v2980_v12 = vld [vmem:[%s5435_s0 + $0x70] sm:$0xf] }
  0x2c   :  { %3550 = vrot.lane.b32.xlu1 %v3549_v15, %s3757_s19  ;;  %127 = vst.msk [vmem:[#allocation2 + $0x81] sm:$0xff] %vm58_vm0, %v103_v14  ;;  %v156_v20 = vld [vmem:[#allocation2 + $0x12] sm:$0xff]  ;;  %v157_v21 = vld [vmem:[#allocation2 + $0x1a] sm:$0xff]  ;;  %v179_v55 = vld [vmem:[#allocation2 + $0x2a] sm:$0xff] }
  0x2d   :  { %3545 = vrot.lane.b32.xlu0 %v3544_v18, %s3758_s21  ;;  %v149_v24 = vld [vmem:[#allocation2 + $0x19] sm:$0xff]  ;;  %128 = vst.msk [vmem:[#allocation2 + $0x89] sm:$0xff] %vm58_vm0, %v104_v17  ;;  %v3559_v25 = vpack.i.bf16 %v157_v21, %v156_v20  ;;  %v3428_v13 = vld [vmem:[%s5435_s0 + $0x74] sm:$0xf0]  ;;  %v3427_v14 = vld [vmem:[%s5435_s0 + $0x74] sm:$0xf]  ;;  %765 = vmatpush.bf16.msra.mxu2 %v3053_v11 }
  0x2e   :  { %129 = vst.msk [vmem:[#allocation2 + $0x91] sm:$0xff] %vm58_vm0, %v105_v19  ;;  %v3554_v29 = vpack.i.bf16 %v149_v24, %v148_v23  ;;  %v2981_v17 = vor.u32 %v3428_v13, %v2980_v12  ;;  %v2982_v18 = vld [vmem:[%s5435_s0 + $0x78] sm:$0xf0]  ;;  %v2972_v19 = vld [vmem:[%s5435_s0 + $0x60] sm:$0xf] }
  0x2f   :  { %3560 = vrot.lane.b32.xlu2 %v3559_v25, %s3758_s21  ;;  %120 = vst.msk [vmem:[#allocation2 + $0x39] sm:$0xff] %vm58_vm0, %v96_v22  ;;  %v2985_v20 = vor.u32 %v3427_v14, %v2982_v18  ;;  %v3426_v21 = vld [vmem:[%s5435_s0 + $0x64] sm:$0xf0]  ;;  %v3425_v22 = vld [vmem:[%s5435_s0 + $0x64] sm:$0xf] }
  0x30   :  { %122 = vst.msk [vmem:[#allocation2 + $0x51] sm:$0xff] %vm58_vm0, %v98_v26  ;;  %v2974_v23 = vld [vmem:[%s5435_s0 + $0x68] sm:$0xf0]  ;;  %700 = vmatpush.bf16.msra.mxu0 %v2981_v17  ;;  %v2973_v26 = vor.u32 %v3426_v21, %v2972_v19  ;;  %v2940_v13 = vld [vmem:[%s5435_s0 + $0x20] sm:$0xf] }
  0x31   :  { %123 = vst.msk [vmem:[#allocation2 + $0x59] sm:$0xff] %vm58_vm0, %v99_v27  ;;  %787 = vmatpush.bf16.msra.mxu3 %v2985_v20  ;;  %v2977_v27 = vor.u32 %v3425_v22, %v2974_v23  ;;  %v3418_v14 = vld [vmem:[%s5435_s0 + $0x24] sm:$0xf0]  ;;  %v2942_v17 = vld [vmem:[%s5435_s0 + $0x28] sm:$0xf0] }
  0x32   :  { %v150_v32 = vld [vmem:[#allocation2 + $0x79] sm:$0xff]  ;;  %121 = vst.msk [vmem:[#allocation2 + $0x41] sm:$0xff] %vm58_vm0, %v97_v28  ;;  %v2964_v28 = vld [vmem:[%s5435_s0 + $0x50] sm:$0xf]  ;;  %v3443_v18 = vld [vmem:[%s5435_s0 + $0xf4] sm:$0xf] }
  0x33   :  { %v151_v34 = vld [vmem:[#allocation2 + $0x81] sm:$0xff]  ;;  %130 = vst.msk [vmem:[#allocation2 + $0xa1] sm:$0xff] %vm58_vm0, %v106_v30  ;;  %v3046_v19 = vld [vmem:[%s5435_s0 + $0xf8] sm:$0xf0]  ;;  %v3416_v23 = vld [vmem:[%s5435_s0 + $0x14] sm:$0xf0] }
  0x34   :  { %3555 = vrot.lane.b32.xlu1 %v3554_v29, %s3756_s29  ;;  %v3569_v36 = vpack.i.bf16 %v151_v34, %v150_v32  ;;  %131 = vst.msk [vmem:[#allocation2 + $0xa9] sm:$0xff] %vm58_vm0, %v107_v31  ;;  %v158_v38 = vld [vmem:[#allocation2 + $0x7a] sm:$0xff]  ;;  %v159_v39 = vld [vmem:[#allocation2 + $0x82] sm:$0xff]  ;;  %v3424_v29 = vld [vmem:[%s5435_s0 + $0x54] sm:$0xf0]  ;;  %701 = vmatpush.bf16.msra.mxu0 %v2973_v26  ;;  %v3049_v21 = vor.u32 %v3443_v18, %v3046_v19 }
  0x35   :  { %124 = vst.msk [vmem:[#allocation2 + $0x61] sm:$0xff] %vm58_vm0, %v100_v33  ;;  %v152_v41 = vld [vmem:[#allocation2 + $0x89] sm:$0xff]  ;;  %v153_v43 = vld [vmem:[#allocation2 + $0x91] sm:$0xff]  ;;  %v3574_v46 = vpack.i.bf16 %v159_v39, %v158_v38  ;;  %788 = vmatpush.bf16.msra.mxu3 %v2977_v27  ;;  %v2965_v38 = vor.u32 %v3424_v29, %v2964_v28 }
  0x36   :  { %3570 = vrot.lane.b32.xlu0 %v3569_v36, %s3756_s29  ;;  %125 = vst.msk [vmem:[#allocation2 + $0x69] sm:$0xff] %vm58_vm0, %v101_v35  ;;  %v165_v44 = vld [vmem:[#allocation2 + $0x38] sm:$0xff]  ;;  %v3584_v48 = vpack.i.bf16 %v153_v43, %v152_v41  ;;  %v160_v50 = vld [vmem:[#allocation2 + $0x8a] sm:$0xff]  ;;  %v2966_v32 = vld [vmem:[%s5435_s0 + $0x58] sm:$0xf0]  ;;  %816 = vmatpush.bf16.msrb.mxu2 %v3049_v21 }
  0x37   :  { %132 = vst.msk [vmem:[#allocation2 + $0xb1] sm:$0xff] %vm58_vm0, %v108_v37  ;;  %v161_v51 = vld [vmem:[#allocation2 + $0x92] sm:$0xff]  ;;  %v3423_v31 = vld [vmem:[%s5435_s0 + $0x54] sm:$0xf]  ;;  %v3422_v43 = vld [vmem:[%s5435_s0 + $0x44] sm:$0xf0] }
  0x38   :  { %133 = vst.msk [vmem:[#allocation2 + $0xb9] sm:$0xff] %vm58_vm0, %v109_v40  ;;  %v180_v56 = vld [vmem:[#allocation2 + $0x32] sm:$0xff]  ;;  %v3589_v57 = vpack.i.bf16 %v161_v51, %v160_v50  ;;  %v2969_v39 = vor.u32 %v3423_v31, %v2966_v32  ;;  %702 = vmatpush.bf16.msra.mxu0 %v2965_v38  ;;  %v2932_v22 = vld [vmem:[%s5435_s0 + $0x10] sm:$0xf]  ;;  %v3415_v28 = vld [vmem:[%s5435_s0 + $0x14] sm:$0xf] }
  0x39   :  { %v166_v47 = vld [vmem:[#allocation2 + $0x40] sm:$0xff]  ;;  %134 = vst.msk [vmem:[#allocation2 + $0xc9] sm:$0xff] %vm58_vm0, %v110_v42  ;;  %v3599_v60 = vpack.i.bf16 %v180_v56, %v179_v55  ;;  %v188_v61 = vld [vmem:[#allocation2 + $0x50] sm:$0xff]  ;;  %v189_v62 = vld [vmem:[#allocation2 + $0x58] sm:$0xff]  ;;  %v2933_v26 = vor.u32 %v3416_v23, %v2932_v22 }
  0x3a   :  { %v3564_v49 = vpack.i.bf16 %v166_v47, %v165_v44  ;;  %135 = vst.msk [vmem:[#allocation2 + $0xd1] sm:$0xff] %vm58_vm0, %v111_v45  ;;  %v167_v52 = vld [vmem:[#allocation2 + $0xa0] sm:$0xff]  ;;  %v204_v9 = vld [vmem:[#allocation2 + $0x52] sm:$0xff]  ;;  %v3604_v15 = vpack.i.bf16 %v189_v62, %v188_v61  ;;  %v3421_v44 = vld [vmem:[%s5435_s0 + $0x44] sm:$0xf]  ;;  %789 = vmatpush.bf16.msra.mxu3 %v2969_v39 }
  0x3b   :  { %v168_v53 = vld [vmem:[#allocation2 + $0xa8] sm:$0xff]  ;;  %136 = vst.msk [vmem:[#allocation2 + $0xd9] sm:$0xff] %vm58_vm0, %v112_v54  ;;  %v181_v3 = vld [vmem:[#allocation2 + $0x3a] sm:$0xff]  ;;  %v196_v30 = vld [vmem:[#allocation2 + $0x51] sm:$0xff] }
  0x3c   :  { %3575 = vrot.lane.b32.xlu1 %v3574_v46, %s3758_s21  ;;  %3565 = vrot.lane.b32.xlu2 %v3564_v49, %s3757_s19  ;;  %v3579_v58 = vpack.i.bf16 %v168_v53, %v167_v52  ;;  %137 = vst.msk [vmem:[#allocation2 + $0xe1] sm:$0xff] %vm58_vm0, %v113_v59  ;;  %v182_v8 = vld [vmem:[#allocation2 + $0x42] sm:$0xff]  ;;  %v205_v10 = vld [vmem:[#allocation2 + $0x5a] sm:$0xff]  ;;  %v3420_v50 = vld [vmem:[%s5435_s0 + $0x34] sm:$0xf0] }
  0x3d   :  { %v3614_v24 = vpack.i.bf16 %v182_v8, %v181_v3  ;;  %v4057_v25 = vpack.c.bf16 %v205_v10, %v204_v9  ;;  %v190_v33 = vld [vmem:[#allocation2 + $0x60] sm:$0xff]  ;;  %v191_v34 = vld [vmem:[#allocation2 + $0x68] sm:$0xff]  ;;  %v2956_v40 = vld [vmem:[%s5435_s0 + $0x40] sm:$0xf] }
  0x3e   :  { %3585 = vrot.lane.b32.xlu0 %v3584_v48, %s3756_s29  ;;  %v169_v63 = vld [vmem:[#allocation2 + $0xb0] sm:$0xff]  ;;  %v197_v35 = vld [vmem:[#allocation2 + $0x59] sm:$0xff]  ;;  %v183_v36 = vld [vmem:[#allocation2 + $0xa2] sm:$0xff]  ;;  %v3619_v41 = vpack.i.bf16 %v191_v34, %v190_v33  ;;  %v2957_v47 = vor.u32 %v3422_v43, %v2956_v40 }
  0x3f   :  { %v170_v4 = vld [vmem:[#allocation2 + $0xb8] sm:$0xff]  ;;  %3066 = vmatmul.msk.bf16.vlgmr.msra.gmra.mxu2 %vm58_vm0, %v4057_v25  ;;  %v184_v37 = vld [vmem:[#allocation2 + $0xaa] sm:$0xff]  ;;  %v3609_v42 = vpack.i.bf16 %v197_v35, %v196_v30  ;;  %v2958_v45 = vld [vmem:[%s5435_s0 + $0x48] sm:$0xf0] }
  0x40   :  { %v3594_v16 = vpack.i.bf16 %v170_v4, %v169_v63  ;;  %v3629_v46 = vpack.i.bf16 %v184_v37, %v183_v36  ;;  %v2961_v48 = vor.u32 %v3421_v44, %v2958_v45  ;;  %v2948_v49 = vld [vmem:[%s5435_s0 + $0x30] sm:$0xf]  ;;  %v3419_v52 = vld [vmem:[%s5435_s0 + $0x34] sm:$0xf]  ;;  %v2950_v53 = vld [vmem:[%s5435_s0 + $0x38] sm:$0xf0]  ;;  %703 = vmatpush.bf16.msra.mxu0 %v2957_v47 }
  0x41   :  { %v198_v51 = vld [vmem:[#allocation2 + $0x61] sm:$0xff]  ;;  %v193_v55 = vld [vmem:[#allocation2 + $0xd0] sm:$0xff]  ;;  %v2949_v61 = vor.u32 %v3420_v50, %v2948_v49  ;;  %v2953_v62 = vor.u32 %v3419_v52, %v2950_v53  ;;  %v2924_v35 = vld [vmem:[%s5435_s0] sm:$0xf] }
  0x42   :  { %v192_v54 = vld [vmem:[#allocation2 + $0xc8] sm:$0xff]  ;;  %790 = vmatpush.bf16.msra.mxu3 %v2961_v48  ;;  %v194_v4 = vld [vmem:[#allocation2 + $0xd8] sm:$0xff]  ;;  %v2934_v29 = vld [vmem:[%s5435_s0 + $0x18] sm:$0xf0] }
  0x43   :  { %v199_v56 = vld [vmem:[#allocation2 + $0x69] sm:$0xff]  ;;  %v3634_v63 = vpack.i.bf16 %v193_v55, %v192_v54  ;;  %v195_v5 = vld [vmem:[#allocation2 + $0xe0] sm:$0xff]  ;;  %v201_v7 = vld [vmem:[#allocation2 + $0xd1] sm:$0xff]  ;;  %v2937_v31 = vor.u32 %v3415_v28, %v2934_v29 }
  0x44   :  { %3590 = vrot.lane.b32.xlu1 %v3589_v57, %s3758_s21  ;;  %3580 = vrot.lane.b32.xlu2 %v3579_v58, %s3757_s19  ;;  %v185_v57 = vld [vmem:[#allocation2 + $0xb2] sm:$0xff]  ;;  %v186_v58 = vld [vmem:[#allocation2 + $0xba] sm:$0xff]  ;;  %v206_v59 = vld [vmem:[#allocation2 + $0x62] sm:$0xff]  ;;  %v3624_v1 = vpack.i.bf16 %v199_v56, %v198_v51  ;;  %v3649_v8 = vpack.i.bf16 %v195_v5, %v194_v4 }
  0x45   :  { %v3644_v2 = vpack.i.bf16 %v186_v58, %v185_v57  ;;  %704 = vmatpush.bf16.msra.mxu0 %v2949_v61  ;;  %v200_v6 = vld [vmem:[#allocation2 + $0xc9] sm:$0xff]  ;;  %v202_v10 = vld [vmem:[#allocation2 + $0xd9] sm:$0xff]  ;;  %v203_v11 = vld [vmem:[#allocation2 + $0xe1] sm:$0xff] }
  0x46   :  { %3600 = vrot.lane.b32.xlu0 %v3599_v60, %s3756_s29  ;;  %v207_v60 = vld [vmem:[#allocation2 + $0x6a] sm:$0xff]  ;;  %791 = vmatpush.bf16.msra.mxu3 %v2953_v62  ;;  %v3639_v9 = vpack.i.bf16 %v201_v7, %v200_v6  ;;  %v3654_v12 = vpack.i.bf16 %v203_v11, %v202_v10  ;;  %v209_v27 = vld [vmem:[#allocation2 + $0xd2] sm:$0xff]  ;;  %v3414_v36 = vld [vmem:[%s5435_s0 + $0x4] sm:$0xf0] }
  0x47   :  { %v4103_v3 = vpack.c.bf16 %v207_v60, %v206_v59  ;;  %v3044_v32 = vld [vmem:[%s5435_s0 + $0xf0] sm:$0xf]  ;;  %v3444_v33 = vld [vmem:[%s5435_s0 + $0xf4] sm:$0xf0]  ;;  %v3413_v37 = vld [vmem:[%s5435_s0 + $0x4] sm:$0xf]  ;;  %v2925_v38 = vor.u32 %v3414_v36, %v2924_v35 }
  0x48   :  { %v3045_v34 = vor.u32 %v3444_v33, %v3044_v32  ;;  %v2926_v39 = vld [vmem:[%s5435_s0 + $0x8] sm:$0xf0]  ;;  %v3441_v43 = vld [vmem:[%s5435_s0 + $0xe4] sm:$0xf]  ;;  %v3062_v47 = vld [vmem:[%s5435_s0 + $0x118] sm:$0xf0] }
  0x49   :  { %v2929_v40 = vor.u32 %v3413_v37, %v2926_v39  ;;  %v3038_v45 = vld [vmem:[%s5435_s0 + $0xe8] sm:$0xf0]  ;;  %v3028_v50 = vld [vmem:[%s5435_s0 + $0xd0] sm:$0xf]  ;;  %v3440_v51 = vld [vmem:[%s5435_s0 + $0xd4] sm:$0xf0] }
  0x4a   :  { %729 = vmatpush.bf16.msra.mxu1 %v3045_v34  ;;  %v3041_v48 = vor.u32 %v3441_v43, %v3038_v45  ;;  %v3439_v52 = vld [vmem:[%s5435_s0 + $0xd4] sm:$0xf]  ;;  %v3029_v53 = vor.u32 %v3440_v51, %v3028_v50  ;;  %v3030_v54 = vld [vmem:[%s5435_s0 + $0xd8] sm:$0xf0]  ;;  %v3020_v56 = vld [vmem:[%s5435_s0 + $0xc0] sm:$0xf] }
  0x4b   :  { %v3033_v55 = vor.u32 %v3439_v52, %v3030_v54  ;;  %v3438_v57 = vld [vmem:[%s5435_s0 + $0xc4] sm:$0xf0]  ;;  %v3437_v58 = vld [vmem:[%s5435_s0 + $0xc4] sm:$0xf]  ;;  %v3022_v60 = vld [vmem:[%s5435_s0 + $0xc8] sm:$0xf0] }
  0x4c   :  { %3605 = vrot.lane.b32.xlu1 %v3604_v15, %s3758_s21  ;;  %3595 = vrot.lane.b32.xlu2 %v3594_v16, %s3757_s19  ;;  %v3417_v15 = vld [vmem:[%s5435_s0 + $0x24] sm:$0xf]  ;;  %v2941_v16 = vor.u32 %v3418_v14, %v2940_v13  ;;  %v3021_v59 = vor.u32 %v3438_v57, %v3020_v56  ;;  %v211_v62 = vld [vmem:[#allocation2 + $0xe2] sm:$0xff]  ;;  %v3436_v5 = vld [vmem:[%s5435_s0 + $0xb4] sm:$0xf0] }
  0x4d   :  { %v2945_v20 = vor.u32 %v3417_v15, %v2942_v17  ;;  %817 = vmatpush.bf16.msrb.mxu2 %v3041_v48  ;;  %v210_v61 = vld [vmem:[#allocation2 + $0xda] sm:$0xff]  ;;  %v3012_v4 = vld [vmem:[%s5435_s0 + $0xb0] sm:$0xf]  ;;  %v3435_v6 = vld [vmem:[%s5435_s0 + $0xb4] sm:$0xf] }
  0x4e   :  { %3615 = vrot.lane.b32.xlu0 %v3614_v24, %s3756_s29  ;;  %v208_v24 = vld [vmem:[#allocation2 + $0xca] sm:$0xff]  ;;  %705 = vmatpush.bf16.msra.mxu0 %v2941_v16  ;;  %v3013_v7 = vor.u32 %v3436_v5, %v3012_v4  ;;  %v3004_v11 = vld [vmem:[%s5435_s0 + $0xa0] sm:$0xf]  ;;  %v3433_v13 = vld [vmem:[%s5435_s0 + $0xa4] sm:$0xf] }
  0x4f   :  { %3067 = vmatmul.msk.bf16.gmra.mxu2 %vm58_vm0, %v4103_v3  ;;  %792 = vmatpush.bf16.msra.mxu3 %v2945_v20  ;;  %v4143_v30 = vpack.c.bf16 %v209_v27, %v208_v24  ;;  %v3006_v15 = vld [vmem:[%s5435_s0 + $0xa8] sm:$0xf0]  ;;  %v2996_v17 = vld [vmem:[%s5435_s0 + $0x90] sm:$0xf]  ;;  %v3432_v18 = vld [vmem:[%s5435_s0 + $0x94] sm:$0xf0] }
  0x50   :  { %v3009_v16 = vor.u32 %v3433_v13, %v3006_v15  ;;  %v3431_v19 = vld [vmem:[%s5435_s0 + $0x94] sm:$0xf]  ;;  %v2997_v20 = vor.u32 %v3432_v18, %v2996_v17  ;;  %v2998_v21 = vld [vmem:[%s5435_s0 + $0x98] sm:$0xf0]  ;;  %v138_v27 = vld [vmem:[#allocation2] sm:$0xff] }
  0x51   :  { %818 = vmatpush.bf16.msrb.mxu2 %v3033_v55  ;;  %v139_v28 = vld [vmem:[#allocation2 + $0x8] sm:$0xff]  ;;  %v2988_v34 = vld [vmem:[%s5435_s0 + $0x80] sm:$0xf]  ;;  %v3430_v35 = vld [vmem:[%s5435_s0 + $0x84] sm:$0xf0] }
  0x52   :  { %706 = vmatpush.bf16.msra.mxu0 %v2933_v26  ;;  %v3001_v26 = vor.u32 %v3431_v19, %v2998_v21  ;;  %v3429_v36 = vld [vmem:[%s5435_s0 + $0x84] sm:$0xf]  ;;  %v2989_v39 = vor.u32 %v3430_v35, %v2988_v34  ;;  %v3054_v51 = vld [vmem:[%s5435_s0 + $0x108] sm:$0xf0]  ;;  %v140_v55 = vld [vmem:[#allocation2 + $0x10] sm:$0xff] }
  0x53   :  { %793 = vmatpush.bf16.msra.mxu3 %v2937_v31  ;;  %v3445_v50 = vld [vmem:[%s5435_s0 + $0x104] sm:$0xf]  ;;  %v143_v15 = vld [vmem:[#allocation2 + $0x80] sm:$0xff] }
  0x54   :  { %3620 = vrot.lane.b32.xlu1 %v3619_v41, %s3758_s21  ;;  %3610 = vrot.lane.b32.xlu2 %v3609_v42, %s3757_s19  ;;  %v3036_v41 = vld [vmem:[%s5435_s0 + $0xe0] sm:$0xf]  ;;  %v3442_v42 = vld [vmem:[%s5435_s0 + $0xe4] sm:$0xf0] }
  0x55   :  { %v3037_v44 = vor.u32 %v3442_v42, %v3036_v41  ;;  %v141_v56 = vld [vmem:[#allocation2 + $0x18] sm:$0xff] }
  0x56   :  { %3630 = vrot.lane.b32.xlu0 %v3629_v46, %s3756_s29  ;;  %707 = vmatpush.bf16.msra.mxu0 %v2925_v38  ;;  %v3447_v46 = vld [vmem:[%s5435_s0 + $0x114] sm:$0xf] }
  0x57   :  { %794 = vmatpush.bf16.msra.mxu3 %v2929_v40  ;;  %730 = vmatpush.bf16.msra.mxu1 %v3037_v44  ;;  %v3065_v49 = vor.u32 %v3447_v46, %v3062_v47  ;;  %v2990_v40 = vld [vmem:[%s5435_s0 + $0x88] sm:$0xf0] }
  0x58   :  { %v2993_v43 = vor.u32 %v3429_v36, %v2990_v40 }
  0x5a   :  { %851 = vmatpush.bf16.msrb.mxu0 %v3065_v49 }
  0x5b   :  { %731 = vmatpush.bf16.msra.mxu1 %v3029_v53 }
  0x5c   :  { %3635 = vrot.lane.b32.xlu1 %v3634_v63, %s3758_s21  ;;  %3625 = vrot.lane.b32.xlu2 %v3624_v1, %s3757_s19  ;;  %v3025_v63 = vor.u32 %v3437_v58, %v3022_v60  ;;  %v4207_v1 = vpack.c.bf16 %v211_v62, %v210_v61  ;;  %v3057_v58 = vor.u32 %v3445_v50, %v3054_v51 }
  0x5e   :  { %3645 = vrot.lane.b32.xlu0 %v3644_v2, %s3756_s29  ;;  %819 = vmatpush.bf16.msrb.mxu2 %v3025_v63 }
  0x5f   :  { %3068 = vmatmul.msk.bf16.gmra.mxu2 %vm58_vm0, %v4143_v30  ;;  %732 = vmatpush.bf16.msra.mxu1 %v3021_v59 }
  0x60   :  { %852 = vmatpush.bf16.msrb.mxu0 %v3057_v58 }
  0x63   :  { %733 = vmatpush.bf16.msra.mxu1 %v3013_v7 }
  0x64   :  { %3650 = vrot.lane.b32.xlu1 %v3649_v8, %s3758_s21  ;;  %3640 = vrot.lane.b32.xlu2 %v3639_v9, %s3757_s19  ;;  %v3014_v8 = vld [vmem:[%s5435_s0 + $0xb8] sm:$0xf0] }
  0x65   :  { %v3017_v10 = vor.u32 %v3435_v6, %v3014_v8 }
  0x67   :  { %820 = vmatpush.bf16.msrb.mxu2 %v3017_v10 }
  0x6b   :  { %821 = vmatpush.bf16.msrb.mxu2 %v3009_v16 }
  0x6c   :  { %3655 = vrot.lane.b32.xlu2 %v3654_v12, %s3757_s19  ;;  %v3434_v12 = vld [vmem:[%s5435_s0 + $0xa4] sm:$0xf0] }
  0x6d   :  { %v3005_v14 = vor.u32 %v3434_v12, %v3004_v11 }
  0x6f   :  { %3069 = vmatmul.msk.bf16.gmra.mxu2 %vm58_vm0, %v4207_v1  ;;  %734 = vmatpush.bf16.msra.mxu1 %v3005_v14  ;;  %v142_v14 = vld [vmem:[#allocation2 + $0x78] sm:$0xff] }
  0x70   :  { %822 = vmatpush.bf16.msrb.mxu2 %v3001_v26 }
  0x73   :  { %735 = vmatpush.bf16.msra.mxu1 %v2997_v20 }
  0x74   :  { %823 = vmatpush.bf16.msrb.mxu2 %v2993_v43 }
  0x77   :  { %736 = vmatpush.bf16.msra.mxu1 %v2989_v39 }
  0x87   :  { %v3541_v9 = vpop.permute.xlu0 %3540 }
  0x88   :  { %v3543_v22 = vunpack.i.h.bf16 %v3541_v9  ;;  %v3542_v23 = vunpack.i.l.bf16 %v3541_v9 }
  0x89   :  { %v4209_v2 = vpop.permute.xlu2 %3560 }
  0x8a   :  { %v404_v41 = vsel %vm58_vm0, %v138_v27, %v3542_v23  ;;  %v405_v42 = vsel %vm58_vm0, %v139_v28, %v3543_v22  ;;  %v3563_v59 = vunpack.i.h.bf16 %v4209_v2  ;;  %v3562_v60 = vunpack.i.l.bf16 %v4209_v2  ;;  %v171_v27 = vld [vmem:[#allocation2 + $0x29] sm:$0xff]  ;;  %v172_v28 = vld [vmem:[#allocation2 + $0x31] sm:$0xff] }
  0x96   :  { %v3566_v24 = vpop.permute.xlu2 %3565 }
  0x97   :  { %v3568_v63 = vunpack.i.h.bf16 %v3566_v24  ;;  %v3567_v4 = vunpack.i.l.bf16 %v3566_v24 }
  0x9e   :  { %v3551_v29 = vpop.permute.xlu1 %3550  ;;  %v3581_v54 = vpop.permute.xlu2 %3580 }
  0x9f   :  { %v3553_v31 = vunpack.i.h.bf16 %v3551_v29  ;;  %v3552_v32 = vunpack.i.l.bf16 %v3551_v29  ;;  %v3546_v33 = vpop.permute.xlu0 %3545  ;;  %v3583_v24 = vunpack.i.h.bf16 %v3581_v54  ;;  %v3582_v26 = vunpack.i.l.bf16 %v3581_v54  ;;  %v174_v54 = vld [vmem:[#allocation2 + $0x41] sm:$0xff] }
  0xa0   :  { %v3548_v37 = vunpack.i.h.bf16 %v3546_v33  ;;  %v3547_v38 = vunpack.i.l.bf16 %v3546_v33 }
  0xa2   :  { %v413_v44 = vsel %vm412_vm2, %v404_v41, %v3547_v38  ;;  %v414_v45 = vsel %vm412_vm2, %v405_v42, %v3548_v37 }
  0xa3   :  { %v422_v46 = vsel %vm421_vm3, %v413_v44, %v3552_v32  ;;  %v423_v47 = vsel %vm421_vm3, %v414_v45, %v3553_v31 }
  0xa4   :  { %v454_v48 = vpack.c.bf16 %v423_v47, %v422_v46 }
  0xa6   :  { %v3556_v49 = vpop.permute.xlu1 %3555  ;;  %708 = vmatmul.bf16.vlgmr.msra.gmra.mxu0 %v454_v48  ;;  %795 = vmatmul.bf16.vlgmr.msra.gmra.mxu3 %v454_v48  ;;  %v4281_v9 = vpop.permute.xlu2 %3595 }
  0xa7   :  { %v3558_v52 = vunpack.i.h.bf16 %v3556_v49  ;;  %v3557_v53 = vunpack.i.l.bf16 %v3556_v49 }
  0xa8   :  { %v3571_v57 = vpop.permute.xlu0 %3570 }
  0xa9   :  { %v406_v61 = vsel %vm58_vm0, %v140_v55, %v3557_v53  ;;  %v407_v62 = vsel %vm58_vm0, %v141_v56, %v3558_v52  ;;  %v3573_v12 = vunpack.i.h.bf16 %v3571_v57  ;;  %v3572_v13 = vunpack.i.l.bf16 %v3571_v57  ;;  %v173_v53 = vld [vmem:[#allocation2 + $0x39] sm:$0xff]  ;;  %v144_v55 = vld [vmem:[#allocation2 + $0x88] sm:$0xff]  ;;  %v145_v56 = vld [vmem:[#allocation2 + $0x90] sm:$0xff] }
  0xaa   :  { %v415_v6 = vsel %vm412_vm2, %v406_v61, %v3562_v60  ;;  %v416_v7 = vsel %vm412_vm2, %v407_v62, %v3563_v59 }
  0xab   :  { %v424_v10 = vsel %vm421_vm3, %v415_v6, %v3567_v4  ;;  %v425_v2 = vsel %vm421_vm3, %v416_v7, %v3568_v63  ;;  %v409_v20 = vsel %vm58_vm0, %v143_v15, %v3573_v12  ;;  %v408_v21 = vsel %vm58_vm0, %v142_v14, %v3572_v13 }
  0xac   :  { %v457_v11 = vpack.c.bf16 %v425_v2, %v424_v10  ;;  %v3598_v10 = vunpack.i.h.bf16 %v4281_v9  ;;  %v3597_v2 = vunpack.i.l.bf16 %v4281_v9 }
  0xae   :  { %v3576_v5 = vpop.permute.xlu1 %3575  ;;  %v3611_v29 = vpop.permute.xlu2 %3610 }
  0xaf   :  { %v3578_v17 = vunpack.i.h.bf16 %v3576_v5  ;;  %v3577_v18 = vunpack.i.l.bf16 %v3576_v5  ;;  %v3613_v36 = vunpack.i.h.bf16 %v3611_v29  ;;  %v3612_v37 = vunpack.i.l.bf16 %v3611_v29 }
  0xb0   :  { %v4279_v8 = vpop.permute.xlu0 %3585 }
  0xb1   :  { %v417_v31 = vsel %vm412_vm2, %v408_v21, %v3577_v18  ;;  %v418_v32 = vsel %vm412_vm2, %v409_v20, %v3578_v17  ;;  %v3588_v51 = vunpack.i.h.bf16 %v4279_v8  ;;  %v3587_v52 = vunpack.i.l.bf16 %v4279_v8 }
  0xb2   :  { %v426_v40 = vsel %vm421_vm3, %v417_v31, %v3582_v26  ;;  %v427_v41 = vsel %vm421_vm3, %v418_v32, %v3583_v24  ;;  %v175_v24 = vld [vmem:[#allocation2 + $0xa1] sm:$0xff]  ;;  %v176_v26 = vld [vmem:[#allocation2 + $0xa9] sm:$0xff] }
  0xb3   :  { %v460_v47 = vpack.c.bf16 %v427_v41, %v426_v40  ;;  %v411_v5 = vsel %vm58_vm0, %v145_v56, %v3588_v51  ;;  %v410_v6 = vsel %vm58_vm0, %v144_v55, %v3587_v52 }
  0xb6   :  { %v4285_v16 = vpop.permute.xlu1 %3590  ;;  %713 = vmatmul.bf16.gmra.mxu0 %v457_v11  ;;  %800 = vmatmul.bf16.gmra.mxu3 %v457_v11  ;;  %v3626_v60 = vpop.permute.xlu2 %3625 }
  0xb7   :  { %v3593_v61 = vunpack.i.h.bf16 %v4285_v16  ;;  %v3592_v62 = vunpack.i.l.bf16 %v4285_v16  ;;  %v3628_v7 = vunpack.i.h.bf16 %v3626_v60  ;;  %v3627_v8 = vunpack.i.l.bf16 %v3626_v60 }
  0xb8   :  { %v3601_v19 = vpop.permute.xlu0 %3600 }
  0xb9   :  { %v3603_v22 = vunpack.i.h.bf16 %v3601_v19  ;;  %v3602_v23 = vunpack.i.l.bf16 %v3601_v19  ;;  %v419_v13 = vsel %vm412_vm2, %v410_v6, %v3592_v62  ;;  %v420_v14 = vsel %vm412_vm2, %v411_v5, %v3593_v61 }
  0xba   :  { %v428_v17 = vsel %vm421_vm3, %v419_v13, %v3597_v2  ;;  %v429_v18 = vsel %vm421_vm3, %v420_v14, %v3598_v10  ;;  %v4372_v2 = vld [vmem:[%s5415_s3 + $0x78] sm:$0xff]  ;;  %v4388_v14 = vld [vmem:[%s5415_s3 + $0x68] sm:$0xff] }
  0xbb   :  { %v431_v33 = vsel %vm58_vm0, %v172_v28, %v3603_v22  ;;  %v430_v34 = vsel %vm58_vm0, %v171_v27, %v3602_v23  ;;  %v463_v21 = vpack.c.bf16 %v429_v18, %v428_v17  ;;  %932 = vmatpush.msrb.mxu1 %v4372_v2  ;;  %v4398_v17 = vld [vmem:[%s5415_s3 + $0x60] sm:$0xff]  ;;  %v4404_v18 = vld [vmem:[%s5415_s3 + $0x58] sm:$0xff] }
  0xbe   :  { %v3606_v35 = vpop.permute.xlu1 %3605  ;;  %v3641_v29 = vpop.permute.xlu2 %3640 }
  0xbf   :  { %v3608_v38 = vunpack.i.h.bf16 %v3606_v35  ;;  %v3607_v39 = vunpack.i.l.bf16 %v3606_v35 }
  0xc0   :  { %v3616_v44 = vpop.permute.xlu0 %3615 }
  0xc1   :  { %v438_v42 = vsel %vm412_vm2, %v430_v34, %v3607_v39  ;;  %v439_v43 = vsel %vm412_vm2, %v431_v33, %v3608_v38  ;;  %v3618_v49 = vunpack.i.h.bf16 %v3616_v44  ;;  %v3617_v50 = vunpack.i.l.bf16 %v3616_v44  ;;  %v177_v44 = vld [vmem:[#allocation2 + $0xb1] sm:$0xff] }
  0xc2   :  { %v446_v45 = vsel %vm421_vm3, %v438_v42, %v3612_v37  ;;  %v447_v46 = vsel %vm421_vm3, %v439_v43, %v3613_v36  ;;  %v3643_v33 = vunpack.i.h.bf16 %v3641_v29  ;;  %v3642_v34 = vunpack.i.l.bf16 %v3641_v29  ;;  %v4446_v29 = vld [vmem:[%s5415_s3 + $0x30] sm:$0xff] }
  0xc3   :  { %v455_v48 = vpack.c.bf16 %v447_v46, %v446_v45  ;;  %v433_v63 = vsel %vm58_vm0, %v174_v54, %v3618_v49  ;;  %v432_v4 = vsel %vm58_vm0, %v173_v53, %v3617_v50  ;;  %v178_v45 = vld [vmem:[#allocation2 + $0xb9] sm:$0xff] }
  0xc5   :  { %737 = vmatmul.bf16.vlgmr.msra.gmra.mxu1 %v455_v48  ;;  %824 = vmatmul.bf16.vlgmr.msrb.gmra.mxu2 %v455_v48 }
  0xc6   :  { %718 = vmatmul.bf16.gmra.mxu0 %v460_v47  ;;  %805 = vmatmul.bf16.gmra.mxu3 %v460_v47  ;;  %v3621_v57 = vpop.permute.xlu1 %3620  ;;  %v3656_v48 = vpop.permute.xlu2 %3655 }
  0xc7   :  { %v3623_v58 = vunpack.i.h.bf16 %v3621_v57  ;;  %v3622_v59 = vunpack.i.l.bf16 %v3621_v57  ;;  %v3658_v51 = vunpack.i.h.bf16 %v3656_v48  ;;  %v3657_v52 = vunpack.i.l.bf16 %v3656_v48 }
  0xc8   :  { %v3631_v20 = vpop.permute.xlu0 %3630 }
  0xc9   :  { %v440_v11 = vsel %vm412_vm2, %v432_v4, %v3622_v59  ;;  %v441_v12 = vsel %vm412_vm2, %v433_v63, %v3623_v58  ;;  %v3633_v9 = vunpack.i.h.bf16 %v3631_v20  ;;  %v3632_v22 = vunpack.i.l.bf16 %v3631_v20  ;;  %v930_v20 = vld [vmem:[%s5415_s3 + $0xf0] sm:$0xff] }
  0xca   :  { %v448_v15 = vsel %vm421_vm3, %v440_v11, %v3627_v8  ;;  %v449_v16 = vsel %vm421_vm3, %v441_v12, %v3628_v7  ;;  %v4380_v12 = vld [vmem:[%s5415_s3 + $0x70] sm:$0xff] }
  0xcb   :  { %v458_v19 = vpack.c.bf16 %v449_v16, %v448_v15  ;;  %v435_v31 = vsel %vm58_vm0, %v176_v26, %v3633_v9  ;;  %v434_v32 = vsel %vm58_vm0, %v175_v24, %v3632_v22  ;;  %933 = vmatpush.msrb.mxu1 %v4380_v12  ;;  %v4424_v22 = vld [vmem:[%s5415_s3 + $0x48] sm:$0xff] }
  0xcd   :  { %934 = vmatpush.msrb.mxu1 %v4388_v14 }
  0xce   :  { %v3636_v23 = vpop.permute.xlu1 %3635 }
  0xcf   :  { %v3638_v27 = vunpack.i.h.bf16 %v3636_v23  ;;  %v3637_v28 = vunpack.i.l.bf16 %v3636_v23  ;;  %935 = vmatpush.msrb.mxu1 %v4398_v17 }
  0xd0   :  { %v3646_v40 = vpop.permute.xlu0 %3645 }
  0xd1   :  { %v442_v35 = vsel %vm412_vm2, %v434_v32, %v3637_v28  ;;  %v443_v36 = vsel %vm412_vm2, %v435_v31, %v3638_v27  ;;  %v3648_v41 = vunpack.i.h.bf16 %v3646_v40  ;;  %v3647_v42 = vunpack.i.l.bf16 %v3646_v40  ;;  %936 = vmatpush.msrb.mxu1 %v4404_v18  ;;  %v4434_v27 = vld [vmem:[%s5415_s3 + $0x40] sm:$0xff]  ;;  %v4440_v28 = vld [vmem:[%s5415_s3 + $0x38] sm:$0xff]  ;;  %v4452_v31 = vld [vmem:[%s5415_s3 + $0x28] sm:$0xff] }
  0xd2   :  { %v450_v37 = vsel %vm421_vm3, %v442_v35, %v3642_v34  ;;  %v451_v38 = vsel %vm421_vm3, %v443_v36, %v3643_v33  ;;  %v929_v35 = vld [vmem:[%s5415_s3 + $0xe8] sm:$0xff]  ;;  %v928_v36 = vld [vmem:[%s5415_s3 + $0xe0] sm:$0xff] }
  0xd3   :  { %v461_v39 = vpack.c.bf16 %v451_v38, %v450_v37  ;;  %v437_v49 = vsel %vm58_vm0, %v178_v45, %v3648_v41  ;;  %v436_v50 = vsel %vm58_vm0, %v177_v44, %v3647_v42  ;;  %v4468_v37 = vld [vmem:[%s5414_s2] sm:$0x3]  ;;  %v927_v41 = vld [vmem:[%s5415_s3 + $0xd8] sm:$0xff]  ;;  %v4489_v42 = vld [vmem:[%s5415_s3 + $0x10] sm:$0xff] }
  0xd4   :  { %v4473_v38 = vld [vmem:[%s5415_s3 + $0x20] sm:$0xff]  ;;  %v926_v44 = vld [vmem:[%s5415_s3 + $0xd0] sm:$0xff]  ;;  %v4499_v45 = vld [vmem:[%s5415_s3 + $0x8] sm:$0xff] }
  0xd5   :  { %742 = vmatmul.bf16.gmra.mxu1 %v458_v19  ;;  %829 = vmatmul.bf16.gmra.mxu2 %v458_v19  ;;  %v931_v19 = vld [vmem:[%s5415_s3 + $0xf8] sm:$0xff] }
  0xd6   :  { %723 = vmatmul.bf16.gmra.mxu0 %v463_v21  ;;  %810 = vmatmul.bf16.gmra.mxu3 %v463_v21  ;;  %v3651_v43 = vpop.permute.xlu1 %3650  ;;  %v4416_v21 = vld [vmem:[%s5415_s3 + $0x50] sm:$0xff] }
  0xd7   :  { %v3653_v46 = vunpack.i.h.bf16 %v3651_v43  ;;  %v3652_v47 = vunpack.i.l.bf16 %v3651_v43  ;;  %952 = vmatpush.msrb.mxu3 %v931_v19  ;;  %937 = vmatpush.msrb.mxu1 %v4416_v21  ;;  %v504_v43 = vperm.slane %v4468_v37, 0 }
  0xd8   :  { %1099 = vmatpush.msra.mxu2 %v931_v19 }
  0xd9   :  { %v444_v53 = vsel %vm412_vm2, %v436_v50, %v3652_v47  ;;  %v445_v54 = vsel %vm412_vm2, %v437_v49, %v3653_v46  ;;  %953 = vmatpush.msrb.mxu3 %v930_v20  ;;  %938 = vmatpush.msrb.mxu1 %v4424_v22  ;;  %v925_v47 = vld [vmem:[%s5415_s3 + $0xc8] sm:$0xff]  ;;  %v4509_v49 = vld [vmem:[%s5415_s3] sm:$0xff] }
  0xda   :  { %v452_v55 = vsel %vm421_vm3, %v444_v53, %v3657_v52  ;;  %v453_v56 = vsel %vm421_vm3, %v445_v54, %v3658_v51  ;;  %1100 = vmatpush.msra.mxu2 %v930_v20 }
  0xdb   :  { %v464_v57 = vpack.c.bf16 %v453_v56, %v452_v55  ;;  %939 = vmatpush.msrb.mxu1 %v4434_v27  ;;  %954 = vmatpush.msrb.mxu3 %v929_v35 }
  0xdc   :  { %1101 = vmatpush.msra.mxu2 %v929_v35 }
  0xdd   :  { %940 = vmatpush.msrb.mxu1 %v4440_v28  ;;  %955 = vmatpush.msrb.mxu3 %v928_v36 }
  0xde   :  { %1102 = vmatpush.msra.mxu2 %v928_v36 }
  0xdf   :  { %941 = vmatpush.msrb.mxu1 %v4446_v29  ;;  %956 = vmatpush.msrb.mxu3 %v927_v41 }
  0xe0   :  { %1103 = vmatpush.msra.mxu2 %v927_v41 }
  0xe1   :  { %942 = vmatpush.msrb.mxu1 %v4452_v31  ;;  %957 = vmatpush.msrb.mxu3 %v926_v44 }
  0xe2   :  { %1104 = vmatpush.msra.mxu2 %v926_v44 }
  0xe3   :  { %943 = vmatpush.msrb.mxu1 %v4473_v38  ;;  %958 = vmatpush.msrb.mxu3 %v925_v47 }
  0xe4   :  { %1105 = vmatpush.msra.mxu2 %v925_v47  ;;  %v920_v47 = vld [vmem:[%s5415_s3 + $0xa0] sm:$0xff] }
  0xe5   :  { %747 = vmatmul.bf16.gmra.mxu1 %v461_v39  ;;  %834 = vmatmul.bf16.gmra.mxu2 %v461_v39  ;;  %v4478_v39 = vld [vmem:[%s5415_s3 + $0x18] sm:$0xff] }
  0xe6   :  { %3070 = vmatmul.msk.bf16.vlgmr.msrb.gmra.mxu0 %vm58_vm0, %v4057_v25  ;;  %v4333_v25 = vpop.f32.mrf.mxu2  ;;  %944 = vmatpush.msrb.mxu1 %v4478_v39 }
  0xe8   :  { %945 = vmatpush.msrb.mxu1 %v4489_v42 }
  0xea   :  { %946 = vmatpush.msrb.mxu1 %v4499_v45 }
  0xec   :  { %947 = vmatpush.msrb.mxu1 %v4509_v49 }
  0xee   :  { %v4337_v58 = vpop.f32.mrf.mxu2 }
  0xf5   :  { %752 = vmatmul.bf16.gmra.mxu1 %v464_v57  ;;  %839 = vmatmul.bf16.gmra.mxu2 %v464_v57 }
  0xf6   :  { %3071 = vmatmul.msk.bf16.gmra.mxu0 %vm58_vm0, %v4103_v3  ;;  %v4339_v59 = vpop.f32.mrf.mxu2 }
  0xfe   :  { %v4343_v60 = vpop.f32.mrf.mxu2 }
 0x106   :  { %3072 = vmatmul.msk.bf16.gmra.mxu0 %vm58_vm0, %v4143_v30  ;;  %v4347_v62 = vpop.f32.mrf.mxu2 }
 0x10e   :  { %v4351_v3 = vpop.f32.mrf.mxu2 }
 0x116   :  { %3073 = vmatmul.msk.bf16.gmra.mxu0 %vm58_vm0, %v4207_v1  ;;  %v4357_v5 = vpop.f32.mrf.mxu2 }
 0x11e   :  { %v4363_v1 = vpop.f32.mrf.mxu2 }
 0x123   :  { %v4345_v61 = vpop.f32.mrf.mxu0 }
 0x124   :  { %v710_v50 = vadd.f32 %v4345_v61, %v504_v43  ;;  %v924_v61 = vld [vmem:[%s5415_s3 + $0xc0] sm:$0xff] }
 0x125   :  { %959 = vmatpush.msrb.mxu3 %v924_v61  ;;  %1106 = vmatpush.msra.mxu2 %v924_v61 }
 0x129   :  { %v4375_v11 = vpop.f32.mrf.mxu3 }
 0x12b   :  { %v4349_v63 = vpop.f32.mrf.mxu0 }
 0x12c   :  { %v712_v46 = vadd.f32 %v4349_v63, %v504_v43  ;;  %v923_v63 = vld [vmem:[%s5415_s3 + $0xb8] sm:$0xff] }
 0x12d   :  { %960 = vmatpush.msrb.mxu3 %v923_v63  ;;  %1107 = vmatpush.msra.mxu2 %v923_v63 }
 0x131   :  { %v4419_v9 = vpop.f32.mrf.mxu3 }
 0x133   :  { %v4353_v4 = vpop.f32.mrf.mxu0 }
 0x134   :  { %v715_v51 = vadd.f32 %v4353_v4, %v504_v43 }
 0x139   :  { %v4455_v33 = vpop.f32.mrf.mxu3 }
 0x13b   :  { %v4355_v30 = vpop.f32.mrf.mxu0 }
 0x13c   :  { %v717_v54 = vadd.f32 %v4355_v30, %v504_v43 }
 0x141   :  { %v4519_v56 = vpop.f32.mrf.mxu3 }
 0x142   :  { %v4359_v6 = vpop.f32.mrf.mxu1 }
 0x143   :  { %v4361_v7 = vpop.f32.mrf.mxu0  ;;  %v739_v55 = vadd.f32 %v4359_v6, %v710_v50 }
 0x144   :  { %v720_v4 = vadd.f32 %v4361_v7, %v504_v43 }
 0x145   :  { %v4539_v19 = vadd.f32 %v4333_v25, %v739_v55 }
 0x148   :  { %v4383_v13 = vpop.f32.mrf.mxu2 }
 0x14a   :  { %v4365_v8 = vpop.f32.mrf.mxu1 }
 0x14b   :  { %v4367_v10 = vpop.f32.mrf.mxu0  ;;  %v741_v52 = vadd.f32 %v4365_v8, %v712_v46 }
 0x14c   :  { %v722_v20 = vadd.f32 %v4367_v10, %v504_v43 }
 0x14d   :  { %v4531_v30 = vadd.f32 %v4337_v58, %v741_v52 }
 0x150   :  { %v4427_v24 = vpop.f32.mrf.mxu2 }
 0x152   :  { %v4390_v15 = vpop.f32.mrf.mxu1 }
 0x153   :  { %v4393_v16 = vpop.f32.mrf.mxu0  ;;  %v744_v57 = vadd.f32 %v4390_v15, %v715_v51  ;;  %v922_v15 = vld [vmem:[%s5415_s3 + $0xb0] sm:$0xff] }
 0x154   :  { %961 = vmatpush.msrb.mxu3 %v922_v15  ;;  %1108 = vmatpush.msra.mxu2 %v922_v15  ;;  %v725_v36 = vadd.f32 %v4393_v16, %v504_v43  ;;  %v806_v16 = vpop.f32.mrf.mxu3 }
 0x155   :  { %v4543_v35 = vadd.f32 %v4339_v59, %v744_v57 }
 0x158   :  { %v4480_v40 = vpop.f32.mrf.mxu2 }
 0x15a   :  { %v745_v23 = vpop.f32.mrf.mxu1 }
 0x15b   :  { %v4429_v26 = vpop.f32.mrf.mxu0  ;;  %v746_v6 = vadd.f32 %v745_v23, %v717_v54  ;;  %v874_v23 = vadd.f32 %v4531_v30, %v4539_v19 }
 0x15d   :  { %v4549_v41 = vadd.f32 %v4343_v60, %v746_v6  ;;  %v875_v46 = vadd.f32 %v874_v23, %v4543_v35 }
 0x15f   :  { %v876_v60 = vadd.f32 %v875_v46, %v4549_v41 }
 0x160   :  { %v4533_v8 = vpop.f32.mrf.mxu2 }
 0x162   :  { %v748_v32 = vpop.f32.mrf.mxu1 }
 0x163   :  { %v4457_v34 = vpop.f32.mrf.mxu0  ;;  %v749_v7 = vadd.f32 %v748_v32, %v720_v4  ;;  %v921_v32 = vld [vmem:[%s5415_s3 + $0xa8] sm:$0xff] }
 0x164   :  { %962 = vmatpush.msrb.mxu3 %v921_v32  ;;  %1109 = vmatpush.msra.mxu2 %v921_v32 }
 0x165   :  { %v4553_v10 = vadd.f32 %v4347_v62, %v749_v7  ;;  %v727_v62 = vadd.f32 %v4429_v26, %v504_v43  ;;  %v808_v43 = vpop.f32.mrf.mxu3  ;;  %v918_v7 = vld [vmem:[%s5415_s3 + $0x90] sm:$0xff] }
 0x166   :  { %963 = vmatpush.msrb.mxu3 %v920_v47  ;;  %1110 = vmatpush.msra.mxu2 %v920_v47 }
 0x167   :  { %v877_v50 = vadd.f32 %v876_v60, %v4553_v10 }
 0x168   :  { %v835_v51 = vpop.f32.mrf.mxu2 }
 0x16a   :  { %v750_v48 = vpop.f32.mrf.mxu1 }
 0x16b   :  { %v4514_v53 = vpop.f32.mrf.mxu0  ;;  %v751_v44 = vadd.f32 %v750_v48, %v722_v20  ;;  %v919_v20 = vld [vmem:[%s5415_s3 + $0x98] sm:$0xff] }
 0x16c   :  { %964 = vmatpush.msrb.mxu3 %v919_v20  ;;  %1111 = vmatpush.msra.mxu2 %v919_v20 }
 0x16d   :  { %v4563_v48 = vadd.f32 %v4351_v3, %v751_v44  ;;  %v916_v44 = vld [vmem:[%s5415_s3 + $0x80] sm:$0xff]  ;;  %v811_v32 = vpop.f32.mrf.mxu3 }
 0x16e   :  { %965 = vmatpush.msrb.mxu3 %v918_v7  ;;  %1112 = vmatpush.msra.mxu2 %v918_v7 }
 0x16f   :  { %v878_v55 = vadd.f32 %v877_v50, %v4563_v48 }
 0x170   :  { %v837_v6 = vpop.f32.mrf.mxu2 }
 0x172   :  { %v753_v58 = vpop.f32.mrf.mxu1 }
 0x173   :  { %v859_v25 = vpop.f32.mrf.mxu0  ;;  %v754_v59 = vadd.f32 %v753_v58, %v725_v36  ;;  %v505_v36 = vperm.slane %v4468_v37, 1 }
 0x175   :  { %v4568_v52 = vadd.f32 %v4357_v5, %v754_v59  ;;  %v799_v59 = vadd.f32 %v4419_v9, %v505_v36  ;;  %v802_v50 = vadd.f32 %v4455_v33, %v505_v36 }
 0x177   :  { %v879_v3 = vadd.f32 %v878_v55, %v4568_v52  ;;  %v828_v37 = vadd.f32 %v4427_v24, %v799_v59  ;;  %v804_v55 = vadd.f32 %v4519_v56, %v505_v36  ;;  %v809_v24 = vadd.f32 %v808_v43, %v505_v36 }
 0x179   :  { %v4597_v9 = vadd.f32 %v4514_v53, %v828_v37  ;;  %v838_v7 = vadd.f32 %v837_v6, %v809_v24  ;;  %v974_v37 = vld [vmem:[%s5416_s4 + $0x8] sm:$0xff] }
 0x17a   :  { %v755_v54 = vpop.f32.mrf.mxu1 }
 0x17b   :  { %v756_v57 = vadd.f32 %v755_v54, %v727_v62  ;;  %v861_v61 = vpop.f32.mrf.mxu0  ;;  %v797_v62 = vadd.f32 %v4375_v11, %v505_v36  ;;  %v840_v54 = vpop.f32.mrf.mxu2 }
 0x17d   :  { %v4573_v63 = vadd.f32 %v4363_v1, %v756_v57  ;;  %v917_v1 = vld [vmem:[%s5415_s3 + $0x88] sm:$0xff]  ;;  %v826_v57 = vadd.f32 %v4383_v13, %v797_v62 }
 0x17e   :  { %966 = vmatpush.msrb.mxu3 %v917_v1  ;;  %1113 = vmatpush.msra.mxu2 %v917_v1 }
 0x17f   :  { %v880_v26 = vadd.f32 %v879_v3, %v4573_v63  ;;  %v831_v3 = vadd.f32 %v4480_v40, %v802_v50  ;;  %v4601_v11 = vadd.f32 %v4457_v34, %v826_v57  ;;  %v812_v40 = vadd.f32 %v811_v32, %v505_v36 }
 0x180   :  { %967 = vmatpush.msrb.mxu3 %v916_v44  ;;  %1114 = vmatpush.msra.mxu2 %v916_v44 }
 0x181   :  { %v881_v4 = vrot.slane %v880_v26, 4  ;;  %v4603_v33 = vadd.f32 %v859_v25, %v831_v3  ;;  %v887_v56 = vadd.f32 %v4597_v9, %v4601_v11 }
 0x182   :  { %1014 = vmatpush.msra.mxu3 %v974_v37 }
 0x183   :  { %v882_v15 = vadd.f32 %v881_v4, %v880_v26  ;;  %v864_v5 = vpop.f32.mrf.mxu0  ;;  %v807_v26 = vadd.f32 %v806_v16, %v505_v36  ;;  %v833_v4 = vadd.f32 %v4533_v8, %v804_v55  ;;  %v888_v53 = vadd.f32 %v887_v56, %v4603_v33  ;;  %v813_v8 = vpop.f32.mrf.mxu3 }
 0x184   :  { %v842_v43 = vpop.f32.mrf.mxu2 }
 0x185   :  { %v883_v58 = vrot.slane %v882_v15, 2  ;;  %v4607_v20 = vadd.f32 %v861_v61, %v833_v4 }
 0x187   :  { %v884_v23 = vadd.f32 %v883_v58, %v882_v15  ;;  %v836_v15 = vadd.f32 %v835_v51, %v807_v26  ;;  %v841_v58 = vadd.f32 %v840_v54, %v812_v40  ;;  %v889_v34 = vadd.f32 %v888_v53, %v4607_v20  ;;  %v973_v54 = vld [vmem:[%s5416_s4] sm:$0xff] }
 0x188   :  { %v814_v51 = vadd.f32 %v813_v8, %v505_v36  ;;  %994 = vmatpush.msra.mxu1 %v973_v54 }
 0x189   :  { %v885_v46 = vrot.slane %v884_v23, 1  ;;  %v4610_v16 = vadd.f32 %v864_v5, %v836_v15 }
 0x18a   :  { %v843_v61 = vadd.f32 %v842_v43, %v814_v51 }
 0x18b   :  { %v886_v47 = vadd.f32 %v885_v46, %v884_v23  ;;  %v866_v60 = vpop.f32.mrf.mxu0  ;;  %v890_v1 = vadd.f32 %v889_v34, %v4610_v16 }
 0x18c   :  { %v4613_v25 = vadd.f32 %v866_v60, %v838_v7 }
 0x18d   :  { %948 = vmatmul.f32.vlgmr.msrb.gmra.mxu1 %v886_v47 }
 0x18e   :  { %v891_v44 = vadd.f32 %v890_v1, %v4613_v25  ;;  %1079 = vmatpush.msrb.mxu1 %v4372_v2 }
 0x190   :  { %1080 = vmatpush.msrb.mxu1 %v4380_v12 }
 0x192   :  { %1081 = vmatpush.msrb.mxu1 %v4388_v14 }
 0x193   :  { %v869_v13 = vpop.f32.mrf.mxu0 }
 0x194   :  { %v4616_v23 = vadd.f32 %v869_v13, %v841_v58  ;;  %1082 = vmatpush.msrb.mxu1 %v4398_v17 }
 0x196   :  { %v892_v46 = vadd.f32 %v891_v44, %v4616_v23  ;;  %1083 = vmatpush.msrb.mxu1 %v4404_v18 }
 0x198   :  { %1084 = vmatpush.msrb.mxu1 %v4416_v21 }
 0x19a   :  { %1085 = vmatpush.msrb.mxu1 %v4424_v22 }
 0x19b   :  { %v871_v6 = vpop.f32.mrf.mxu0 }
 0x19c   :  { %v4620_v5 = vadd.f32 %v871_v6, %v843_v61  ;;  %1086 = vmatpush.msrb.mxu1 %v4434_v27 }
 0x19e   :  { %v893_v59 = vadd.f32 %v892_v46, %v4620_v5  ;;  %1087 = vmatpush.msrb.mxu1 %v4440_v28 }
 0x1a0   :  { %v894_v32 = vrot.slane %v893_v59, 4  ;;  %1088 = vmatpush.msrb.mxu1 %v4446_v29 }
 0x1a2   :  { %v895_v47 = vadd.f32 %v894_v32, %v893_v59  ;;  %1089 = vmatpush.msrb.mxu1 %v4452_v31 }
 0x1a4   :  { %v896_v60 = vrot.slane %v895_v47, 2  ;;  %1090 = vmatpush.msrb.mxu1 %v4473_v38 }
 0x1a6   :  { %v897_v62 = vadd.f32 %v896_v60, %v895_v47  ;;  %1091 = vmatpush.msrb.mxu1 %v4478_v39 }
 0x1a8   :  { %v898_v50 = vrot.slane %v897_v62, 1  ;;  %1092 = vmatpush.msrb.mxu1 %v4489_v42 }
 0x1aa   :  { %v899_v36 = vadd.f32 %v898_v50, %v897_v62  ;;  %1093 = vmatpush.msrb.mxu1 %v4499_v45 }
 0x1ac   :  { %968 = vmatmul.f32.vlgmr.msrb.gmra.mxu3 %v899_v36  ;;  %1094 = vmatpush.msrb.mxu1 %v4509_v49 }
 0x1ad   :  { %1151 = vmatpush.msrb.mxu3 %v973_v54 }
 0x20a   :  { %v949_v2 = vpop.f32.mrf.mxu1 }
 0x22f   :  { %v969_v12 = vpop.f32.mrf.mxu3 }
 0x230   :  { %v970_v14 = vadd.f32 %v969_v12, %v949_v2 }
 0x232   :  { %v972_v17 = vmul.f32 0.00048828125, %v970_v14 }
 0x234   :  { %3074 = vmatmul.msk.f32.vlgmr.msra.gmra.mxu1 %vm975_vm4, %v972_v17  ;;  %3075 = vmatmul.msk.f32.vlgmr.msra.gmra.mxu3 %vm975_vm4, %v972_v17 }
 0x235   :  { %1171 = vmatpush.msra.mxu3 %v974_v37 }
 0x2b1   :  { %v996_v18 = vpop.f32.mrf.mxu1 }
 0x2b2   :  { %v1019_v21 = vperm.slane %v996_v18, 0 }
 0x2b4   :  { %v4648_v22 = vsub.f32 %v4539_v19, %v1019_v21  ;;  %v4651_v27 = vsub.f32 %v4531_v30, %v1019_v21  ;;  %v4654_v28 = vsub.f32 %v4543_v35, %v1019_v21  ;;  %v4657_v29 = vsub.f32 %v4549_v41, %v1019_v21 }
 0x2b5   :  { %v4664_v42 = vsub.f32 %v4553_v10, %v1019_v21  ;;  %v4669_v19 = vsub.f32 %v4563_v48, %v1019_v21  ;;  %v4683_v3 = vsub.f32 %v4568_v52, %v1019_v21  ;;  %v4695_v24 = vsub.f32 %v4573_v63, %v1019_v21 }
 0x2b6   :  { %v1037_v31 = vmul.f32 %v4648_v22, %v4648_v22  ;;  %v1039_v38 = vmul.f32 %v4651_v27, %v4651_v27  ;;  %v1041_v49 = vmul.f32 %v4654_v28, %v4654_v28  ;;  %v1043_v35 = vmul.f32 %v4657_v29, %v4657_v29 }
 0x2b7   :  { %v1016_v39 = vpop.f32.mrf.mxu3  ;;  %v1045_v48 = vmul.f32 %v4664_v42, %v4664_v42  ;;  %v1047_v52 = vmul.f32 %v4669_v19, %v4669_v19  ;;  %v1049_v13 = vmul.f32 %v4683_v3, %v4683_v3  ;;  %v1051_v8 = vmul.f32 %v4695_v24, %v4695_v24 }
 0x2b8   :  { %v1020_v45 = vperm.slane %v1016_v39, 0  ;;  %v1053_v30 = vadd.f32 %v1039_v38, %v1037_v31 }
 0x2ba   :  { %v1054_v41 = vadd.f32 %v1053_v30, %v1041_v49  ;;  %v4674_v55 = vsub.f32 %v4601_v11, %v1020_v45  ;;  %v4677_v57 = vsub.f32 %v4597_v9, %v1020_v45  ;;  %v4680_v10 = vsub.f32 %v4603_v33, %v1020_v45 }
 0x2bb   :  { %v4688_v4 = vsub.f32 %v4607_v20, %v1020_v45  ;;  %v4700_v15 = vsub.f32 %v4610_v16, %v1020_v45  ;;  %v4707_v7 = vsub.f32 %v4613_v25, %v1020_v45  ;;  %v4714_v58 = vsub.f32 %v4616_v23, %v1020_v45 }
 0x2bc   :  { %v1055_v26 = vadd.f32 %v1054_v41, %v1043_v35  ;;  %v1038_v11 = vmul.f32 %v4674_v55, %v4674_v55  ;;  %v1040_v9 = vmul.f32 %v4677_v57, %v4677_v57  ;;  %v1042_v56 = vmul.f32 %v4680_v10, %v4680_v10 }
 0x2bd   :  { %v1044_v63 = vmul.f32 %v4688_v4, %v4688_v4  ;;  %v1046_v34 = vmul.f32 %v4700_v15, %v4700_v15  ;;  %v4719_v1 = vsub.f32 %v4620_v5, %v1020_v45  ;;  %v1048_v25 = vmul.f32 %v4707_v7, %v4707_v7 }
 0x2be   :  { %v1056_v33 = vadd.f32 %v1055_v26, %v1045_v48  ;;  %v1066_v20 = vadd.f32 %v1040_v9, %v1038_v11  ;;  %v1050_v6 = vmul.f32 %v4714_v58, %v4714_v58  ;;  %v1131_v48 = vld [vmem:[%s5417_s5] sm:$0x1]  ;;  %s3759_s5 = smov 120  }
 0x2bf   :  { %v1052_v23 = vmul.f32 %v4719_v1, %v4719_v1  ;;  %v1194_v9 = vld [vmem:[%s5418_s6] sm:$0x3]  ;;  %s2913_s6 = sshll.u32 %s5429_s17, 4  ;;  %s2914_s6 = int_to_ptr.hbm [resolvable:$true] %s2913_s6 }
 0x2c0   :  { %v1057_v40 = vadd.f32 %v1056_v33, %v1047_v52  ;;  %v1067_v53 = vadd.f32 %v1066_v20, %v1042_v56  ;;  %v1196_v56 = vperm.slane %v1194_v9, 0 }
 0x2c2   :  { %v1058_v16 = vadd.f32 %v1057_v40, %v1049_v13  ;;  %v1068_v43 = vadd.f32 %v1067_v53, %v1044_v63 }
 0x2c4   :  { %v1059_v51 = vadd.f32 %v1058_v16, %v1051_v8  ;;  %v1069_v61 = vadd.f32 %v1068_v43, %v1046_v34  ;;  %v4737_v16 = vperm.slane %v1194_v9, 1 }
 0x2c6   :  { %v1060_v44 = vrot.slane %v1059_v51, 4  ;;  %v1070_v46 = vadd.f32 %v1069_v61, %v1048_v25 }
 0x2c8   :  { %v1061_v59 = vadd.f32 %v1060_v44, %v1059_v51  ;;  %v1071_v32 = vadd.f32 %v1070_v46, %v1050_v6 }
 0x2ca   :  { %v1062_v47 = vrot.slane %v1061_v59, 2  ;;  %v1072_v60 = vadd.f32 %v1071_v32, %v1052_v23 }
 0x2cc   :  { %v1063_v62 = vadd.f32 %v1062_v47, %v1061_v59  ;;  %v1073_v50 = vrot.slane %v1072_v60, 4 }
 0x2ce   :  { %v1064_v5 = vrot.slane %v1063_v62, 1  ;;  %v1074_v36 = vadd.f32 %v1073_v50, %v1072_v60 }
 0x2d0   :  { %v1065_v37 = vadd.f32 %v1064_v5, %v1063_v62  ;;  %v1075_v54 = vrot.slane %v1074_v36, 2 }
 0x2d2   :  { %1095 = vmatmul.f32.vlgmr.msrb.gmra.mxu1 %v1065_v37  ;;  %v1076_v2 = vadd.f32 %v1075_v54, %v1074_v36 }
 0x2d4   :  { %v1077_v12 = vrot.slane %v1076_v2, 1 }
 0x2d6   :  { %v1078_v14 = vadd.f32 %v1077_v12, %v1076_v2 }
 0x2d8   :  { %1115 = vmatmul.f32.vlgmr.msra.gmra.mxu2 %v1078_v14 }
 0x34f   :  { %v1096_v17 = vpop.f32.mrf.mxu1 }
 0x35b   :  { %v1116_v18 = vpop.f32.mrf.mxu2 }
 0x35c   :  { %v1117_v21 = vadd.f32 %v1116_v18, %v1096_v17 }
 0x35e   :  { %v1119_v31 = vmul.f32 0.00048828125, %v1117_v21 }
 0x360   :  { %v1120_v38 = vadd.f32 1e-05, %v1119_v31 }
 0x362   :  { %3683 = vrsqrt.f32 %v1120_v38  ;;  %vm1127_vm6 = vweird.f32 %v1120_v38 }
 0x368   :  { %v3684_v39 = vpop.eup %3683 }
 0x369   :  { %v1122_v45 = vmul.f32 %v3684_v39, %v1120_v38  ;;  %vm1128_vm5 = vweird.f32 %v3684_v39 }
 0x36a   :  { %vm1129_vm7 = vmor %vm1127_vm6, %vm1128_vm5  ;;  %vm2506_vm5 = vcmask 1041409  }
 0x36b   :  { %v1123_v49 = vmul.f32 %v3684_v39, %v1122_v45  ;;  %v1337_v45 = vlaneseq }
 0x36d   :  { %v1124_v30 = vmul.f32 0.5, %v1123_v49  ;;  %vm4825_vm8 = vcmp.lt.s32.totalorder %v1337_v45, 256 }
 0x36e   :  { %1341 = vst.msk [vmem:[#allocation3] ss:$8 sm:$0x3] %vm4825_vm8, %v3755_v0 }
 0x36f   :  { %v1125_v35 = vsub.f32 1.5, %v1124_v30  ;;  %1344 = vst.msk [vmem:[#allocation3 + $0x30] ss:$8 sm:$0x3] %vm4825_vm8, %v3755_v0 }
 0x370   :  { %1347 = vst.msk [vmem:[#allocation3 + $0x21] ss:$8 sm:$0x3] %vm4825_vm8, %v3755_v0 }
 0x371   :  { %v1126_v41 = vmul.f32 %v3684_v39, %v1125_v35  ;;  %1350 = vst.msk [vmem:[#allocation3 + $0x51] ss:$8 sm:$0x3] %vm4825_vm8, %v3755_v0 }
 0x373   :  { %v1130_v26 = vsel %vm1129_vm7, %v3684_v39, %v1126_v41 }
 0x374   :  { %v1132_v11 = vmul.f32 %v1131_v48, %v1130_v26 }
 0x376   :  { %3076 = vmatmul.msk.f32.vlgmr.msrb.gmra.mxu3 %vm975_vm4, %v1132_v11 }
 0x37e   :  { %3077 = vmatmul.msk.f32.vlgmr.msra.gmra.mxu3 %vm975_vm4, %v1132_v11  ;;  %vm2478_vm4 = vcmask 490496  }
 0x3f9   :  { %v1153_v52 = vpop.f32.mrf.mxu3 }
 0x3fa   :  { %v1176_v33 = vperm.slane %v1153_v52, 0 }
 0x3fc   :  { %v1186_v20 = vmul.f32 %v1176_v33, %v4664_v42  ;;  %v1178_v13 = vmul.f32 %v1176_v33, %v4648_v22  ;;  %v1190_v37 = vmul.f32 %v1176_v33, %v4683_v3 }
 0x3fe   :  { %v1208_v40 = vadd.f32 %v1196_v56, %v1186_v20  ;;  %v1200_v63 = vadd.f32 %v1196_v56, %v1178_v13  ;;  %v1212_v14 = vadd.f32 %v1196_v56, %v1190_v37 }
 0x400   :  { %3685 = vtanh.f32 %v1208_v40 }
 0x401   :  { %v1173_v53 = vpop.f32.mrf.mxu3  ;;  %3687 = vtanh.f32 %v1200_v63 }
 0x402   :  { %v1177_v8 = vperm.slane %v1173_v53, 0 }
 0x404   :  { %v1187_v34 = vmul.f32 %v1177_v8, %v4700_v15  ;;  %v1181_v43 = vmul.f32 %v1177_v8, %v4677_v57  ;;  %v1179_v51 = vmul.f32 %v1177_v8, %v4674_v55  ;;  %v1188_v55 = vmul.f32 %v1176_v33, %v4669_v19 }
 0x405   :  { %v1182_v57 = vmul.f32 %v1176_v33, %v4654_v28  ;;  %v1180_v15 = vmul.f32 %v1176_v33, %v4651_v27  ;;  %v1183_v28 = vmul.f32 %v1177_v8, %v4680_v10  ;;  %v1191_v27 = vmul.f32 %v1177_v8, %v4714_v58 }
 0x406   :  { %v4742_v25 = vpop.eup %3685  ;;  %v1209_v42 = vadd.f32 %v4737_v16, %v1187_v34  ;;  %v1203_v22 = vadd.f32 %v4737_v16, %v1181_v43  ;;  %v1201_v61 = vadd.f32 %v4737_v16, %v1179_v51  ;;  %v1210_v6 = vadd.f32 %v1196_v56, %v1188_v55 }
 0x407   :  { %v4747_v44 = vpop.eup %3687  ;;  %1264 = vrot.lane.b32.xlu2 %v4742_v25, %s3759_s5  ;;  %v1204_v46 = vadd.f32 %v1196_v56, %v1182_v57  ;;  %v1202_v23 = vadd.f32 %v1196_v56, %v1180_v15  ;;  %v1189_v19 = vmul.f32 %v1177_v8, %v4707_v7  ;;  %v1205_v60 = vadd.f32 %v4737_v16, %v1183_v28 }
 0x408   :  { %1248 = vrot.lane.b32.xlu0 %v4747_v44, %s3759_s5  ;;  %3689 = vtanh.f32 %v1209_v42  ;;  %v1213_v62 = vadd.f32 %v4737_v16, %v1191_v27  ;;  %v1184_v7 = vmul.f32 %v1176_v33, %v4657_v29  ;;  %v1192_v58 = vmul.f32 %v1176_v33, %v4695_v24 }
 0x409   :  { %3691 = vtanh.f32 %v1203_v22  ;;  %v1211_v5 = vadd.f32 %v4737_v16, %v1189_v19  ;;  %v1193_v29 = vmul.f32 %v1177_v8, %v4719_v1  ;;  %v1185_v3 = vmul.f32 %v1177_v8, %v4688_v4 }
 0x40a   :  { %3693 = vtanh.f32 %v1201_v61  ;;  %v1206_v54 = vadd.f32 %v1196_v56, %v1184_v7  ;;  %v1214_v2 = vadd.f32 %v1196_v56, %v1192_v58 }
 0x40b   :  { %3695 = vtanh.f32 %v1210_v6  ;;  %v1215_v24 = vadd.f32 %v4737_v16, %v1193_v29  ;;  %v1207_v31 = vadd.f32 %v4737_v16, %v1185_v3 }
 0x40c   :  { %3697 = vtanh.f32 %v1204_v46 }
 0x40d   :  { %3699 = vtanh.f32 %v1202_v23 }
 0x40e   :  { %v4756_v59 = vpop.eup %3689  ;;  %3701 = vtanh.f32 %v1205_v60 }
 0x40f   :  { %v4758_v32 = vpop.eup %3691  ;;  %3703 = vtanh.f32 %v1213_v62 }
 0x410   :  { %v4760_v47 = vpop.eup %3693  ;;  %1266 = vrot.lane.b32.xlu0 %v4756_v59, %s3759_s5  ;;  %1254 = vrot.lane.b32.xlu2 %v4758_v32, %s3759_s5  ;;  %3705 = vtanh.f32 %v1211_v5 }
 0x411   :  { %1250 = vrot.lane.b32.xlu1 %v4760_v47, %s3759_s5  ;;  %v4773_v50 = vpop.eup %3695  ;;  %3707 = vtanh.f32 %v1206_v54 }
 0x412   :  { %v4776_v36 = vpop.eup %3697  ;;  %3709 = vtanh.f32 %v1214_v2 }
 0x413   :  { %v4778_v10 = vpop.eup %3699  ;;  %3711 = vtanh.f32 %v1212_v14 }
 0x414   :  { %v4789_v12 = vpop.eup %3701  ;;  %3713 = vtanh.f32 %v1215_v24 }
 0x415   :  { %v4791_v17 = vpop.eup %3703  ;;  %3715 = vtanh.f32 %v1207_v31 }
 0x416   :  { %v4793_v18 = vpop.eup %3705 }
 0x417   :  { %v4804_v21 = vpop.eup %3707 }
 0x418   :  { %1268 = vrot.lane.b32.xlu0 %v4773_v50, %s3759_s5  ;;  %1256 = vrot.lane.b32.xlu2 %v4776_v36, %s3759_s5  ;;  %v4807_v38 = vpop.eup %3709 }
 0x419   :  { %1252 = vrot.lane.b32.xlu1 %v4778_v10, %s3759_s5  ;;  %v4809_v39 = vpop.eup %3711 }
 0x41a   :  { %v4817_v4 = vpop.eup %3713 }
 0x41b   :  { %v4819_v1 = vpop.eup %3715 }
 0x420   :  { %1258 = vrot.lane.b32.xlu0 %v4789_v12, %s3759_s5  ;;  %1274 = vrot.lane.b32.xlu2 %v4791_v17, %s3759_s5 }
 0x421   :  { %1270 = vrot.lane.b32.xlu1 %v4793_v18, %s3759_s5 }
 0x428   :  { %1260 = vrot.lane.b32.xlu0 %v4804_v21, %s3759_s5  ;;  %1276 = vrot.lane.b32.xlu2 %v4807_v38, %s3759_s5 }
 0x429   :  { %1272 = vrot.lane.b32.xlu1 %v4809_v39, %s3759_s5 }
 0x430   :  { %1278 = vrot.lane.b32.xlu0 %v4817_v4, %s3759_s5 }
 0x431   :  { %1262 = vrot.lane.b32.xlu1 %v4819_v1, %s3759_s5  ;;  %s3762_s5 = smov [#allocation4]  }
 0x461   :  { %v1265_v30 = vpop.permute.xlu2 %1264 }
 0x46a   :  { %v1255_v9 = vpop.permute.xlu2 %1254 }
 0x47a   :  { %v1249_v35 = vpop.permute.xlu0 %1248 }
 0x482   :  { %v1267_v41 = vpop.permute.xlu0 %1266 }
 0x483   :  { %v1285_v48 = vsel %vm1280_vm9, %v1265_v30, %v1267_v41  ;;  %v1317_v26 = vsel %vm1280_vm9, %v1267_v41, %v1265_v30  ;;  %v1251_v11 = vpop.permute.xlu1 %1250 }
 0x484   :  { %v1329_v52 = vmax.f32 %v4742_v25, %v1285_v48  ;;  %v1330_v33 = vmax.f32 %v4756_v59, %v1317_v26  ;;  %v1281_v56 = vsel %vm1280_vm9, %v1249_v35, %v1251_v11  ;;  %v1313_v20 = vsel %vm1280_vm9, %v1251_v11, %v1249_v35  ;;  %v1257_v59 = vpop.permute.xlu2 %1256 }
 0x485   :  { %v1321_v0 = vmax.f32 %v4747_v44, %v1281_v56  ;;  %v1322_v13 = vmax.f32 %v4760_v47, %v1313_v20 }
 0x486   :  { %v1358_v40 = vrot.slane %v1329_v52, 1  ;;  %v1359_v63 = vrot.slane %v1330_v33, 1 }
 0x487   :  { %v1356_v53 = vrot.slane %v1321_v0, 1  ;;  %v1357_v8 = vrot.slane %v1322_v13, 1 }
 0x488   :  { %v4849_v16 = vmax.f32 %v1330_v33, %v1359_v63  ;;  %v4855_v51 = vmax.f32 %v1329_v52, %v1358_v40 }
 0x489   :  { %v4851_v34 = vmax.f32 %v1321_v0, %v1356_v53  ;;  %v4853_v43 = vmax.f32 %v1322_v13, %v1357_v8 }
 0x48a   :  { %v1373_v25 = vrot.slane %v4849_v16, 7  ;;  %v1269_v42 = vpop.permute.xlu0 %1268 }
 0x48b   :  { %v1372_v22 = vrot.slane %v4853_v43, 7  ;;  %1385 = vst [vmem:[#allocation1] sm:$0xff] %v4851_v34  ;;  %v1253_v61 = vpop.permute.xlu1 %1252 }
 0x48c   :  { %v1376_v44 = vsel %vm1374_vm10, %v4855_v51, %v1373_v25  ;;  %1386 = vst [vmem:[#allocation1 + $0x9] sm:$0xff] %v4853_v43  ;;  %v1282_v55 = vsel %vm1280_vm9, %v1253_v61, %v1255_v9  ;;  %v1314_v57 = vsel %vm1280_vm9, %v1255_v9, %v1253_v61  ;;  %v1275_v24 = vpop.permute.xlu2 %1274 }
 0x48d   :  { %1383 = vst.msk [vmem:[#allocation3 + $0x31] ss:$8 sm:$0x3] %vm4825_vm8, %v1376_v44  ;;  %v1375_v15 = vsel %vm1374_vm10, %v4851_v34, %v1372_v22  ;;  %v1323_v6 = vmax.f32 %v4778_v10, %v1282_v55  ;;  %v1324_v46 = vmax.f32 %v4758_v32, %v1314_v57 }
 0x48e   :  { %1380 = vst.msk [vmem:[#allocation3 + $0x1] ss:$8 sm:$0x3] %vm4825_vm8, %v1375_v15 }
 0x48f   :  { %v1434_v23 = vrot.slane %v1323_v6, 1  ;;  %v1435_v47 = vrot.slane %v1324_v46, 1 }
 0x491   :  { %v4873_v28 = vmax.f32 %v1324_v46, %v1435_v47  ;;  %v4875_v60 = vmax.f32 %v1323_v6, %v1434_v23 }
 0x492   :  { %v1259_v27 = vpop.permute.xlu0 %1258 }
 0x493   :  { %v1388_v19 = vld [vmem:[#allocation1 + $0x2] ss:$9 sm:$0xff]  ;;  %v1450_v62 = vrot.slane %v4873_v28, 7  ;;  %v1283_v5 = vsel %vm1280_vm9, %v1257_v59, %v1259_v27  ;;  %v1315_v10 = vsel %vm1280_vm9, %v1259_v27, %v1257_v59  ;;  %v1271_v7 = vpop.permute.xlu1 %1270 }
 0x494   :  { %1389 = vst [vmem:[#allocation1] sm:$0xff] %v4855_v51  ;;  %v1325_v32 = vmax.f32 %v4776_v36, %v1283_v5  ;;  %v1326_v58 = vmax.f32 %v4789_v12, %v1315_v10  ;;  %v1286_v37 = vsel %vm1280_vm9, %v1269_v42, %v1271_v7  ;;  %v1318_v54 = vsel %vm1280_vm9, %v1271_v7, %v1269_v42 }
 0x495   :  { %1390 = vst [vmem:[#allocation1 + $0x9] sm:$0xff] %v4849_v16  ;;  %v1452_v2 = vsel %vm1374_vm10, %v4875_v60, %v1450_v62  ;;  %v1331_v14 = vmax.f32 %v4773_v50, %v1286_v37  ;;  %v1332_v29 = vmax.f32 %v4793_v18, %v1318_v54  ;;  %v3464_v54 = vld [vmem:[%s5419_s7 + $0x78] sm:$0xff] }
 0x496   :  { %1395 = vst.msk [vmem:[#allocation3 + $0x2] ss:$8 sm:$0x3] %vm4825_vm8, %v1388_v19  ;;  %v1512_v3 = vrot.slane %v1326_v58, 1  ;;  %v1511_v36 = vrot.slane %v1325_v32, 1  ;;  %2182 = vmatpush.bf16.msra.mxu0 %v3464_v54 }
 0x497   :  { %1457 = vst.msk [vmem:[#allocation3 + $0x5] ss:$8 sm:$0x3] %vm4825_vm8, %v1452_v2  ;;  %v1437_v12 = vrot.slane %v1332_v29, 1  ;;  %v1436_v45 = vrot.slane %v1331_v14, 1 }
 0x498   :  { %v4894_v31 = vmax.f32 %v1326_v58, %v1512_v3  ;;  %v4899_v41 = vmax.f32 %v1325_v32, %v1511_v36  ;;  %v3480_v3 = vld [vmem:[%s5419_s7 + $0xf8] sm:$0xff]  ;;  %v3462_v36 = vld [vmem:[%s5419_s7 + $0x68] sm:$0xff] }
 0x499   :  { %v4896_v30 = vmax.f32 %v1332_v29, %v1437_v12  ;;  %v4902_v11 = vmax.f32 %v1331_v14, %v1436_v45  ;;  %v3456_v14 = vld [vmem:[%s5419_s7 + $0x38] sm:$0xff]  ;;  %v3471_v12 = vld [vmem:[%s5419_s7 + $0xb0] sm:$0xff]  ;;  %2220 = vmatpush.bf16.msrb.mxu2 %v3480_v3 }
 0x49a   :  { %v1527_v35 = vrot.slane %v4894_v31, 7  ;;  %v1261_v50 = vpop.permute.xlu0 %1260  ;;  %2163 = vmatpush.bf16.msrb.mxu3 %v3456_v14  ;;  %v3472_v29 = vld [vmem:[%s5419_s7 + $0xb8] sm:$0xff]  ;;  %v3479_v45 = vld [vmem:[%s5419_s7 + $0xf0] sm:$0xff] }
 0x49b   :  { %v1451_v18 = vrot.slane %v4896_v30, 7  ;;  %v1273_v48 = vpop.permute.xlu1 %1272  ;;  %2201 = vmatpush.bf16.msra.mxu1 %v3472_v29 }
 0x49c   :  { %v1391_v26 = vld [vmem:[#allocation1 + $0x2] ss:$9 sm:$0xff]  ;;  %v1287_v9 = vsel %vm1280_vm9, %v1273_v48, %v1275_v24  ;;  %v1319_v52 = vsel %vm1280_vm9, %v1275_v24, %v1273_v48  ;;  %v1529_v33 = vsel %vm1374_vm10, %v4899_v41, %v1527_v35 }
 0x49d   :  { %1400 = vst [vmem:[#allocation1] sm:$0xff] %v4851_v34  ;;  %v1333_v56 = vmax.f32 %v4809_v39, %v1287_v9  ;;  %v1334_v20 = vmax.f32 %v4791_v17, %v1319_v52  ;;  %v1453_v0 = vsel %vm1374_vm10, %v4902_v11, %v1451_v18  ;;  %v1277_v39 = vpop.permute.xlu2 %1276  ;;  %v3454_v24 = vld [vmem:[%s5419_s7 + $0x28] sm:$0xff]  ;;  %v3461_v35 = vld [vmem:[%s5419_s7 + $0x60] sm:$0xff]  ;;  %2221 = vmatpush.bf16.msrb.mxu2 %v3479_v45  ;;  %v3459_v9 = vld [vmem:[%s5419_s7 + $0x50] sm:$0xff] }
 0x49e   :  { %1401 = vst [vmem:[#allocation1 + $0x9] sm:$0xff] %v4853_v43  ;;  %v3453_v18 = vld [vmem:[%s5419_s7 + $0x20] sm:$0xff]  ;;  %v3478_v48 = vld [vmem:[%s5419_s7 + $0xe8] sm:$0xff] }
 0x49f   :  { %1398 = vst.msk [vmem:[#allocation3 + $0x32] ss:$8 sm:$0x3] %vm4825_vm8, %v1391_v26  ;;  %v1513_v13 = vrot.slane %v1333_v56, 1  ;;  %v1514_v40 = vrot.slane %v1334_v20, 1  ;;  %2202 = vmatpush.bf16.msra.mxu1 %v3471_v12  ;;  %v3460_v26 = vld [vmem:[%s5419_s7 + $0x58] sm:$0xff] }
 0x4a0   :  { %1534 = vst.msk [vmem:[#allocation3 + $0x11] ss:$8 sm:$0x3] %vm4825_vm8, %v1529_v33  ;;  %v3451_v33 = vld [vmem:[%s5419_s7 + $0x10] sm:$0xff] }
 0x4a1   :  { %1460 = vst.msk [vmem:[#allocation3 + $0x35] ss:$8 sm:$0x3] %vm4825_vm8, %v1453_v0  ;;  %v4920_v63 = vmax.f32 %v1334_v20, %v1514_v40  ;;  %v4922_v53 = vmax.f32 %v1333_v56, %v1513_v13  ;;  %2222 = vmatpush.bf16.msrb.mxu2 %v3478_v48  ;;  %v3458_v56 = vld [vmem:[%s5419_s7 + $0x48] sm:$0xff]  ;;  %v3457_v0 = vld [vmem:[%s5419_s7 + $0x40] sm:$0xff] }
 0x4a2   :  { %v1279_v17 = vpop.permute.xlu0 %1278  ;;  %v3450_v20 = vld [vmem:[%s5419_s7 + $0x8] sm:$0xff]  ;;  %v3449_v13 = vld [vmem:[%s5419_s7] sm:$0xff] }
 0x4a3   :  { %v1528_v8 = vrot.slane %v4920_v63, 7  ;;  %v1288_v25 = vsel %vm1280_vm9, %v1277_v39, %v1279_v17  ;;  %v1320_v42 = vsel %vm1280_vm9, %v1279_v17, %v1277_v39  ;;  %v1263_v22 = vpop.permute.xlu1 %1262 }
 0x4a4   :  { %v1335_v61 = vmax.f32 %v4807_v38, %v1288_v25  ;;  %v1336_v44 = vmax.f32 %v4817_v4, %v1320_v42  ;;  %v1284_v55 = vsel %vm1280_vm9, %v1261_v50, %v1263_v22  ;;  %v1316_v57 = vsel %vm1280_vm9, %v1263_v22, %v1261_v50  ;;  %v3470_v50 = vld [vmem:[%s5419_s7 + $0xa8] sm:$0xff]  ;;  %v3468_v42 = vld [vmem:[%s5419_s7 + $0x98] sm:$0xff] }
 0x4a5   :  { %v1403_v15 = vld [vmem:[#allocation1 + $0x4] ss:$9 sm:$0xff]  ;;  %v1327_v6 = vmax.f32 %v4804_v21, %v1284_v55  ;;  %v1328_v46 = vmax.f32 %v4819_v1, %v1316_v57  ;;  %v1530_v59 = vsel %vm1374_vm10, %v4922_v53, %v1528_v8  ;;  %2203 = vmatpush.bf16.msra.mxu1 %v3470_v50 }
 0x4a6   :  { %1404 = vst [vmem:[#allocation1] sm:$0xff] %v4855_v51  ;;  %v1590_v23 = vrot.slane %v1335_v61, 1  ;;  %v1591_v47 = vrot.slane %v1336_v44, 1  ;;  %v3476_v22 = vld [vmem:[%s5419_s7 + $0xd8] sm:$0xff]  ;;  %v3495_v55 = vld [vmem:[%s5419_s7 + $0x170] sm:$0xff] }
 0x4a7   :  { %1405 = vst [vmem:[#allocation1 + $0x9] sm:$0xff] %v4849_v16  ;;  %v1588_v38 = vrot.slane %v1327_v6, 1  ;;  %v1589_v4 = vrot.slane %v1328_v46, 1  ;;  %v3467_v57 = vld [vmem:[%s5419_s7 + $0x90] sm:$0xff] }
 0x4a8   :  { %1410 = vst.msk [vmem:[#allocation3 + $0x3] ss:$8 sm:$0x3] %vm4825_vm8, %v1403_v15  ;;  %v4939_v27 = vmax.f32 %v1336_v44, %v1591_v47  ;;  %v4945_v1 = vmax.f32 %v1335_v61, %v1590_v23  ;;  %v3487_v44 = vld [vmem:[%s5419_s7 + $0x130] sm:$0xff]  ;;  %v3474_v23 = vld [vmem:[%s5419_s7 + $0xc8] sm:$0xff]  ;;  %v3485_v47 = vld [vmem:[%s5419_s7 + $0x120] sm:$0xff] }
 0x4a9   :  { %1537 = vst.msk [vmem:[#allocation3 + $0x41] ss:$8 sm:$0x3] %vm4825_vm8, %v1530_v59  ;;  %v4943_v21 = vmax.f32 %v1328_v46, %v1589_v4  ;;  %v4948_v62 = vmax.f32 %v1327_v6, %v1588_v38  ;;  %v3475_v15 = vld [vmem:[%s5419_s7 + $0xd0] sm:$0xff]  ;;  %v3486_v6 = vld [vmem:[%s5419_s7 + $0x128] sm:$0xff]  ;;  %v3493_v38 = vld [vmem:[%s5419_s7 + $0x160] sm:$0xff] }
 0x4aa   :  { %v1605_v19 = vrot.slane %v4939_v27, 7  ;;  %v3494_v46 = vld [vmem:[%s5419_s7 + $0x168] sm:$0xff] }
 0x4ab   :  { %v1604_v5 = vrot.slane %v4943_v21, 7  ;;  %v3466_v59 = vld [vmem:[%s5419_s7 + $0x88] sm:$0xff] }
 0x4ac   :  { %v1607_v10 = vsel %vm1374_vm10, %v4945_v1, %v1605_v19  ;;  %v3465_v19 = vld [vmem:[%s5419_s7 + $0x80] sm:$0xff] }
 0x4ad   :  { %1614 = vst.msk [vmem:[#allocation3 + $0x45] ss:$8 sm:$0x3] %vm4825_vm8, %v1607_v10  ;;  %v1606_v7 = vsel %vm1374_vm10, %v4948_v62, %v1604_v5  ;;  %v3473_v5 = vld [vmem:[%s5419_s7 + $0xc0] sm:$0xff]  ;;  %v3484_v10 = vld [vmem:[%s5419_s7 + $0x118] sm:$0xff] }
 0x4ae   :  { %v1406_v32 = vld [vmem:[#allocation1 + $0x4] ss:$9 sm:$0xff]  ;;  %1611 = vst.msk [vmem:[#allocation3 + $0x15] ss:$8 sm:$0x3] %vm4825_vm8, %v1606_v7 }
 0x4af   :  { %1415 = vst [vmem:[#allocation1] sm:$0xff] %v4851_v34  ;;  %v3492_v7 = vld [vmem:[%s5419_s7 + $0x158] sm:$0xff] }
 0x4b0   :  { %1416 = vst [vmem:[#allocation1 + $0x9] sm:$0xff] %v4853_v43 }
 0x4b1   :  { %1413 = vst.msk [vmem:[#allocation3 + $0x33] ss:$8 sm:$0x3] %vm4825_vm8, %v1406_v32 }
 0x4b7   :  { %v1418_v58 = vld [vmem:[#allocation1 + $0x6] ss:$9 sm:$0xff] }
 0x4b8   :  { %1419 = vst [vmem:[#allocation1] sm:$0xff] %v4855_v51 }
 0x4b9   :  { %1420 = vst [vmem:[#allocation1 + $0x9] sm:$0xff] %v4849_v16 }
 0x4ba   :  { %1425 = vst.msk [vmem:[#allocation3 + $0x4] ss:$8 sm:$0x3] %vm4825_vm8, %v1418_v58  ;;  %v3483_v58 = vld [vmem:[%s5419_s7 + $0x110] sm:$0xff] }
 0x4c0   :  { %v1421_v37 = vld [vmem:[#allocation1 + $0x6] ss:$9 sm:$0xff] }
 0x4c1   :  { %1428 = vst.msk [vmem:[#allocation3 + $0x34] ss:$8 sm:$0x3] %vm4825_vm8, %v1421_v37  ;;  %v3491_v37 = vld [vmem:[%s5419_s7 + $0x150] sm:$0xff] }
 0x4c2   :  { %1462 = vst [vmem:[#allocation1] sm:$0xff] %v4875_v60 }
 0x4c3   :  { %1463 = vst [vmem:[#allocation1 + $0x9] sm:$0xff] %v4873_v28 }
 0x4ca   :  { %v1465_v34 = vld [vmem:[#allocation1 + $0x2] ss:$9 sm:$0xff] }
 0x4cb   :  { %1472 = vst.msk [vmem:[#allocation3 + $0x6] ss:$8 sm:$0x3] %vm4825_vm8, %v1465_v34  ;;  %v3482_v34 = vld [vmem:[%s5419_s7 + $0x108] sm:$0xff] }
 0x4cc   :  { %1466 = vst [vmem:[#allocation1] sm:$0xff] %v4902_v11 }
 0x4cd   :  { %1467 = vst [vmem:[#allocation1 + $0x9] sm:$0xff] %v4896_v30 }
 0x4d4   :  { %v1468_v16 = vld [vmem:[#allocation1 + $0x2] ss:$9 sm:$0xff] }
 0x4d5   :  { %1477 = vst [vmem:[#allocation1] sm:$0xff] %v4875_v60 }
 0x4d6   :  { %1478 = vst [vmem:[#allocation1 + $0x9] sm:$0xff] %v4873_v28 }
 0x4d7   :  { %1475 = vst.msk [vmem:[#allocation3 + $0x36] ss:$8 sm:$0x3] %vm4825_vm8, %v1468_v16  ;;  %v3490_v16 = vld [vmem:[%s5419_s7 + $0x148] sm:$0xff] }
 0x4dd   :  { %v1480_v43 = vld [vmem:[#allocation1 + $0x4] ss:$9 sm:$0xff] }
 0x4de   :  { %1481 = vst [vmem:[#allocation1] sm:$0xff] %v4902_v11 }
 0x4df   :  { %1482 = vst [vmem:[#allocation1 + $0x9] sm:$0xff] %v4896_v30 }
 0x4e0   :  { %1487 = vst.msk [vmem:[#allocation3 + $0x7] ss:$8 sm:$0x3] %vm4825_vm8, %v1480_v43 }
 0x4e6   :  { %v1483_v51 = vld [vmem:[#allocation1 + $0x4] ss:$9 sm:$0xff] }
 0x4e7   :  { %1492 = vst [vmem:[#allocation1] sm:$0xff] %v4875_v60  ;;  %v3463_v60 = vld [vmem:[%s5419_s7 + $0x70] sm:$0xff]  ;;  %v1661_v43 = vld [vmem:[#allocation3] sm:$0xff]  ;;  %v1670_v50 = vld [vmem:[#allocation3 + $0x8] sm:$0xfe] }
 0x4e8   :  { %1493 = vst [vmem:[#allocation1 + $0x9] sm:$0xff] %v4873_v28  ;;  %v3455_v28 = vld [vmem:[%s5419_s7 + $0x30] sm:$0xff]  ;;  %2183 = vmatpush.bf16.msra.mxu0 %v3463_v60  ;;  %v1662_v60 = vld [vmem:[#allocation3 + $0x8] sm:$0xff] }
 0x4e9   :  { %1490 = vst.msk [vmem:[#allocation3 + $0x37] ss:$8 sm:$0x3] %vm4825_vm8, %v1483_v51  ;;  %2164 = vmatpush.bf16.msrb.mxu3 %v3455_v28  ;;  %v3489_v28 = vld [vmem:[%s5419_s7 + $0x140] sm:$0xff] }
 0x4ec   :  { %2184 = vmatpush.bf16.msra.mxu0 %v3462_v36 }
 0x4ed   :  { %2165 = vmatpush.bf16.msrb.mxu3 %v3454_v24 }
 0x4ef   :  { %v1495_v2 = vld [vmem:[#allocation1 + $0x6] ss:$9 sm:$0xff] }
 0x4f0   :  { %1496 = vst [vmem:[#allocation1] sm:$0xff] %v4902_v11  ;;  %2185 = vmatpush.bf16.msra.mxu0 %v3461_v35  ;;  %v3452_v11 = vld [vmem:[%s5419_s7 + $0x18] sm:$0xff]  ;;  %v1665_v45 = vld [vmem:[#allocation3 + $0x30] sm:$0xff] }
 0x4f1   :  { %1497 = vst [vmem:[#allocation1 + $0x9] sm:$0xff] %v4896_v30  ;;  %2166 = vmatpush.bf16.msrb.mxu3 %v3453_v18 }
 0x4f2   :  { %1502 = vst.msk [vmem:[#allocation3 + $0x10] ss:$8 sm:$0x3] %vm4825_vm8, %v1495_v2  ;;  %v3481_v2 = vld [vmem:[%s5419_s7 + $0x100] sm:$0xff] }
 0x4f4   :  { %2186 = vmatpush.bf16.msra.mxu0 %v3460_v26 }
 0x4f5   :  { %2167 = vmatpush.bf16.msrb.mxu3 %v3452_v11 }
 0x4f8   :  { %v1498_v30 = vld [vmem:[#allocation1 + $0x6] ss:$9 sm:$0xff]  ;;  %2187 = vmatpush.bf16.msra.mxu0 %v3459_v9 }
 0x4f9   :  { %1539 = vst [vmem:[#allocation1] sm:$0xff] %v4899_v41  ;;  %2168 = vmatpush.bf16.msrb.mxu3 %v3451_v33 }
 0x4fa   :  { %1540 = vst [vmem:[#allocation1 + $0x9] sm:$0xff] %v4894_v31 }
 0x4fb   :  { %1505 = vst.msk [vmem:[#allocation3 + $0x40] ss:$8 sm:$0x3] %vm4825_vm8, %v1498_v30 }
 0x4fc   :  { %2188 = vmatpush.bf16.msra.mxu0 %v3458_v56 }
 0x4fd   :  { %2169 = vmatpush.bf16.msrb.mxu3 %v3450_v20 }
 0x500   :  { %2189 = vmatpush.bf16.msra.mxu0 %v3457_v0 }
 0x501   :  { %v1542_v52 = vld [vmem:[#allocation1 + $0x2] ss:$9 sm:$0xff]  ;;  %2170 = vmatpush.bf16.msrb.mxu3 %v3449_v13 }
 0x502   :  { %1549 = vst.msk [vmem:[#allocation3 + $0x12] ss:$8 sm:$0x3] %vm4825_vm8, %v1542_v52 }
 0x503   :  { %1543 = vst [vmem:[#allocation1] sm:$0xff] %v4922_v53 }
 0x504   :  { %1544 = vst [vmem:[#allocation1 + $0x9] sm:$0xff] %v4920_v63 }
 0x50b   :  { %v1545_v40 = vld [vmem:[#allocation1 + $0x2] ss:$9 sm:$0xff] }
 0x50c   :  { %1552 = vst.msk [vmem:[#allocation3 + $0x42] ss:$8 sm:$0x3] %vm4825_vm8, %v1545_v40 }
 0x50d   :  { %1554 = vst [vmem:[#allocation1] sm:$0xff] %v4899_v41 }
 0x50e   :  { %1555 = vst [vmem:[#allocation1 + $0x9] sm:$0xff] %v4894_v31 }
 0x515   :  { %v1557_v39 = vld [vmem:[#allocation1 + $0x4] ss:$9 sm:$0xff] }
 0x516   :  { %1558 = vst [vmem:[#allocation1] sm:$0xff] %v4922_v53 }
 0x517   :  { %1559 = vst [vmem:[#allocation1 + $0x9] sm:$0xff] %v4920_v63 }
 0x518   :  { %1564 = vst.msk [vmem:[#allocation3 + $0x13] ss:$8 sm:$0x3] %vm4825_vm8, %v1557_v39 }
 0x51e   :  { %v1560_v17 = vld [vmem:[#allocation1 + $0x4] ss:$9 sm:$0xff] }
 0x51f   :  { %1569 = vst [vmem:[#allocation1] sm:$0xff] %v4899_v41  ;;  %v3477_v41 = vld [vmem:[%s5419_s7 + $0xe0] sm:$0xff] }
 0x520   :  { %1570 = vst [vmem:[#allocation1 + $0x9] sm:$0xff] %v4894_v31  ;;  %v3469_v31 = vld [vmem:[%s5419_s7 + $0xa0] sm:$0xff]  ;;  %2223 = vmatpush.bf16.msrb.mxu2 %v3477_v41 }
 0x521   :  { %1567 = vst.msk [vmem:[#allocation3 + $0x43] ss:$8 sm:$0x3] %vm4825_vm8, %v1560_v17  ;;  %2204 = vmatpush.bf16.msra.mxu1 %v3469_v31  ;;  %v1677_v31 = vld [vmem:[#allocation3] sm:$0xfc] }
 0x524   :  { %2224 = vmatpush.bf16.msrb.mxu2 %v3476_v22  ;;  %v1735_v22 = vrot.slane %v1677_v31, 2 }
 0x525   :  { %2205 = vmatpush.bf16.msra.mxu1 %v3468_v42 }
 0x527   :  { %v1572_v8 = vld [vmem:[#allocation1 + $0x6] ss:$9 sm:$0xff] }
 0x528   :  { %1573 = vst [vmem:[#allocation1] sm:$0xff] %v4922_v53  ;;  %v3496_v53 = vld [vmem:[%s5419_s7 + $0x178] sm:$0xff]  ;;  %2225 = vmatpush.bf16.msrb.mxu2 %v3475_v15 }
 0x529   :  { %1574 = vst [vmem:[#allocation1 + $0x9] sm:$0xff] %v4920_v63  ;;  %v3488_v63 = vld [vmem:[%s5419_s7 + $0x138] sm:$0xff]  ;;  %2258 = vmatpush.bf16.msrb.mxu0 %v3496_v53  ;;  %2206 = vmatpush.bf16.msra.mxu1 %v3467_v57  ;;  %v1678_v53 = vld [vmem:[#allocation3 + $0x8] sm:$0xfc] }
 0x52a   :  { %1579 = vst.msk [vmem:[#allocation3 + $0x14] ss:$8 sm:$0x3] %vm4825_vm8, %v1572_v8  ;;  %2239 = vmatpush.bf16.msra.mxu3 %v3488_v63 }
 0x52c   :  { %2226 = vmatpush.bf16.msrb.mxu2 %v3474_v23 }
 0x52d   :  { %2259 = vmatpush.bf16.msrb.mxu0 %v3495_v55  ;;  %2207 = vmatpush.bf16.msra.mxu1 %v3466_v59  ;;  %v1738_v55 = vrot.slane %v1678_v53, 2 }
 0x52e   :  { %2240 = vmatpush.bf16.msra.mxu3 %v3487_v44 }
 0x530   :  { %v1575_v25 = vld [vmem:[#allocation1 + $0x6] ss:$9 sm:$0xff]  ;;  %2227 = vmatpush.bf16.msrb.mxu2 %v3473_v5 }
 0x531   :  { %1616 = vst [vmem:[#allocation1] sm:$0xff] %v4948_v62  ;;  %2260 = vmatpush.bf16.msrb.mxu0 %v3494_v46  ;;  %2208 = vmatpush.bf16.msra.mxu1 %v3465_v19 }
 0x532   :  { %1617 = vst [vmem:[#allocation1 + $0x9] sm:$0xff] %v4943_v21  ;;  %2241 = vmatpush.bf16.msra.mxu3 %v3486_v6 }
 0x533   :  { %1582 = vst.msk [vmem:[#allocation3 + $0x44] ss:$8 sm:$0x3] %vm4825_vm8, %v1575_v25 }
 0x535   :  { %2261 = vmatpush.bf16.msrb.mxu0 %v3493_v38  ;;  %v1673_v38 = vld [vmem:[#allocation3 + $0x30] sm:$0xfe] }
 0x536   :  { %2242 = vmatpush.bf16.msra.mxu3 %v3485_v47 }
 0x539   :  { %v1619_v61 = vld [vmem:[#allocation1 + $0x2] ss:$9 sm:$0xff]  ;;  %2262 = vmatpush.bf16.msrb.mxu0 %v3492_v7 }
 0x53a   :  { %1620 = vst [vmem:[#allocation1] sm:$0xff] %v4945_v1  ;;  %2243 = vmatpush.bf16.msra.mxu3 %v3484_v10  ;;  %v1708_v10 = vrot.slane %v1673_v38, 1  ;;  %v2291_v38 = vld [vmem:[%s5421_s9 + $0x8] sm:$0xff] }
 0x53b   :  { %1621 = vst [vmem:[#allocation1 + $0x9] sm:$0xff] %v4939_v27 }
 0x53c   :  { %1626 = vst.msk [vmem:[#allocation3 + $0x16] ss:$8 sm:$0x3] %vm4825_vm8, %v1619_v61 }
 0x53d   :  { %2263 = vmatpush.bf16.msrb.mxu0 %v3491_v37 }
 0x53e   :  { %2244 = vmatpush.bf16.msra.mxu3 %v3483_v58 }
 0x541   :  { %2264 = vmatpush.bf16.msrb.mxu0 %v3490_v16 }
 0x542   :  { %v1622_v4 = vld [vmem:[#allocation1 + $0x2] ss:$9 sm:$0xff]  ;;  %2245 = vmatpush.bf16.msra.mxu3 %v3482_v34 }
 0x543   :  { %1631 = vst [vmem:[#allocation1] sm:$0xff] %v4948_v62 }
 0x544   :  { %1632 = vst [vmem:[#allocation1 + $0x9] sm:$0xff] %v4943_v21 }
 0x545   :  { %1629 = vst.msk [vmem:[#allocation3 + $0x46] ss:$8 sm:$0x3] %vm4825_vm8, %v1622_v4  ;;  %2265 = vmatpush.bf16.msrb.mxu0 %v3489_v28  ;;  %v1674_v4 = vld [vmem:[#allocation3 + $0x38] sm:$0xfe] }
 0x546   :  { %2246 = vmatpush.bf16.msra.mxu3 %v3481_v2 }
 0x54b   :  { %v1634_v32 = vld [vmem:[#allocation1 + $0x4] ss:$9 sm:$0xff] }
 0x54c   :  { %1641 = vst.msk [vmem:[#allocation3 + $0x17] ss:$8 sm:$0x3] %vm4825_vm8, %v1634_v32  ;;  %v1711_v32 = vrot.slane %v1674_v4, 1 }
 0x54d   :  { %1635 = vst [vmem:[#allocation1] sm:$0xff] %v4945_v1 }
 0x54e   :  { %1636 = vst [vmem:[#allocation1 + $0x9] sm:$0xff] %v4939_v27 }
 0x553   :  { %v5169_v51 = vld [vmem:[#allocation3 + $0x10] sm:$0xff]  ;;  %v5171_v54 = vld [vmem:[#allocation3 + $0x18] sm:$0xff] }
 0x554   :  { %v1763_v14 = vpack.c.bf16 %v5169_v51, %v1661_v43  ;;  %v1764_v29 = vpack.c.bf16 %v5171_v54, %v1662_v60  ;;  %v1699_v18 = vrot.slane %v5169_v51, 1  ;;  %v1702_v48 = vrot.slane %v5171_v54, 1 }
 0x555   :  { %v1637_v3 = vld [vmem:[#allocation1 + $0x4] ss:$9 sm:$0xff]  ;;  %v1736_v63 = vrot.slane %v5169_v51, 2  ;;  %v1739_v42 = vrot.slane %v5171_v54, 2 }
 0x556   :  { %2171 = vmatmul.bf16.vlgmr.msrb.gmra.mxu3 %v1763_v14  ;;  %1644 = vst.msk [vmem:[#allocation3 + $0x47] ss:$8 sm:$0x3] %vm4825_vm8, %v1637_v3  ;;  %2190 = vmatmul.bf16.vlgmr.msra.gmra.mxu0 %v1764_v29  ;;  %v1681_v14 = vld [vmem:[#allocation3 + $0x30] sm:$0xfc] }
 0x557   :  { %1646 = vst [vmem:[#allocation1] sm:$0xff] %v4948_v62  ;;  %v1666_v62 = vld [vmem:[#allocation3 + $0x38] sm:$0xff]  ;;  %v1737_v15 = vsel %vm1734_vm12, %v1735_v22, %v1736_v63  ;;  %v1740_v46 = vsel %vm1734_vm12, %v1738_v55, %v1739_v42 }
 0x558   :  { %1647 = vst [vmem:[#allocation1 + $0x9] sm:$0xff] %v4943_v21  ;;  %v1669_v21 = vld [vmem:[#allocation3] sm:$0xfe]  ;;  %v1682_v29 = vld [vmem:[#allocation3 + $0x38] sm:$0xfc] }
 0x559   :  { %v1698_v11 = vrot.slane %v1669_v21, 1 }
 0x55b   :  { %v1700_v56 = vsel %vm1697_vm11, %v1698_v11, %v1699_v18 }
 0x55d   :  { %v5187_v12 = vld [vmem:[#allocation3 + $0x40] sm:$0xff]  ;;  %v5190_v24 = vld [vmem:[#allocation3 + $0x48] sm:$0xff] }
 0x55e   :  { %v1769_v30 = vpack.c.bf16 %v5187_v12, %v1665_v45  ;;  %v1770_v35 = vpack.c.bf16 %v5190_v24, %v1666_v62  ;;  %v1709_v19 = vrot.slane %v5187_v12, 1  ;;  %v1712_v5 = vrot.slane %v5190_v24, 1 }
 0x55f   :  { %v1649_v36 = vld [vmem:[#allocation1 + $0x6] ss:$9 sm:$0xff]  ;;  %v1746_v28 = vrot.slane %v5187_v12, 2  ;;  %v1749_v3 = vrot.slane %v5190_v24, 2 }
 0x560   :  { %1656 = vst.msk [vmem:[#allocation3 + $0x20] ss:$8 sm:$0x3] %vm4825_vm8, %v1649_v36  ;;  %v1710_v37 = vsel %vm1697_vm11, %v1708_v10, %v1709_v19  ;;  %v1713_v34 = vsel %vm1697_vm11, %v1711_v32, %v1712_v5  ;;  %v1745_v36 = vrot.slane %v1681_v14, 2 }
 0x561   :  { %1650 = vst [vmem:[#allocation1] sm:$0xff] %v4945_v1 }
 0x562   :  { %1651 = vst [vmem:[#allocation1 + $0x9] sm:$0xff] %v4939_v27  ;;  %v1701_v27 = vrot.slane %v1670_v50, 1 }
 0x564   :  { %v1703_v0 = vsel %vm1697_vm11, %v1701_v27, %v1702_v48 }
 0x566   :  { %2176 = vmatmul.bf16.gmra.mxu3 %v1769_v30  ;;  %2195 = vmatmul.bf16.gmra.mxu0 %v1770_v35  ;;  %v1748_v30 = vrot.slane %v1682_v29, 2  ;;  %v1747_v35 = vsel %vm1734_vm12, %v1745_v36, %v1746_v28 }
 0x567   :  { %v1671_v26 = vld [vmem:[#allocation3 + $0x20] sm:$0x1]  ;;  %v1672_v1 = vld [vmem:[#allocation3 + $0x28] sm:$0x1] }
 0x568   :  { %v1704_v9 = vrot.slane %v1671_v26, 1  ;;  %v1706_v52 = vrot.slane %v1672_v1, 1  ;;  %v1679_v40 = vld [vmem:[#allocation3 + $0x20] sm:$0x3]  ;;  %v1680_v8 = vld [vmem:[#allocation3 + $0x28] sm:$0x3]  ;;  %v1750_v50 = vsel %vm1734_vm12, %v1748_v30, %v1749_v3 }
 0x569   :  { %v1652_v33 = vld [vmem:[#allocation1 + $0x6] ss:$9 sm:$0xff]  ;;  %v1741_v25 = vrot.slane %v1679_v40, 2  ;;  %v1743_v41 = vrot.slane %v1680_v8, 2  ;;  %v3679_v8 = vld [vmem:[%s5420_s8] ss:$0 sm:$0xff] }
 0x56a   :  { %v1705_v20 = vsel %vm1697_vm11, %v1699_v18, %v1704_v9  ;;  %v1707_v13 = vsel %vm1697_vm11, %v1702_v48, %v1706_v52  ;;  %1659 = vst.msk [vmem:[#allocation3 + $0x50] ss:$8 sm:$0x3] %vm4825_vm8, %v1652_v33  ;;  %v2297_v9 = vld [vmem:[%s5421_s9 + $0x38] sm:$0xff]  ;;  %v2296_v33 = vld [vmem:[%s5421_s9 + $0x30] sm:$0xff] }
 0x56b   :  { %v1765_v39 = vpack.c.bf16 %v1705_v20, %v1700_v56  ;;  %v1766_v17 = vpack.c.bf16 %v1707_v13, %v1703_v0  ;;  %v1742_v61 = vsel %vm1734_vm12, %v1736_v63, %v1741_v25  ;;  %v1744_v57 = vsel %vm1734_vm12, %v1739_v42, %v1743_v41  ;;  %2309 = vmatpush.msrb.mxu1 %v2297_v9  ;;  %v2295_v56 = vld [vmem:[%s5421_s9 + $0x28] sm:$0xff] }
 0x56c   :  { %v1767_v6 = vpack.c.bf16 %v1742_v61, %v1737_v15  ;;  %v1768_v47 = vpack.c.bf16 %v1744_v57, %v1740_v46  ;;  %v2294_v61 = vld [vmem:[%s5421_s9 + $0x20] sm:$0xff] }
 0x56d   :  { %2209 = vmatmul.bf16.vlgmr.msra.gmra.mxu1 %v1765_v39  ;;  %2228 = vmatmul.bf16.vlgmr.msrb.gmra.mxu2 %v1766_v17  ;;  %v2322_v46 = vld [vmem:[%s5422_s10] sm:$0xf] }
 0x56e   :  { %2310 = vmatpush.msrb.mxu1 %v2296_v33  ;;  %3271 = vmatpush.msk.msra.mxu2 %vm2327_vm13, %v2322_v46 }
 0x570   :  { %2311 = vmatpush.msrb.mxu1 %v2295_v56  ;;  %3274 = vmatpush.msk.msrb.mxu2 %vm2327_vm13, %v2322_v46 }
 0x571   :  { %v1675_v44 = vld [vmem:[#allocation3 + $0x50] sm:$0x1]  ;;  %v1676_v49 = vld [vmem:[#allocation3 + $0x58] sm:$0x1] }
 0x572   :  { %v1714_v59 = vrot.slane %v1675_v44, 1  ;;  %v1716_v23 = vrot.slane %v1676_v49, 1  ;;  %v1683_v16 = vld [vmem:[#allocation3 + $0x50] sm:$0x3]  ;;  %v1684_v54 = vld [vmem:[#allocation3 + $0x58] sm:$0x3]  ;;  %2312 = vmatpush.msrb.mxu1 %v2294_v61 }
 0x573   :  { %v1751_v2 = vrot.slane %v1683_v16, 2  ;;  %v1753_v60 = vrot.slane %v1684_v54, 2  ;;  %v2293_v49 = vld [vmem:[%s5421_s9 + $0x18] sm:$0xff] }
 0x574   :  { %v1715_v7 = vsel %vm1697_vm11, %v1709_v19, %v1714_v59  ;;  %v1717_v58 = vsel %vm1697_vm11, %v1712_v5, %v1716_v23  ;;  %2313 = vmatpush.msrb.mxu1 %v2293_v49 }
 0x575   :  { %v1771_v43 = vpack.c.bf16 %v1715_v7, %v1710_v37  ;;  %v1772_v51 = vpack.c.bf16 %v1717_v58, %v1713_v34  ;;  %v1752_v45 = vsel %vm1734_vm12, %v1746_v28, %v1751_v2  ;;  %v1754_v62 = vsel %vm1734_vm12, %v1749_v3, %v1753_v60  ;;  %v2290_v7 = vld [vmem:[%s5421_s9] sm:$0xff] }
 0x576   :  { %2247 = vmatmul.bf16.vlgmr.msra.gmra.mxu3 %v1767_v6  ;;  %2266 = vmatmul.bf16.vlgmr.msrb.gmra.mxu0 %v1768_v47  ;;  %v1773_v21 = vpack.c.bf16 %v1752_v45, %v1747_v35  ;;  %v1774_v18 = vpack.c.bf16 %v1754_v62, %v1750_v50  ;;  %v2292_v6 = vld [vmem:[%s5421_s9 + $0x10] sm:$0xff]  ;;  %s2911_s9 = sshll.u32 %s3762_s5, 4  ;;  %s2912_s9 = int_to_ptr.vmem [resolvable:$true] %s2911_s9 }
 0x577   :  { %2314 = vmatpush.msrb.mxu1 %v2292_v6 }
 0x579   :  { %2315 = vmatpush.msrb.mxu1 %v2291_v38 }
 0x57b   :  { %2316 = vmatpush.msrb.mxu1 %v2290_v7 }
 0x57d   :  { %2214 = vmatmul.bf16.gmra.mxu1 %v1771_v43  ;;  %2233 = vmatmul.bf16.gmra.mxu2 %v1772_v51 }
 0x57e   :  { %2384 = vmatpush.msra.mxu1 %v2297_v9 }
 0x580   :  { %2385 = vmatpush.msra.mxu1 %v2296_v33 }
 0x582   :  { %2386 = vmatpush.msra.mxu1 %v2295_v56 }
 0x584   :  { %2387 = vmatpush.msra.mxu1 %v2294_v61 }
 0x586   :  { %2252 = vmatmul.bf16.gmra.mxu3 %v1773_v21  ;;  %2271 = vmatmul.bf16.gmra.mxu0 %v1774_v18 }
 0x587   :  { %2388 = vmatpush.msra.mxu1 %v2293_v49 }
 0x589   :  { %2389 = vmatpush.msra.mxu1 %v2292_v6 }
 0x58b   :  { %2390 = vmatpush.msra.mxu1 %v2291_v38 }
 0x58d   :  { %2391 = vmatpush.msra.mxu1 %v2290_v7  ;;  %v2408_v7 = vld [vmem:[%s5423_s11] sm:$0x1]  ;;  %s3760_s11 = smov 60  }
 0x5d3   :  { %v2191_v48 = vpop.f32.mrf.mxu0 }
 0x5d9   :  { %v2172_v26 = vpop.f32.mrf.mxu3 }
 0x5da   :  { %v2173_v41 = vadd.f32 %v3679_v8, %v2172_v26 }
 0x5db   :  { %v2193_v12 = vpop.f32.mrf.mxu0 }
 0x5dc   :  { %v2192_v55 = vadd.f32 %v2191_v48, %v2173_v41 }
 0x5e1   :  { %v2174_v1 = vpop.f32.mrf.mxu3 }
 0x5e2   :  { %v2175_v25 = vadd.f32 %v3679_v8, %v2174_v1 }
 0x5e3   :  { %v2196_v11 = vpop.f32.mrf.mxu0 }
 0x5e4   :  { %v2194_v22 = vadd.f32 %v2193_v12, %v2175_v25 }
 0x5e9   :  { %v2177_v24 = vpop.f32.mrf.mxu3 }
 0x5ea   :  { %v2210_v52 = vpop.f32.mrf.mxu1  ;;  %v2178_v63 = vadd.f32 %v3679_v8, %v2177_v24 }
 0x5eb   :  { %v2198_v27 = vpop.f32.mrf.mxu0  ;;  %v2211_v59 = vadd.f32 %v2210_v52, %v2192_v55 }
 0x5ec   :  { %v2197_v15 = vadd.f32 %v2196_v11, %v2178_v63 }
 0x5f0   :  { %v2229_v20 = vpop.f32.mrf.mxu2 }
 0x5f1   :  { %v2179_v0 = vpop.f32.mrf.mxu3  ;;  %v2230_v4 = vadd.f32 %v2229_v20, %v2211_v59 }
 0x5f2   :  { %v2212_v40 = vpop.f32.mrf.mxu1  ;;  %v2180_v19 = vadd.f32 %v3679_v8, %v2179_v0 }
 0x5f3   :  { %v2267_v13 = vpop.f32.mrf.mxu0  ;;  %v2213_v57 = vadd.f32 %v2212_v40, %v2194_v22 }
 0x5f4   :  { %v2199_v43 = vadd.f32 %v2198_v27, %v2180_v19 }
 0x5f8   :  { %v2231_v39 = vpop.f32.mrf.mxu2 }
 0x5f9   :  { %v2248_v17 = vpop.f32.mrf.mxu3  ;;  %v2232_v23 = vadd.f32 %v2231_v39, %v2213_v57 }
 0x5fa   :  { %v2215_v53 = vpop.f32.mrf.mxu1  ;;  %v2249_v37 = vadd.f32 %v2248_v17, %v2230_v4 }
 0x5fb   :  { %v2269_v31 = vpop.f32.mrf.mxu0  ;;  %v2216_v47 = vadd.f32 %v2215_v53, %v2197_v15 }
 0x5fc   :  { %v2268_v2 = vadd.f32 %v2267_v13, %v2249_v37 }
 0x5fe   :  { %v2277_v36 = vsel %vm412_vm2, %v2268_v2, 0.0 }
 0x600   :  { %v2234_v44 = vpop.f32.mrf.mxu2 }
 0x601   :  { %v2250_v42 = vpop.f32.mrf.mxu3  ;;  %v2235_v5 = vadd.f32 %v2234_v44, %v2216_v47 }
 0x602   :  { %v2251_v10 = vadd.f32 %v2250_v42, %v2232_v23  ;;  %v2217_v16 = vpop.f32.mrf.mxu1 }
 0x603   :  { %v2272_v32 = vpop.f32.mrf.mxu0  ;;  %v2218_v14 = vadd.f32 %v2217_v16, %v2199_v43  ;;  %v3680_v16 = vld [vmem:[%s5424_s12] ss:$0 sm:$0xff]  ;;  %s3761_s12 = smov 124  }
 0x604   :  { %v2270_v51 = vadd.f32 %v2269_v31, %v2251_v10 }
 0x606   :  { %v2278_v28 = vsel %vm412_vm2, %v2270_v51, 0.0 }
 0x607   :  { %v2279_v62 = vadd.f32 %v2278_v28, %v2277_v36 }
 0x608   :  { %v2236_v54 = vpop.f32.mrf.mxu2 }
 0x609   :  { %v2253_v58 = vpop.f32.mrf.mxu3  ;;  %v2237_v29 = vadd.f32 %v2236_v54, %v2218_v14 }
 0x60a   :  { %v2254_v34 = vadd.f32 %v2253_v58, %v2235_v5 }
 0x60b   :  { %v2274_v35 = vpop.f32.mrf.mxu0 }
 0x60c   :  { %v2273_v60 = vadd.f32 %v2272_v32, %v2254_v34 }
 0x60e   :  { %v2280_v45 = vsel %vm412_vm2, %v2273_v60, 0.0 }
 0x60f   :  { %v2281_v50 = vadd.f32 %v2280_v45, %v2279_v62 }
 0x611   :  { %v2255_v3 = vpop.f32.mrf.mxu3 }
 0x612   :  { %v2256_v30 = vadd.f32 %v2255_v3, %v2237_v29 }
 0x614   :  { %v2275_v21 = vadd.f32 %v2274_v35, %v2256_v30 }
 0x616   :  { %v2282_v18 = vsel %vm412_vm2, %v2275_v21, 0.0 }
 0x617   :  { %v2283_v48 = vadd.f32 %v2282_v18, %v2281_v50  ;;  %v3528_v50 = vld [vmem:[%s5425_s13 + $0xf8] sm:$0xff]  ;;  %v3503_v18 = vld [vmem:[%s5425_s13 + $0x30] sm:$0xff] }
 0x619   :  { %v2284_v26 = vrot.slane %v2283_v48, 4 }
 0x61b   :  { %v2285_v12 = vadd.f32 %v2284_v26, %v2283_v48  ;;  %v3527_v48 = vld [vmem:[%s5425_s13 + $0xf0] sm:$0xff]  ;;  %v3512_v26 = vld [vmem:[%s5425_s13 + $0x78] sm:$0xff] }
 0x61c   :  { %2827 = vmatpush.bf16.msra.mxu0 %v3512_v26  ;;  %v3522_v26 = vld [vmem:[%s5425_s13 + $0xc8] sm:$0xff] }
 0x61d   :  { %v2286_v1 = vrot.slane %v2285_v12, 2 }
 0x61f   :  { %v2287_v11 = vadd.f32 %v2286_v1, %v2285_v12  ;;  %v3502_v12 = vld [vmem:[%s5425_s13 + $0x28] sm:$0xff] }
 0x620   :  { %v3526_v1 = vld [vmem:[%s5425_s13 + $0xe8] sm:$0xff] }
 0x621   :  { %v2288_v24 = vrot.slane %v2287_v11, 1 }
 0x623   :  { %v2289_v9 = vadd.f32 %v2288_v24, %v2287_v11  ;;  %v3501_v24 = vld [vmem:[%s5425_s13 + $0x20] sm:$0xff] }
 0x625   :  { %3270 = vmatmul.msk.f32.vlgmr.msrb.gmra.mxu1 %vm412_vm2, %v2289_v9 }
 0x626   :  { %2853 = vmatpush.bf16.msrb.mxu1 %v3528_v50  ;;  %v3523_v50 = vld [vmem:[%s5425_s13 + $0xd0] sm:$0xff] }
 0x62a   :  { %2854 = vmatpush.bf16.msrb.mxu1 %v3527_v48  ;;  %v3520_v48 = vld [vmem:[%s5425_s13 + $0xb8] sm:$0xff] }
 0x62e   :  { %2855 = vmatpush.bf16.msrb.mxu1 %v3526_v1  ;;  %v3519_v1 = vld [vmem:[%s5425_s13 + $0xb0] sm:$0xff] }
 0x6a2   :  { %v2318_v27 = vpop.f32.mrf.mxu1 }
 0x6a3   :  { %v2321_v52 = vmul.f32 0.001953125, %v2318_v27  ;;  %v3525_v27 = vld [vmem:[%s5425_s13 + $0xe0] sm:$0xff] }
 0x6a4   :  { %2856 = vmatpush.bf16.msrb.mxu1 %v3525_v27  ;;  %v3507_v27 = vld [vmem:[%s5425_s13 + $0x50] sm:$0xff] }
 0x6a5   :  { %3272 = vmatmul.msk.f32.vlgmr.msra.gmra.mxu2 %vm2323_vm14, %v2321_v52 }
 0x6a6   :  { %2840 = vmatpush.bf16.msra.mxu2 %v3520_v48 }
 0x6aa   :  { %2841 = vmatpush.bf16.msra.mxu2 %v3519_v1 }
 0x728   :  { %v2348_v33 = vpop.f32.mrf.mxu2 }
 0x729   :  { %v2351_v56 = vperm.slane %v2348_v33, 0 }
 0x72b   :  { %v2352_v20 = vsub.f32 %v2268_v2, %v2351_v56  ;;  %v2353_v0 = vsub.f32 %v2270_v51, %v2351_v56  ;;  %v2354_v13 = vsub.f32 %v2273_v60, %v2351_v56  ;;  %v2355_v40 = vsub.f32 %v2275_v21, %v2351_v56  ;;  %v3504_v21 = vld [vmem:[%s5425_s13 + $0x38] sm:$0xff] }
 0x72c   :  { %2814 = vmatpush.bf16.msrb.mxu3 %v3504_v21  ;;  %v3511_v21 = vld [vmem:[%s5425_s13 + $0x70] sm:$0xff] }
 0x72d   :  { %v2356_v39 = vmul.f32 %v2352_v20, %v2352_v20  ;;  %v2357_v17 = vmul.f32 %v2353_v0, %v2353_v0  ;;  %v2358_v8 = vmul.f32 %v2354_v13, %v2354_v13  ;;  %v2359_v25 = vmul.f32 %v2355_v40, %v2355_v40  ;;  %2828 = vmatpush.bf16.msra.mxu0 %v3511_v21 }
 0x72f   :  { %v2360_v31 = vsel %vm412_vm2, %v2356_v39, 0.0  ;;  %v2361_v41 = vsel %vm412_vm2, %v2357_v17, 0.0  ;;  %v2363_v53 = vsel %vm412_vm2, %v2358_v8, 0.0  ;;  %v2365_v22 = vsel %vm412_vm2, %v2359_v25, 0.0  ;;  %v3524_v8 = vld [vmem:[%s5425_s13 + $0xd8] sm:$0xff] }
 0x730   :  { %v2362_v63 = vadd.f32 %v2361_v41, %v2360_v31  ;;  %2815 = vmatpush.bf16.msrb.mxu3 %v3503_v18  ;;  %2857 = vmatpush.bf16.msrb.mxu1 %v3524_v8  ;;  %v3510_v18 = vld [vmem:[%s5425_s13 + $0x68] sm:$0xff]  ;;  %v3513_v8 = vld [vmem:[%s5425_s13 + $0x80] sm:$0xff] }
 0x731   :  { %2829 = vmatpush.bf16.msra.mxu0 %v3510_v18 }
 0x732   :  { %v2364_v42 = vadd.f32 %v2363_v53, %v2362_v63  ;;  %v3499_v63 = vld [vmem:[%s5425_s13 + $0x10] sm:$0xff] }
 0x734   :  { %v2366_v61 = vadd.f32 %v2365_v22, %v2364_v42  ;;  %2816 = vmatpush.bf16.msrb.mxu3 %v3502_v12  ;;  %2858 = vmatpush.bf16.msrb.mxu1 %v3523_v50  ;;  %v3509_v12 = vld [vmem:[%s5425_s13 + $0x60] sm:$0xff] }
 0x735   :  { %2830 = vmatpush.bf16.msra.mxu0 %v3509_v12 }
 0x736   :  { %v2367_v44 = vrot.slane %v2366_v61, 4 }
 0x738   :  { %v2368_v49 = vadd.f32 %v2367_v44, %v2366_v61  ;;  %2817 = vmatpush.bf16.msrb.mxu3 %v3501_v24  ;;  %2859 = vmatpush.bf16.msrb.mxu1 %v3522_v26  ;;  %v3508_v24 = vld [vmem:[%s5425_s13 + $0x58] sm:$0xff] }
 0x739   :  { %2831 = vmatpush.bf16.msra.mxu0 %v3508_v24 }
 0x73a   :  { %v2369_v55 = vrot.slane %v2368_v49, 2 }
 0x73c   :  { %v2370_v57 = vadd.f32 %v2369_v55, %v2368_v49 }
 0x73d   :  { %2832 = vmatpush.bf16.msra.mxu0 %v3507_v27 }
 0x73e   :  { %v2371_v15 = vrot.slane %v2370_v57, 1 }
 0x740   :  { %v2372_v6 = vadd.f32 %v2371_v15, %v2370_v57 }
 0x742   :  { %3273 = vmatmul.msk.f32.vlgmr.msra.gmra.mxu1 %vm412_vm2, %v2372_v6 }
 0x7bf   :  { %v2393_v46 = vpop.f32.mrf.mxu1 }
 0x7c0   :  { %v2396_v59 = vmul.f32 0.001953125, %v2393_v46 }
 0x7c2   :  { %v2397_v23 = vadd.f32 1e-05, %v2396_v59 }
 0x7c4   :  { %3717 = vrsqrt.f32 %v2397_v23  ;;  %vm2404_vm1 = vweird.f32 %v2397_v23 }
 0x7ca   :  { %v3718_v47 = vpop.eup %3717 }
 0x7cb   :  { %v2399_v38 = vmul.f32 %v3718_v47, %v2397_v23  ;;  %vm2405_vm15 = vweird.f32 %v3718_v47 }
 0x7cc   :  { %vm2406_vm3 = vmor %vm2404_vm1, %vm2405_vm15 }
 0x7cd   :  { %v2400_v4 = vmul.f32 %v3718_v47, %v2399_v38 }
 0x7cf   :  { %v2401_v19 = vmul.f32 0.5, %v2400_v4 }
 0x7d1   :  { %v2402_v5 = vsub.f32 1.5, %v2401_v19 }
 0x7d3   :  { %v2403_v10 = vmul.f32 %v3718_v47, %v2402_v5 }
 0x7d5   :  { %v2407_v32 = vsel %vm2406_vm3, %v3718_v47, %v2403_v10  ;;  %v3498_v47 = vld [vmem:[%s5425_s13 + $0x8] sm:$0xff] }
 0x7d6   :  { %v2409_v58 = vmul.f32 %v2408_v7, %v2407_v32 }
 0x7d8   :  { %3275 = vmatmul.msk.f32.vlgmr.msrb.gmra.mxu2 %vm2323_vm14, %v2409_v58 }
 0x85b   :  { %v2430_v37 = vpop.f32.mrf.mxu2 }
 0x85c   :  { %v2433_v34 = vperm.slane %v2430_v37, 0 }
 0x85e   :  { %v2434_v43 = vmul.f32 %v2433_v34, %v2352_v20  ;;  %v2435_v51 = vmul.f32 %v2433_v34, %v2353_v0  ;;  %v2436_v54 = vmul.f32 %v2433_v34, %v2354_v13  ;;  %v2437_v2 = vmul.f32 %v2433_v34, %v2355_v40  ;;  %v3500_v40 = vld [vmem:[%s5425_s13 + $0x18] sm:$0xff] }
 0x85f   :  { %2818 = vmatpush.bf16.msrb.mxu3 %v3500_v40 }
 0x860   :  { %v2442_v14 = vadd.f32 %v3680_v16, %v2434_v43  ;;  %v2443_v60 = vadd.f32 %v3680_v16, %v2435_v51  ;;  %v2444_v28 = vadd.f32 %v3680_v16, %v2436_v54  ;;  %v2445_v29 = vadd.f32 %v3680_v16, %v2437_v2 }
 0x862   :  { %3719 = vtanh.f32 %v2442_v14 }
 0x863   :  { %3721 = vtanh.f32 %v2443_v60  ;;  %2819 = vmatpush.bf16.msrb.mxu3 %v3499_v63 }
 0x864   :  { %3723 = vtanh.f32 %v2444_v28 }
 0x865   :  { %3725 = vtanh.f32 %v2445_v29 }
 0x867   :  { %2820 = vmatpush.bf16.msrb.mxu3 %v3498_v47 }
 0x868   :  { %v3720_v3 = vpop.eup %3719 }
 0x869   :  { %v5269_v36 = vpop.eup %3721 }
 0x86a   :  { %v3724_v45 = vpop.eup %3723 }
 0x86b   :  { %v5271_v30 = vpop.eup %3725  ;;  %v3664_v62 = vpack.i.bf16 %v3724_v45, %v3720_v3 }
 0x86c   :  { %v3669_v35 = vpack.i.bf16 %v5271_v30, %v5269_v36 }
 0x86d   :  { %3665 = vrot.lane.b32.xlu2 %v3664_v62, %s3760_s11  ;;  %3660 = vrot.lane.b32.xlu1 %v3664_v62, %s3761_s12 }
 0x86e   :  { %3670 = vrot.lane.b32.xlu0 %v3669_v35, %s3761_s12 }
 0x875   :  { %3675 = vrot.lane.b32.xlu1 %v3669_v35, %s3760_s11  ;;  %v3497_v35 = vld [vmem:[%s5425_s13] sm:$0xff] }
 0x876   :  { %2821 = vmatpush.bf16.msrb.mxu3 %v3497_v35 }
 0x8c7   :  { %v3666_v11 = vpop.permute.xlu2 %3665 }
 0x8c8   :  { %v3668_v52 = vunpack.i.h.bf16 %v3666_v11  ;;  %v3667_v33 = vunpack.i.l.bf16 %v3666_v11  ;;  %v3521_v11 = vld [vmem:[%s5425_s13 + $0xc0] sm:$0xff] }
 0x8c9   :  { %2860 = vmatpush.bf16.msrb.mxu1 %v3521_v11 }
 0x8df   :  { %v3661_v9 = vpop.permute.xlu1 %3660 }
 0x8e0   :  { %v3663_v56 = vunpack.i.h.bf16 %v3661_v9  ;;  %v3662_v20 = vunpack.i.l.bf16 %v3661_v9  ;;  %v3671_v25 = vpop.permute.xlu0 %3670  ;;  %v3518_v9 = vld [vmem:[%s5425_s13 + $0xa8] sm:$0xff] }
 0x8e1   :  { %v3673_v61 = vunpack.i.h.bf16 %v3671_v25  ;;  %v3672_v44 = vunpack.i.l.bf16 %v3671_v25  ;;  %2842 = vmatpush.bf16.msra.mxu2 %v3518_v9 }
 0x8e2   :  { %v2481_v0 = vsel %vm2478_vm4, %v3663_v56, %v3668_v52  ;;  %v2479_v13 = vsel %vm2478_vm4, %v3662_v20, %v3667_v33  ;;  %v3517_v52 = vld [vmem:[%s5425_s13 + $0xa0] sm:$0xff]  ;;  %v3506_v33 = vld [vmem:[%s5425_s13 + $0x48] sm:$0xff]  ;;  %v3516_v56 = vld [vmem:[%s5425_s13 + $0x98] sm:$0xff] }
 0x8e3   :  { %v2485_v39 = vmax.f32 %v3724_v45, %v2481_v0  ;;  %v2483_v17 = vmax.f32 %v3720_v3, %v2479_v13  ;;  %2833 = vmatpush.bf16.msra.mxu0 %v3506_v33  ;;  %v3505_v20 = vld [vmem:[%s5425_s13 + $0x40] sm:$0xff]  ;;  %v3515_v0 = vld [vmem:[%s5425_s13 + $0x90] sm:$0xff]  ;;  %v3514_v13 = vld [vmem:[%s5425_s13 + $0x88] sm:$0xff] }
 0x8e5   :  { %v2490_v31 = vrot.slane %v2485_v39, 1  ;;  %v2489_v41 = vrot.slane %v2483_v17, 1  ;;  %2843 = vmatpush.bf16.msra.mxu2 %v3517_v52 }
 0x8e7   :  { %v2494_v53 = vmax.f32 %v2485_v39, %v2490_v31  ;;  %v2493_v42 = vmax.f32 %v2483_v17, %v2489_v41  ;;  %v3676_v22 = vpop.permute.xlu1 %3675  ;;  %2834 = vmatpush.bf16.msra.mxu0 %v3505_v20 }
 0x8e8   :  { %v3678_v49 = vunpack.i.h.bf16 %v3676_v22  ;;  %v3677_v55 = vunpack.i.l.bf16 %v3676_v22 }
 0x8e9   :  { %v2519_v57 = vrot.slane %v2493_v42, 6  ;;  %v2520_v15 = vrot.slane %v2494_v53, 5  ;;  %v2509_v6 = vrot.slane %v2493_v42, 2  ;;  %v2510_v46 = vrot.slane %v2494_v53, 1  ;;  %2844 = vmatpush.bf16.msra.mxu2 %v3516_v56 }
 0x8ea   :  { %v2482_v59 = vsel %vm2478_vm4, %v3673_v61, %v3678_v49  ;;  %v2480_v23 = vsel %vm2478_vm4, %v3672_v44, %v3677_v55  ;;  %v2505_v38 = vrot.slane %v2494_v53, 7  ;;  %v2516_v4 = vrot.slane %v2494_v53, 3  ;;  %v3530_v49 = vld [vmem:[%s5427_s15 + $0x8] sm:$0xff] }
 0x8eb   :  { %v2486_v19 = vmax.f32 %v5271_v30, %v2482_v59  ;;  %v2484_v5 = vmax.f32 %v5269_v36, %v2480_v23  ;;  %v2521_v10 = vsel %vm2506_vm5, %v2520_v15, %v2519_v57  ;;  %v2511_v7 = vsel %vm2506_vm5, %v2510_v46, %v2509_v6  ;;  %2897 = vmatpush.bf16.msra.mxu3 %v3530_v49  ;;  %v3529_v46 = vld [vmem:[%s5427_s15] sm:$0xff] }
 0x8ec   :  { %2522 = vrot.lane.b32.xlu1 %v2521_v10, %s3758_s21  ;;  %2512 = vrot.lane.b32.xlu2 %v2511_v7, %s3758_s21  ;;  %v2507_v32 = vsel %vm2506_vm5, %v2505_v38, %v2493_v42  ;;  %v2515_v58 = vrot.slane %v2493_v42, 4  ;;  %v3681_v23 = vld [vmem:[%s5426_s14] ss:$0 sm:$0xff] }
 0x8ed   :  { %v2498_v37 = vrot.slane %v2486_v19, 1  ;;  %v2497_v34 = vrot.slane %v2484_v5, 1  ;;  %2845 = vmatpush.bf16.msra.mxu2 %v3515_v0 }
 0x8ee   :  { %v5326_v16 = vsel %vm2506_vm5, %v2516_v4, %v2515_v58 }
 0x8ef   :  { %v2502_v43 = vmax.f32 %v2486_v19, %v2498_v37  ;;  %v2501_v51 = vmax.f32 %v2484_v5, %v2497_v34  ;;  %2898 = vmatpush.bf16.msra.mxu3 %v3529_v46  ;;  %v3682_v37 = vld [vmem:[%s5428_s16] ss:$0 sm:$0xff] }
 0x8f1   :  { %v2530_v54 = vrot.slane %v2501_v51, 2  ;;  %v2531_v2 = vrot.slane %v2502_v43, 1  ;;  %v2540_v14 = vrot.slane %v2501_v51, 6  ;;  %v2541_v60 = vrot.slane %v2502_v43, 5  ;;  %2846 = vmatpush.bf16.msra.mxu2 %v3514_v13 }
 0x8f2   :  { %v2536_v28 = vrot.slane %v2501_v51, 4  ;;  %v2537_v29 = vrot.slane %v2502_v43, 3  ;;  %v2527_v3 = vrot.slane %v2502_v43, 7 }
 0x8f3   :  { %v2532_v36 = vsel %vm2506_vm5, %v2531_v2, %v2530_v54  ;;  %v2542_v45 = vsel %vm2506_vm5, %v2541_v60, %v2540_v14 }
 0x8f4   :  { %2533 = vrot.lane.b32.xlu0 %v2532_v36, %s3758_s21  ;;  %2543 = vrot.lane.b32.xlu2 %v2542_v45, %s3758_s21  ;;  %v2538_v30 = vsel %vm2506_vm5, %v2537_v29, %v2536_v28  ;;  %v2528_v62 = vsel %vm2506_vm5, %v2527_v3, %v2501_v51 }
 0x8f5   :  { %2847 = vmatpush.bf16.msra.mxu2 %v3513_v8 }
 0x946   :  { %v2513_v40 = vpop.permute.xlu2 %2512 }
 0x947   :  { %v2546_v39 = vsel %vm412_vm2, %v2507_v32, %v2513_v40 }
 0x948   :  { %v2550_v17 = vpack.c.bf16 %v2546_v39, %v2546_v39 }
 0x94a   :  { %2822 = vmatmul.bf16.vlgmr.msrb.gmra.mxu3 %v2550_v17 }
 0x94e   :  { %v2544_v25 = vpop.permute.xlu2 %2543 }
 0x94f   :  { %v2549_v31 = vsel %vm412_vm2, %v2538_v30, %v2544_v25 }
 0x950   :  { %v2553_v41 = vpack.c.bf16 %v2549_v31, %v2549_v31 }
 0x952   :  { %2861 = vmatmul.bf16.vlgmr.msrb.gmra.mxu1 %v2553_v41 }
 0x95e   :  { %v2523_v63 = vpop.permute.xlu1 %2522 }
 0x95f   :  { %v2547_v53 = vsel %vm412_vm2, %v5326_v16, %v2523_v63 }
 0x960   :  { %v2551_v42 = vpack.c.bf16 %v2547_v53, %v2547_v53 }
 0x962   :  { %2835 = vmatmul.bf16.vlgmr.msra.gmra.mxu0 %v2551_v42 }
 0x966   :  { %v2534_v22 = vpop.permute.xlu0 %2533 }
 0x967   :  { %v2548_v61 = vsel %vm412_vm2, %v2528_v62, %v2534_v22  ;;  %vm2904_vm2 = vcmask 9216  }
 0x968   :  { %v2552_v44 = vpack.c.bf16 %v2548_v61, %v2548_v61 }
 0x96a   :  { %2848 = vmatmul.bf16.vlgmr.msra.gmra.mxu2 %v2552_v44 }
 0x9cd   :  { %v2823_v55 = vpop.f32.mrf.mxu3 }
 0x9ce   :  { %v2824_v38 = vadd.f32 %v3681_v23, %v2823_v55 }
 0x9cf   :  { %v2862_v57 = vpop.f32.mrf.mxu1 }
 0x9d5   :  { %v2825_v15 = vpop.f32.mrf.mxu3 }
 0x9d7   :  { %v2864_v6 = vpop.f32.mrf.mxu1 }
 0x9df   :  { %v2836_v59 = vpop.f32.mrf.mxu0 }
 0x9e0   :  { %v2837_v4 = vadd.f32 %v2836_v59, %v2824_v38 }
 0x9e7   :  { %v2838_v47 = vpop.f32.mrf.mxu0 }
 0x9ed   :  { %v2849_v19 = vpop.f32.mrf.mxu2 }
 0x9ee   :  { %v2850_v5 = vadd.f32 %v2849_v19, %v2837_v4 }
 0x9f0   :  { %v2863_v10 = vadd.f32 %v2862_v57, %v2850_v5 }
 0x9f2   :  { %3727 = vtanh.f32 %v2863_v10 }
 0x9f5   :  { %v2851_v7 = vpop.f32.mrf.mxu2 }
 0x9f8   :  { %v3728_v32 = vpop.eup %3727 }
 0x9f9   :  { %v2867_v58 = vpack.c.bf16 %v3728_v32, %v3728_v32 }
 0x9fb   :  { %3412 = vmatmul.msk.bf16.vlgmr.msra.gmra.mxu3 %vm58_vm0, %v2867_v58 }
 0xa7e   :  { %v2900_v34 = vpop.f32.mrf.mxu3 }
 0xa7f   :  { %v2901_v16 = vadd.f32 %v3682_v37, %v2900_v34 }
 0xa81   :  { %2905 = vst.msk [vmem:[#allocation4] sm:$0x3] %vm2904_vm2, %v2901_v16 }
 0xa82   :  { %2916 = dma.vmem_to_hbm [thread:$0]  %s2912_s9, 32, %s2914_s6, [#allocation5]  }
 0xa86   :  { %v2902_v43 = vpop.f32.mrf.mxu3 }
 0xa87   :  { %3753 = dma.done.wait [#allocation5], 32  }
 0xa88   :  { %3754 = vsyncadd [#allocation5], 4294967264 }
 0xa89   :  { %2921 = vsyncpa [#allocation5], 1 }

</bundles_post_ra>
